<compile_context>
chip_gen: v7x
topology: tpu7x:2x2x1
jax: 0.10.0
libtpu: 0.0.40
codegen_flags: <defaults>
</compile_context>

<pallas_src>
import math

import jax
import jax.numpy as jnp
from jax import lax
from jax.experimental import pallas as pl
from jax.experimental.pallas import tpu as pltpu
from jax.scipy.special import digamma, gammaln

_HALF_LN_2PI = 0.5 * math.log(2.0 * math.pi)


def _recip(x):
    """~f32-accurate reciprocal: EUP vrcp + one Newton step (VPU)."""
    r = pl.reciprocal(x, approx=True)
    return r * (2.0 - x * r)


def _lgamma_digamma_pos(x):
    """(lgamma(x), digamma(x)) for x >= 1.

    Fused 4-step recurrence: lgamma shift = log(P) with P = x(x+1)(x+2)(x+3),
    digamma shift = Q/P with Q = sum of triple products (VPU muls/adds only),
    then the Stirling series at z = x + 4 >= 5.  EUP cost: 2 log + 2 vrcp.
    P <= ~2.4e17 for alpha <= exp(10)+1, well inside f32 range.
    """
    z1 = x + 1.0
    z2 = x + 2.0
    z3 = x + 3.0
    z4 = x + 4.0
    a = x * z1
    b = z2 * z3
    prod = a * b                       # x(x+1)(x+2)(x+3)
    s01 = x + z1                       # 2x + 1
    s23 = z2 + z3                      # 2x + 5
    q = b * s01 + a * s23              # sum of the four triple products
    lg_shift = jnp.log(prod)           # = log x + log(x+1) + log(x+2) + log(x+3)
    dg_shift = q * _recip(prod)        # = 1/x + 1/(x+1) + 1/(x+2) + 1/(x+3)

    zi = _recip(z4)
    zi2 = zi * zi
    log_z = jnp.log(z4)
    lg = ((z4 - 0.5) * log_z - z4 + _HALF_LN_2PI
          + zi * (1.0 / 12.0 + zi2 * (-1.0 / 360.0
                   + zi2 * (1.0 / 1260.0 - zi2 * (1.0 / 1680.0))))
          - lg_shift)
    dg = (log_z - 0.5 * zi
          - zi2 * (1.0 / 12.0 - zi2 * (1.0 / 120.0 - zi2 * (1.0 / 252.0)))
          - dg_shift)
    return lg, dg


def _ev_stats_kernel(scale_ref, img_ref, txt_t_ref, row_ref, col_ref):
    """One row tile of the (N, N) evidential statistics.

    Emits per-row stats [S, sum lgamma(alpha), sum (alpha-1)*digamma(alpha), alpha_ii]
    and this tile's per-column partial sums of the same three slab quantities.
    logits_per_text == logits_per_image.T, so the text direction is recovered from the
    column sums in the epilogue — only one logits matrix is ever built.
    """
    i = pl.program_id(0)
    tm = img_ref.shape[0]
    n = txt_t_ref.shape[1]
    scale = scale_ref[0]

    # MXU: (tm, d) @ (d, n) with the resident RHS already K-major.
    dn = (((1,), (0,)), ((), ()))
    logits = scale * lax.dot_general(img_ref[...], txt_t_ref[...], dn,
                                     preferred_element_type=jnp.float32)   # (tm, n)
    alpha = jnp.exp(jnp.clip(logits, -10.0, 10.0)) + 1.0                   # >= 1
    lg_a, dg_a = _lgamma_digamma_pos(alpha)      # the only (tm, n) transcendentals
    w = (alpha - 1.0) * dg_a

    # Diagonal entries alpha_rr that fall in this row tile (broadcasted compare,
    # no (tm, n) int32 temporaries).
    rows = lax.broadcasted_iota(jnp.int32, (tm, 1), 0) + i * tm
    cols = lax.broadcasted_iota(jnp.int32, (1, n), 1)
    diag = jnp.sum(jnp.where(rows == cols, alpha, 0.0), axis=1, keepdims=True)  # (tm,1)

    # Image-direction (per-row) sufficient statistics.
    row_ref[:, 0:1] = jnp.sum(alpha, axis=1, keepdims=True)
    row_ref[:, 1:2] = jnp.sum(lg_a, axis=1, keepdims=True)
    row_ref[:, 2:3] = jnp.sum(w, axis=1, keepdims=True)
    row_ref[:, 3:4] = diag

    # Text-direction per-column partial sums for this row tile.
    cref = col_ref.at[0]                              # (3, n) view of this tile's block
    cref[0:1, :] = jnp.sum(alpha, axis=0, keepdims=True)
    cref[1:2, :] = jnp.sum(lg_a, axis=0, keepdims=True)
    cref[2:3, :] = jnp.sum(w, axis=0, keepdims=True)


def _vmem_bytes_estimate(tm, n, d):
    slab = tm * n * 4
    return (12 * slab                    # live (tm, n) f32 temporaries in the body
            + 2 * tm * d * 4             # double-buffered image-feature tile
            + 2 * d * n * 4              # resident (double-buffered) text features
            + 2 * (tm * 4 + 3 * n) * 4   # stats output blocks
            + (1 << 20))                 # slack


def _physical_vmem_bytes():
    try:
        return int(pltpu.get_tpu_info().vmem_capacity_bytes)
    except Exception:
        return 64 * 1024 * 1024          # conservative (v7x per-core VMEM)


def _pick_row_tile(n, d, max_rows, vmem_budget):
    """Largest row tile (multiple of 8, divides n, fits the VMEM budget)."""
    cands = [t for t in (512, 256, 128, 64, 32, 16, 8)
             if t <= min(n, max_rows) and n % t == 0]
    if not cands:
        return n                         # single full-height tile (block == full dims)
    for t in cands:
        if _vmem_bytes_estimate(t, n, d) <= vmem_budget:
            return t
    return cands[-1]


def _edl_from_stats(s, lg_sum, w_sum, d_diag, n, ann):
    """Per-sample EDL digamma loss from sufficient statistics (y == identity)."""
    n_f = jnp.float32(n)
    s_kl = s - d_diag + 1.0                                    # sum_j kl_alpha_j
    a = digamma(s) - digamma(d_diag)                           # sum_j y*(psi(S)-psi(alpha))
    first = gammaln(s_kl) - (lg_sum - gammaln(d_diag)) - gammaln(n_f)
    second = (w_sum - (d_diag - 1.0) * digamma(d_diag)) - digamma(s_kl) * (s_kl - n_f)
    return jnp.mean(a + ann * (first + second))


def ev_loss(image_features, text_features, logit_scale, epoch_num,
            annealing_step=20, block_rows=512, use_bf16_features=False):
    """world_size == 1, evidential == True path of EVLoss.forward."""
    # TODO(synk): world_size > 1 gather_features (torch.distributed all_gather) and the
    # host-side label cache have no single-device Pallas equivalent; forward-only
    # (no custom_vjp), so do not differentiate through this call.
    # TODO(synk): for N >~ 8k with large D on v7x, add a column-tile grid axis so the
    # working set is (TM, TN) instead of (TM, N).
    img = jnp.asarray(image_features, jnp.float32)
    txt = jnp.asarray(text_features, jnp.float32)
    n, d = img.shape
    txt_t = txt.T                                        # (d, n): K-major resident RHS
    if use_bf16_features:                                # optional v5e HBM-bandwidth saver
        img = img.astype(jnp.bfloat16)
        txt_t = txt_t.astype(jnp.bfloat16)

    phys_vmem = _physical_vmem_bytes()
    tm = _pick_row_tile(n, d, block_rows, int(phys_vmem * 0.7))
    assert n % tm == 0
    num_tiles = n // tm
    vmem_limit = int(min(max(2 * _vmem_bytes_estimate(tm, n, d), 32 << 20),
                         int(phys_vmem * 0.75)))

    # Logit scale as a prefetched SMEM scalar so traced / learnable values work.
    scale_arr = jnp.asarray(logit_scale, jnp.float32).reshape(1)

    grid_spec = pltpu.PrefetchScalarGridSpec(
        num_scalar_prefetch=1,                           # logit_scale
        grid=(num_tiles,),
        in_specs=[
            pl.BlockSpec((tm, d), lambda i, s: (i, 0)),  # image-feature row tile
            pl.BlockSpec((d, n), lambda i, s: (0, 0)),   # text features (D,N), resident
        ],
        out_specs=[
            pl.BlockSpec((tm, 4), lambda i, s: (i, 0)),      # per-row stats
            pl.BlockSpec((1, 3, n), lambda i, s: (i, 0, 0)),  # per-tile column partials
        ],
    )
    row_stats, col_stats = pl.pallas_call(
        _ev_stats_kernel,
        out_shape=(jax.ShapeDtypeStruct((n, 4), jnp.float32),
                   jax.ShapeDtypeStruct((num_tiles, 3, n), jnp.float32)),
        grid_spec=grid_spec,
        compiler_params=pltpu.CompilerParams(
            dimension_semantics=("parallel",),           # no carries: both v7x cores used
            vmem_limit_bytes=vmem_limit,
        ),
    )(scale_arr, img, txt_t)

    # O(n) epilogue in plain XLA with exact digamma/gammaln (negligible vs the
    # O(n^2) transcendental work done in the kernel).
    ann = jnp.minimum(jnp.float32(1.0),
                      jnp.asarray(epoch_num, jnp.float32) / jnp.float32(annealing_step))
    d_diag = row_stats[:, 3]                             # alpha_ii (same for both dirs)
    col = jnp.sum(col_stats, axis=0)                     # (3, n) reduced over row tiles
    loss_img = _edl_from_stats(row_stats[:, 0], row_stats[:, 1], row_stats[:, 2],
                               d_diag, n, ann)
    loss_txt = _edl_from_stats(col[0], col[1], col[2], d_diag, n, ann)
    return 0.5 * (loss_img + loss_txt)


def _ref_ev_loss(img, txt, logit_scale, epoch_num, annealing_step=20):
    """Pure-JAX reference mirroring the PyTorch module (world_size=1, evidential)."""
    n = img.shape[0]
    logits_i = logit_scale * img @ txt.T
    logits_t = logit_scale * txt @ img.T
    y = jnp.eye(n, dtype=jnp.float32)
    ann = min(1.0, epoch_num / annealing_step)

    def edl(lg):
        alpha = jnp.exp(jnp.clip(lg, -10.0, 10.0)) + 1.0
        s = jnp.sum(alpha, axis=1, keepdims=True)
        a = jnp.sum(y * (digamma(s) - digamma(alpha)), axis=1, keepdims=True)
        ka = (alpha - 1.0) * (1.0 - y) + 1.0
        ska = jnp.sum(ka, axis=1, keepdims=True)
        first = (gammaln(ska) - jnp.sum(gammaln(ka), axis=1, keepdims=True)
                 - gammaln(jnp.float32(n)))
        second = jnp.sum((ka - 1.0) * (digamma(ka) - digamma(ska)),
                         axis=1, keepdims=True)
        return jnp.mean(a + ann * (first + second))

    return 0.5 * (edl(logits_i) + edl(logits_t))


if __name__ == "__main__":
    key = jax.random.PRNGKey(0)
    k1, k2 = jax.random.split(key)
    N, D = 256, 32                      # batch (= num_classes) and feature dim
    image_features = jax.random.normal(k1, (N, D), jnp.float32)
    text_features = jax.random.normal(k2, (N, D), jnp.float32)
    # CLIP-style L2-normalized features (keeps logits in [-scale, scale]).
    image_features = image_features / jnp.linalg.norm(image_features, axis=-1, keepdims=True)
    text_features = text_features / jnp.linalg.norm(text_features, axis=-1, keepdims=True)
    logit_scale = 2.5
    epoch_num = 3

    # block_rows=128 forces 2 row tiles so the multi-tile column-partial path runs.
    loss = ev_loss(image_features, text_features, logit_scale, epoch_num, block_rows=128)
    loss = jax.block_until_ready(loss)

    ref = _ref_ev_loss(image_features, text_features, logit_scale, epoch_num)
    ref = jax.block_until_ready(ref)
    err = abs(float(loss) - float(ref))
    if not bool(jnp.isfinite(loss)) or err > 1e-2 * (1.0 + abs(float(ref))):
        raise AssertionError(f"mismatch: pallas={float(loss)} ref={float(ref)} err={err}")

    print("KERNEL_OK")
</pallas_src>

<mosaic_0001>
module attributes {stable_mosaic.version = 11 : i64} {
  func.func @_ev_stats_kernel(%arg0: i32, %arg1: memref<1xf32, #tpu.memory_space<smem>>, %arg2: memref<128x32xf32, #tpu.memory_space<vmem>>, %arg3: memref<32x256xf32, #tpu.memory_space<vmem>>, %arg4: memref<128x4xf32, #tpu.memory_space<vmem>>, %arg5: memref<1x3x256xf32, #tpu.memory_space<vmem>>) attributes {dimension_semantics = [#tpu.dimension_semantics<parallel>], iteration_bounds = array<i64: 2>, scalar_prefetch = 1 : i64, scratch_operands = 0 : i64, tpu.core_type = #tpu.core_type<tc>, window_params = [{transform_indices = @transform_0, window_bounds = array<i64: 128, 32>}, {pipeline_mode = #tpu.pipeline_mode<synchronous>, transform_indices = @transform_1, window_bounds = array<i64: 32, 256>}, {transform_indices = @transform_2, window_bounds = array<i64: 128, 4>}, {transform_indices = @transform_3, window_bounds = array<i64: 1, 3, 256>}]} {
    %c0 = arith.constant 0 : index
    %0 = memref.load %arg1[%c0] : memref<1xf32, #tpu.memory_space<smem>>
    %c0_0 = arith.constant 0 : index
    %c0_1 = arith.constant 0 : index
    %1 = vector.load %arg2[%c0_0, %c0_1] : memref<128x32xf32, #tpu.memory_space<vmem>>, vector<128x32xf32>
    %c0_2 = arith.constant 0 : index
    %c0_3 = arith.constant 0 : index
    %2 = vector.load %arg3[%c0_2, %c0_3] : memref<32x256xf32, #tpu.memory_space<vmem>>, vector<32x256xf32>
    %cst = arith.constant dense<0.000000e+00> : vector<128x256xf32>
    %3 = tpu.matmul %1, %2, %cst {dimension_numbers = #tpu.dot_dimension_numbers<[1], [0], [0], [1], [0, 0, 1, 1], [], []>} : vector<128x32xf32>, vector<32x256xf32>, vector<128x256xf32> -> vector<128x256xf32>
    %4 = vector.broadcast %0 : f32 to vector<128x256xf32>
    %5 = arith.mulf %4, %3 : vector<128x256xf32>
    %cst_4 = arith.constant -1.000000e+01 : f32
    %cst_5 = arith.constant 1.000000e+01 : f32
    %6 = vector.broadcast %cst_4 : f32 to vector<128x256xf32>
    %7 = arith.maximumf %6, %5 : vector<128x256xf32>
    %8 = vector.broadcast %cst_5 : f32 to vector<128x256xf32>
    %9 = arith.minimumf %8, %7 : vector<128x256xf32>
    %10 = math.exp %9 : vector<128x256xf32>
    %cst_6 = arith.constant 1.000000e+00 : f32
    %11 = vector.broadcast %cst_6 : f32 to vector<128x256xf32>
    %12 = arith.addf %10, %11 : vector<128x256xf32>
    %cst_7 = arith.constant 1.000000e+00 : f32
    %13 = vector.broadcast %cst_7 : f32 to vector<128x256xf32>
    %14 = arith.addf %12, %13 : vector<128x256xf32>
    %cst_8 = arith.constant 2.000000e+00 : f32
    %15 = vector.broadcast %cst_8 : f32 to vector<128x256xf32>
    %16 = arith.addf %12, %15 : vector<128x256xf32>
    %cst_9 = arith.constant 3.000000e+00 : f32
    %17 = vector.broadcast %cst_9 : f32 to vector<128x256xf32>
    %18 = arith.addf %12, %17 : vector<128x256xf32>
    %cst_10 = arith.constant 4.000000e+00 : f32
    %19 = vector.broadcast %cst_10 : f32 to vector<128x256xf32>
    %20 = arith.addf %12, %19 : vector<128x256xf32>
    %21 = arith.mulf %12, %14 : vector<128x256xf32>
    %22 = arith.mulf %16, %18 : vector<128x256xf32>
    %23 = arith.mulf %21, %22 : vector<128x256xf32>
    %24 = arith.addf %12, %14 : vector<128x256xf32>
    %25 = arith.addf %16, %18 : vector<128x256xf32>
    %26 = arith.mulf %22, %24 : vector<128x256xf32>
    %27 = arith.mulf %21, %25 : vector<128x256xf32>
    %28 = arith.addf %26, %27 : vector<128x256xf32>
    %29 = math.log %23 : vector<128x256xf32>
    %30 = tpu.reciprocal %23 {approx = true} : vector<128x256xf32> -> vector<128x256xf32>
    %31 = arith.mulf %23, %30 : vector<128x256xf32>
    %cst_11 = arith.constant 2.000000e+00 : f32
    %32 = vector.broadcast %cst_11 : f32 to vector<128x256xf32>
    %33 = arith.subf %32, %31 : vector<128x256xf32>
    %34 = arith.mulf %30, %33 : vector<128x256xf32>
    %35 = arith.mulf %28, %34 : vector<128x256xf32>
    %36 = tpu.reciprocal %20 {approx = true} : vector<128x256xf32> -> vector<128x256xf32>
    %37 = arith.mulf %20, %36 : vector<128x256xf32>
    %cst_12 = arith.constant 2.000000e+00 : f32
    %38 = vector.broadcast %cst_12 : f32 to vector<128x256xf32>
    %39 = arith.subf %38, %37 : vector<128x256xf32>
    %40 = arith.mulf %36, %39 : vector<128x256xf32>
    %41 = arith.mulf %40, %40 : vector<128x256xf32>
    %42 = math.log %20 : vector<128x256xf32>
    %cst_13 = arith.constant 5.000000e-01 : f32
    %43 = vector.broadcast %cst_13 : f32 to vector<128x256xf32>
    %44 = arith.subf %20, %43 : vector<128x256xf32>
    %45 = arith.mulf %44, %42 : vector<128x256xf32>
    %46 = arith.subf %45, %20 : vector<128x256xf32>
    %cst_14 = arith.constant 0.918938517 : f32
    %47 = vector.broadcast %cst_14 : f32 to vector<128x256xf32>
    %48 = arith.addf %46, %47 : vector<128x256xf32>
    %cst_15 = arith.constant 5.95238118E-4 : f32
    %49 = vector.broadcast %cst_15 : f32 to vector<128x256xf32>
    %50 = arith.mulf %41, %49 : vector<128x256xf32>
    %cst_16 = arith.constant 7.93650805E-4 : f32
    %51 = vector.broadcast %cst_16 : f32 to vector<128x256xf32>
    %52 = arith.subf %51, %50 : vector<128x256xf32>
    %53 = arith.mulf %41, %52 : vector<128x256xf32>
    %cst_17 = arith.constant -0.00277777785 : f32
    %54 = vector.broadcast %cst_17 : f32 to vector<128x256xf32>
    %55 = arith.addf %54, %53 : vector<128x256xf32>
    %56 = arith.mulf %41, %55 : vector<128x256xf32>
    %cst_18 = arith.constant 0.0833333358 : f32
    %57 = vector.broadcast %cst_18 : f32 to vector<128x256xf32>
    %58 = arith.addf %57, %56 : vector<128x256xf32>
    %59 = arith.mulf %40, %58 : vector<128x256xf32>
    %60 = arith.addf %48, %59 : vector<128x256xf32>
    %61 = arith.subf %60, %29 : vector<128x256xf32>
    %cst_19 = arith.constant 5.000000e-01 : f32
    %62 = vector.broadcast %cst_19 : f32 to vector<128x256xf32>
    %63 = arith.mulf %62, %40 : vector<128x256xf32>
    %64 = arith.subf %42, %63 : vector<128x256xf32>
    %cst_20 = arith.constant 0.0039682542 : f32
    %65 = vector.broadcast %cst_20 : f32 to vector<128x256xf32>
    %66 = arith.mulf %41, %65 : vector<128x256xf32>
    %cst_21 = arith.constant 0.00833333377 : f32
    %67 = vector.broadcast %cst_21 : f32 to vector<128x256xf32>
    %68 = arith.subf %67, %66 : vector<128x256xf32>
    %69 = arith.mulf %41, %68 : vector<128x256xf32>
    %cst_22 = arith.constant 0.0833333358 : f32
    %70 = vector.broadcast %cst_22 : f32 to vector<128x256xf32>
    %71 = arith.subf %70, %69 : vector<128x256xf32>
    %72 = arith.mulf %41, %71 : vector<128x256xf32>
    %73 = arith.subf %64, %72 : vector<128x256xf32>
    %74 = arith.subf %73, %35 : vector<128x256xf32>
    %cst_23 = arith.constant 1.000000e+00 : f32
    %75 = vector.broadcast %cst_23 : f32 to vector<128x256xf32>
    %76 = arith.subf %12, %75 : vector<128x256xf32>
    %77 = arith.mulf %76, %74 : vector<128x256xf32>
    %78 = tpu.iota {dimensions = array<i32: 0>} : vector<128x1xi32>
    %c128_i32 = arith.constant 128 : i32
    %79 = arith.muli %arg0, %c128_i32 : i32
    %80 = vector.broadcast %79 : i32 to vector<128x1xi32>
    %81 = arith.addi %78, %80 : vector<128x1xi32>
    %82 = tpu.iota {dimensions = array<i32: 1>} : vector<1x256xi32>
    %83 = vector.broadcast %81 : vector<128x1xi32> to vector<128x256xi32>
    %84 = vector.broadcast %82 : vector<1x256xi32> to vector<128x256xi32>
    %85 = arith.cmpi eq, %83, %84 : vector<128x256xi32>
    %cst_24 = arith.constant 0.000000e+00 : f32
    %86 = vector.broadcast %cst_24 : f32 to vector<128x256xf32>
    %87 = arith.select %85, %12, %86 : vector<128x256xi1>, vector<128x256xf32>
    %cst_25 = arith.constant dense<0.000000e+00> : vector<128xf32>
    %88 = vector.multi_reduction <add>, %87, %cst_25 [1] : vector<128x256xf32> to vector<128xf32>
    %89 = vector.shape_cast %88 : vector<128xf32> to vector<128x1xf32>
    %cst_26 = arith.constant dense<0.000000e+00> : vector<128xf32>
    %90 = vector.multi_reduction <add>, %12, %cst_26 [1] : vector<128x256xf32> to vector<128xf32>
    %91 = vector.shape_cast %90 : vector<128xf32> to vector<128x1xf32>
    %c0_27 = arith.constant 0 : index
    %c0_28 = arith.constant 0 : index
    %92 = vector.load %arg4[%c0_27, %c0_28] : memref<128x4xf32, #tpu.memory_space<vmem>>, vector<128x1xf32>
    tpu.vector_store %arg4[%c0_27, %c0_28], %91 {strides = array<i32>} : memref<128x4xf32, #tpu.memory_space<vmem>>, vector<128x1xf32>,
    %cst_29 = arith.constant dense<0.000000e+00> : vector<128xf32>
    %93 = vector.multi_reduction <add>, %61, %cst_29 [1] : vector<128x256xf32> to vector<128xf32>
    %94 = vector.shape_cast %93 : vector<128xf32> to vector<128x1xf32>
    %c0_30 = arith.constant 0 : index
    %c1 = arith.constant 1 : index
    %95 = vector.load %arg4[%c0_30, %c1] : memref<128x4xf32, #tpu.memory_space<vmem>>, vector<128x1xf32>
    tpu.vector_store %arg4[%c0_30, %c1], %94 {strides = array<i32>} : memref<128x4xf32, #tpu.memory_space<vmem>>, vector<128x1xf32>,
    %cst_31 = arith.constant dense<0.000000e+00> : vector<128xf32>
    %96 = vector.multi_reduction <add>, %77, %cst_31 [1] : vector<128x256xf32> to vector<128xf32>
    %97 = vector.shape_cast %96 : vector<128xf32> to vector<128x1xf32>
    %c0_32 = arith.constant 0 : index
    %c2 = arith.constant 2 : index
    %98 = vector.load %arg4[%c0_32, %c2] : memref<128x4xf32, #tpu.memory_space<vmem>>, vector<128x1xf32>
    tpu.vector_store %arg4[%c0_32, %c2], %97 {strides = array<i32>} : memref<128x4xf32, #tpu.memory_space<vmem>>, vector<128x1xf32>,
    %c0_33 = arith.constant 0 : index
    %c3 = arith.constant 3 : index
    %99 = vector.load %arg4[%c0_33, %c3] : memref<128x4xf32, #tpu.memory_space<vmem>>, vector<128x1xf32>
    tpu.vector_store %arg4[%c0_33, %c3], %89 {strides = array<i32>} : memref<128x4xf32, #tpu.memory_space<vmem>>, vector<128x1xf32>,
    %cst_34 = arith.constant dense<0.000000e+00> : vector<256xf32>
    %100 = vector.multi_reduction <add>, %12, %cst_34 [0] : vector<128x256xf32> to vector<256xf32>
    %101 = vector.shape_cast %100 : vector<256xf32> to vector<1x256xf32>
    %c0_i32 = arith.constant 0 : i32
    %c0_i32_35 = arith.constant 0 : i32
    %c0_i32_36 = arith.constant 0 : i32
    %102 = tpu.memref_slice %arg5[%c0_i32, %c0_i32_35, %c0_i32_36] : memref<1x3x256xf32, #tpu.memory_space<vmem>> -> memref<1x3x256xf32, #tpu.memory_space<vmem>>
    %103 = tpu.memref_squeeze %102 : memref<1x3x256xf32, #tpu.memory_space<vmem>> -> memref<3x256xf32, #tpu.memory_space<vmem>>
    %c0_37 = arith.constant 0 : index
    %c0_38 = arith.constant 0 : index
    %104 = vector.load %103[%c0_37, %c0_38] : memref<3x256xf32, #tpu.memory_space<vmem>>, vector<1x256xf32>
    tpu.vector_store %103[%c0_37, %c0_38], %101 {strides = array<i32>} : memref<3x256xf32, #tpu.memory_space<vmem>>, vector<1x256xf32>,
    %cst_39 = arith.constant dense<0.000000e+00> : vector<256xf32>
    %105 = vector.multi_reduction <add>, %61, %cst_39 [0] : vector<128x256xf32> to vector<256xf32>
    %106 = vector.shape_cast %105 : vector<256xf32> to vector<1x256xf32>
    %c0_i32_40 = arith.constant 0 : i32
    %c0_i32_41 = arith.constant 0 : i32
    %c0_i32_42 = arith.constant 0 : i32
    %107 = tpu.memref_slice %arg5[%c0_i32_40, %c0_i32_41, %c0_i32_42] : memref<1x3x256xf32, #tpu.memory_space<vmem>> -> memref<1x3x256xf32, #tpu.memory_space<vmem>>
    %108 = tpu.memref_squeeze %107 : memref<1x3x256xf32, #tpu.memory_space<vmem>> -> memref<3x256xf32, #tpu.memory_space<vmem>>
    %c1_43 = arith.constant 1 : index
    %c0_44 = arith.constant 0 : index
    %109 = vector.load %108[%c1_43, %c0_44] : memref<3x256xf32, #tpu.memory_space<vmem>>, vector<1x256xf32>
    tpu.vector_store %108[%c1_43, %c0_44], %106 {strides = array<i32>} : memref<3x256xf32, #tpu.memory_space<vmem>>, vector<1x256xf32>,
    %cst_45 = arith.constant dense<0.000000e+00> : vector<256xf32>
    %110 = vector.multi_reduction <add>, %77, %cst_45 [0] : vector<128x256xf32> to vector<256xf32>
    %111 = vector.shape_cast %110 : vector<256xf32> to vector<1x256xf32>
    %c0_i32_46 = arith.constant 0 : i32
    %c0_i32_47 = arith.constant 0 : i32
    %c0_i32_48 = arith.constant 0 : i32
    %112 = tpu.memref_slice %arg5[%c0_i32_46, %c0_i32_47, %c0_i32_48] : memref<1x3x256xf32, #tpu.memory_space<vmem>> -> memref<1x3x256xf32, #tpu.memory_space<vmem>>
    %113 = tpu.memref_squeeze %112 : memref<1x3x256xf32, #tpu.memory_space<vmem>> -> memref<3x256xf32, #tpu.memory_space<vmem>>
    %c2_49 = arith.constant 2 : index
    %c0_50 = arith.constant 0 : index
    %114 = vector.load %113[%c2_49, %c0_50] : memref<3x256xf32, #tpu.memory_space<vmem>>, vector<1x256xf32>
    tpu.vector_store %113[%c2_49, %c0_50], %111 {strides = array<i32>} : memref<3x256xf32, #tpu.memory_space<vmem>>, vector<1x256xf32>,
    return
  }
  func.func @transform_0(%arg0: i32, %arg1: memref<1xf32, #tpu.memory_space<smem>>) -> (i32, i32) {
    %c0_i32 = arith.constant 0 : i32
    %c0_i32_0 = arith.constant 0 : i32
    return %arg0, %c0_i32 : i32, i32
  }
  func.func @transform_1(%arg0: i32, %arg1: memref<1xf32, #tpu.memory_space<smem>>) -> (i32, i32) {
    %c0_i32 = arith.constant 0 : i32
    %c0_i32_0 = arith.constant 0 : i32
    %c0_i32_1 = arith.constant 0 : i32
    return %c0_i32, %c0_i32_0 : i32, i32
  }
  func.func @transform_2(%arg0: i32, %arg1: memref<1xf32, #tpu.memory_space<smem>>) -> (i32, i32) {
    %c0_i32 = arith.constant 0 : i32
    %c0_i32_0 = arith.constant 0 : i32
    return %arg0, %c0_i32 : i32, i32
  }
  func.func @transform_3(%arg0: i32, %arg1: memref<1xf32, #tpu.memory_space<smem>>) -> (i32, i32, i32) {
    %c0_i32 = arith.constant 0 : i32
    %c0_i32_0 = arith.constant 0 : i32
    %c0_i32_1 = arith.constant 0 : i32
    return %arg0, %c0_i32, %c0_i32_0 : i32, i32, i32
  }
}

</mosaic_0001>

<bundles_post_ra>
// kernel: tpu_custom_call.1
= control target key start
LH: loop header
LB: loop body
LE: loop exit
PB: predicated region body
PF: predicated region fallthrough
CT: control target
= control target key end

     0   :  { %s3366_s17 = smov 0   ;;  %s6062_s0 = inlined_call_operand.<no memory space> [shape: f32[1], index: 0, kind: input, shape index: {}]   ;;  %s6063_s1 = inlined_call_operand.vmem [shape: f32[256,32], index: 1, kind: input, shape index: {}]   ;;  %s6064_s2 = inlined_call_operand.vmem [shape: f32[32,256], index: 2, kind: input, shape index: {}]   ;;  %s6065_s3 = inlined_call_operand.vmem [shape: f32[256,4], index: 3, kind: output, shape index: {0}]   ;;  %s6066_s4 = inlined_call_operand.vmem [shape: f32[2,3,256], index: 4, kind: output, shape index: {1}]  }
   0x1   :  { %10 = sst [smem:[#allocation3]] %s6062_s0 }
   0x2 LB: > { %s3372_s18 = sadd.s32 4294967295, %s3334_s17   ;;  %p2861_p0 = scmp.ge.s32.totalorder %s3334_s17, 1  ;;  %s3334_s17 = sphi %s3366_s17, %s16_s17  }
   0x3   : > { %p143_p1 = scmp.lt.s32.totalorder %s3334_s17, 3 }
   0x5   : > { %p144_p2 = pnand %p2861_p0, %p143_p1 }
   0x7   : > { %147 = sbr.rel (%p144_p2) target bundleno = 893 (0x37d), region = 28 }
   0xe   : > { %v207_v0 = vld [vmem:[%s6064_s2 + $0x8] sm:$0xff]  ;;  %v209_v1 = vld [vmem:[%s6064_s2 + $0x18] sm:$0xff]  ;;  %v206_v2 = vld [vmem:[%s6064_s2] sm:$0xff]  ;;  %s2862_s24 = sshll.u32 %s3372_s18, 4  ;;  %v3336_v7 = vmov 0.0   ;;  %vm214_vm0 = vcmask 261120   ;;  %v6067_v29 = vlaneseq }
   0xf   : > { %v2986_v3 = vpack.c.bf16 %v209_v1, %v207_v0  ;;  %v208_v4 = vld [vmem:[%s6064_s2 + $0x10] sm:$0xff]  ;;  %v211_v5 = vld [vmem:[%s6064_s2 + $0x28] sm:$0xff]  ;;  %v213_v6 = vld [vmem:[%s6064_s2 + $0x38] sm:$0xff]  ;;  %327 = vmatprep.mubr.f32.mxu0 %v3336_v7  ;;  %375 = vmatprep.mubr.f32.mxu1 %v3336_v7  ;;  %p173_p3 = scmp.lt.s32.totalorder %s2862_s24, 31  ;;  %s189_s13 = sld [smem:[#allocation3]] }
  0x10   : > { %v2988_v8 = vpack.c.bf16 %v208_v4, %v206_v2  ;;  %v2990_v9 = vpack.c.bf16 %v213_v6, %v211_v5  ;;  %v210_v10 = vld [vmem:[%s6064_s2 + $0x20] sm:$0xff]  ;;  %v212_v11 = vld [vmem:[%s6064_s2 + $0x30] sm:$0xff]  ;;  %s2980_s14 = sshll.u32 %s3372_s18, 7  ;;  %v3445_v30 = vshrl.u32 %v6067_v29, 7  ;;  %v3448_v31 = vand.u32 127, %v6067_v29  ;;  %p184_p4 = scmp.lt.s32.totalorder %s3372_s18, 1 }
  0x11   : > { %2987 = vmatprep.subr.bf16.mxu0 %v2986_v3  ;;  %2994 = vmatprep.subr.bf16.mxu1 %v2986_v3  ;;  %s6328_s24 = smov (!%p173_p3, %s2862_s24), 31  ;;  %v2992_v12 = vpack.c.bf16 %v212_v11, %v210_v10  ;;  %v3450_v32 = vstv %s2980_s14 }
  0x12   : > { %2989 = vmatpush1.bf16.msra.mxu0 %v2988_v8  ;;  %2996 = vmatpush1.bf16.msra.mxu1 %v2988_v8  ;;  %s2863_s9 = sshll.u32 %s6328_s24, 3  ;;  %6152 = vst [vmem:[#allocation4_spill] sm:$0xff] %v3445_v30  ;;  %v2226_v33 = vadd.s32 64, %v3445_v30  ;;  %v2219_v34 = vadd.s32 8, %v3445_v30  ;;  %v2227_v35 = vadd.s32 72, %v3445_v30  ;;  %v2220_v36 = vadd.s32 16, %v3445_v30 }
  0x13   : > { %2991 = vmatprep.subr.bf16.mxu0 %v2990_v9  ;;  %2995 = vmatprep.subr.bf16.mxu1 %v2990_v9  ;;  %s3409_s12 = scalar_lea.vmem %s6063_s1, %s2863_s9  ;;  %v2228_v37 = vadd.s32 80, %v3445_v30  ;;  %v2221_v39 = vadd.s32 24, %v3445_v30  ;;  %v2229_v40 = vadd.s32 88, %v3445_v30  ;;  %v3463_v41 = vadd.s32 %v3450_v32, %v3445_v30  ;;  %s6330_s18 = smov (!%p184_p4, %s3372_s18), 1 }
  0x14   : > { %v190_v13 = vld [vmem:[%s3409_s12] sm:$0xff]  ;;  %v191_v15 = vld [vmem:[%s3409_s12 + $0x8] sm:$0xff]  ;;  %v192_v17 = vld [vmem:[%s3409_s12 + $0x10] sm:$0xff]  ;;  %v3466_v42 = vadd.s32 128, %v3448_v31  ;;  %v2222_v43 = vadd.s32 32, %v3445_v30  ;;  %v2230_v44 = vadd.s32 96, %v3445_v30  ;;  %v3471_v45 = vadd.s32 %v3450_v32, %v2226_v33  ;;  %s5824_s19 = scalar_lea.vmem %s6065_s3, %s2863_s9 }
  0x15   : > { %v198_v14 = vld [vmem:[%s3409_s12 + $0x40] sm:$0xff]  ;;  %v199_v16 = vld [vmem:[%s3409_s12 + $0x48] sm:$0xff]  ;;  %v200_v18 = vld [vmem:[%s3409_s12 + $0x50] sm:$0xff]  ;;  %v3457_v38 = vstv %s189_s13  ;;  %v3474_v46 = vadd.s32 %v3450_v32, %v2219_v34  ;;  %v2223_v47 = vadd.s32 40, %v3445_v30  ;;  %v2231_v48 = vadd.s32 104, %v3445_v30  ;;  %s2985_s20 = sshll.u32 %s6330_s18, 3 }
  0x16   : > { %2993 = vmatpush1.bf16.msra.mxu0 %v2992_v12  ;;  %2997 = vmatpush1.bf16.msra.mxu1 %v2992_v12  ;;  %v193_v19 = vld [vmem:[%s3409_s12 + $0x18] sm:$0xff]  ;;  %v194_v21 = vld [vmem:[%s3409_s12 + $0x20] sm:$0xff]  ;;  %v195_v23 = vld [vmem:[%s3409_s12 + $0x28] sm:$0xff]  ;;  %v3479_v51 = vadd.s32 %v3450_v32, %v2227_v35  ;;  %v3482_v52 = vadd.s32 %v3450_v32, %v2220_v36  ;;  %v3485_v53 = vadd.s32 %v3450_v32, %v2228_v37  ;;  %v2224_v54 = vadd.s32 48, %v3445_v30  ;;  %s5941_s22 = scalar_lea.vmem %s6066_s4, %s2985_s20 }
  0x17   : > { %v201_v20 = vld [vmem:[%s3409_s12 + $0x58] sm:$0xff]  ;;  %v202_v22 = vld [vmem:[%s3409_s12 + $0x60] sm:$0xff]  ;;  %v203_v24 = vld [vmem:[%s3409_s12 + $0x68] sm:$0xff]  ;;  %v3491_v59 = vadd.s32 %v3450_v32, %v2221_v39  ;;  %v3494_v60 = vadd.s32 %v3450_v32, %v2229_v40  ;;  %v3499_v63 = vadd.s32 %v3450_v32, %v2222_v43  ;;  %v3502_v0 = vadd.s32 %v3450_v32, %v2230_v44 }
  0x18   : > { %v196_v25 = vld [vmem:[%s3409_s12 + $0x30] sm:$0xff]  ;;  %v197_v27 = vld [vmem:[%s3409_s12 + $0x38] sm:$0xff]  ;;  %v3505_v3 = vadd.s32 %v3450_v32, %v2223_v47  ;;  %v3508_v4 = vadd.s32 %v3450_v32, %v2231_v48  ;;  %v3511_v9 = vadd.s32 %v3450_v32, %v2224_v54  ;;  %v2232_v10 = vadd.s32 112, %v3445_v30 }
  0x19   : > { %2868 = vmatmul.mubr.msk.f32.vlgmr.msra.gmra.mrb[0].mxu0 %vm214_vm0, %v190_v13  ;;  %2876 = vmatmul.mubr.msk.f32.vlgmr.msra.gmra.mrb[0].mxu1 %vm214_vm0, %v198_v14  ;;  %v204_v26 = vld [vmem:[%s3409_s12 + $0x70] sm:$0xff]  ;;  %v205_v28 = vld [vmem:[%s3409_s12 + $0x78] sm:$0xff]  ;;  %vm2255_vm1 = vcmp.eq.s32.totalorder %v3463_v41, %v3448_v31  ;;  %vm2256_vm2 = vcmp.eq.s32.totalorder %v3463_v41, %v3466_v42  ;;  %vm2271_vm3 = vcmp.eq.s32.totalorder %v3471_v45, %v3448_v31 }
  0x1a   : > { %333 = vmatprep.mubr.f32.mxu0 %v3336_v7  ;;  %381 = vmatprep.mubr.f32.mxu1 %v3336_v7  ;;  %vm2272_vm4 = vcmp.eq.s32.totalorder %v3471_v45, %v3466_v42  ;;  %vm2273_vm5 = vcmp.eq.s32.totalorder %v3479_v51, %v3448_v31  ;;  %vm2274_vm6 = vcmp.eq.s32.totalorder %v3479_v51, %v3466_v42 }
  0x1b   : > { %vm2257_vm7 = vcmp.eq.s32.totalorder %v3474_v46, %v3448_v31  ;;  %vm2258_vm8 = vcmp.eq.s32.totalorder %v3474_v46, %v3466_v42  ;;  %vm2259_vm9 = vcmp.eq.s32.totalorder %v3482_v52, %v3448_v31  ;;  %vm2260_vm10 = vcmp.eq.s32.totalorder %v3482_v52, %v3466_v42 }
  0x1c   : > { %vm2275_vm11 = vcmp.eq.s32.totalorder %v3485_v53, %v3448_v31  ;;  %vm2276_vm12 = vcmp.eq.s32.totalorder %v3485_v53, %v3466_v42  ;;  %vm2261_vm13 = vcmp.eq.s32.totalorder %v3491_v59, %v3448_v31  ;;  %vm2262_vm14 = vcmp.eq.s32.totalorder %v3491_v59, %v3466_v42 }
  0x1d   : > { %2869 = vmatmul.mubr.msk.f32.gmra.mrb[2].mxu0 %vm214_vm0, %v191_v15  ;;  %2877 = vmatmul.mubr.msk.f32.gmra.mrb[2].mxu1 %vm214_vm0, %v199_v16  ;;  %vm2277_vm15 = vcmp.eq.s32.totalorder %v3494_v60, %v3448_v31 }
  0x1e   : > { %339 = vmatprep.mubr.f32.mxu0 %v3336_v7  ;;  %387 = vmatprep.mubr.f32.mxu1 %v3336_v7 }
  0x21   : > { %2870 = vmatmul.mubr.msk.f32.gmra.mrb[4].mxu0 %vm214_vm0, %v192_v17  ;;  %2878 = vmatmul.mubr.msk.f32.gmra.mrb[4].mxu1 %vm214_vm0, %v200_v18 }
  0x22   : > { %345 = vmatprep.mubr.f32.mxu0 %v3336_v7  ;;  %393 = vmatprep.mubr.f32.mxu1 %v3336_v7 }
  0x25   : > { %2871 = vmatmul.mubr.msk.f32.gmra.mrb[6].mxu0 %vm214_vm0, %v193_v19  ;;  %2879 = vmatmul.mubr.msk.f32.gmra.mrb[6].mxu1 %vm214_vm0, %v201_v20 }
  0x26   : > { %351 = vmatprep.mubr.f32.mxu0 %v3336_v7  ;;  %399 = vmatprep.mubr.f32.mxu1 %v3336_v7 }
  0x29   : > { %2872 = vmatmul.mubr.msk.f32.gmra.mrb[8].mxu0 %vm214_vm0, %v194_v21  ;;  %2880 = vmatmul.mubr.msk.f32.gmra.mrb[8].mxu1 %vm214_vm0, %v202_v22 }
  0x2a   : > { %357 = vmatprep.mubr.f32.mxu0 %v3336_v7  ;;  %405 = vmatprep.mubr.f32.mxu1 %v3336_v7 }
  0x2d   : > { %2873 = vmatmul.mubr.msk.f32.gmra.mrb[10].mxu0 %vm214_vm0, %v195_v23  ;;  %2881 = vmatmul.mubr.msk.f32.gmra.mrb[10].mxu1 %vm214_vm0, %v203_v24  ;;  %v2225_v23 = vadd.s32 56, %v3445_v30 }
  0x2e   : > { %363 = vmatprep.mubr.f32.mxu0 %v3336_v7  ;;  %411 = vmatprep.mubr.f32.mxu1 %v3336_v7 }
  0x31   : > { %2874 = vmatmul.mubr.msk.f32.gmra.mrb[12].mxu0 %vm214_vm0, %v196_v25  ;;  %2882 = vmatmul.mubr.msk.f32.gmra.mrb[12].mxu1 %vm214_vm0, %v204_v26 }
  0x32   : > { %369 = vmatprep.mubr.f32.mxu0 %v3336_v7  ;;  %417 = vmatprep.mubr.f32.mxu1 %v3336_v7 }
  0x35   : > { %2875 = vmatmul.mubr.msk.f32.gmra.mrb[14].mxu0 %vm214_vm0, %v197_v27  ;;  %2883 = vmatmul.mubr.msk.f32.gmra.mrb[14].mxu1 %vm214_vm0, %v205_v28  ;;  %v3520_v28 = vadd.s32 %v3450_v32, %v2232_v10  ;;  %vm2265_vm0 = vcmp.eq.s32.totalorder %v3505_v3, %v3448_v31 }
  0xec   : > { %v329_v49 = vpop.f32.mrb[0].mxu0  ;;  %v377_v50 = vpop.f32.mrb[0].mxu1 }
  0xed   : > { %v425_v55 = vmul.f32 %v3457_v38, %v329_v49  ;;  %v441_v56 = vmul.f32 %v3457_v38, %v377_v50  ;;  %v331_v57 = vpop.f32.mrb[1].mxu0  ;;  %v379_v58 = vpop.f32.mrb[1].mxu1 }
  0xee   : > { %v426_v61 = vmul.f32 %v3457_v38, %v331_v57  ;;  %v442_v62 = vmul.f32 %v3457_v38, %v379_v58 }
  0xef   : > { %v2884_v1 = vclamps-f32 %v425_v55, 10.0  ;;  %v2900_v2 = vclamps-f32 %v441_v56, 10.0  ;;  %v3527_v55 = vadd.s32 %v3450_v32, %v2225_v23  ;;  %v2233_v56 = vadd.s32 120, %v3445_v30 }
  0xf0   : > { %v2885_v5 = vclamps-f32 %v426_v61, 10.0  ;;  %v2901_v6 = vclamps-f32 %v442_v62, 10.0  ;;  %v335_v7 = vpop.f32.mrb[2].mxu0  ;;  %v383_v8 = vpop.f32.mrb[2].mxu1 }
  0xf1   : > { %v521_v11 = vmul.f32 1.442695, %v2884_v1  ;;  %v553_v12 = vmul.f32 1.442695, %v2900_v2  ;;  %v427_v13 = vmul.f32 %v3457_v38, %v335_v7  ;;  %v443_v14 = vmul.f32 %v3457_v38, %v383_v8  ;;  %v337_v15 = vpop.f32.mrb[3].mxu0  ;;  %v385_v16 = vpop.f32.mrb[3].mxu1 }
  0xf2   : > { %v523_v17 = vmul.f32 1.442695, %v2885_v5  ;;  %v555_v18 = vmul.f32 1.442695, %v2901_v6  ;;  %v428_v19 = vmul.f32 %v3457_v38, %v337_v15  ;;  %v444_v20 = vmul.f32 %v3457_v38, %v385_v16 }
  0xf3   : > { %3008 = vpow2.f32 %v521_v11  ;;  %v2886_v21 = vclamps-f32 %v427_v13, 10.0  ;;  %v2902_v22 = vclamps-f32 %v443_v14, 10.0 }
  0xf4   : > { %3010 = vpow2.f32 %v553_v12  ;;  %v2887_v24 = vclamps-f32 %v428_v19, 10.0  ;;  %v2903_v25 = vclamps-f32 %v444_v20, 10.0  ;;  %v341_v26 = vpop.f32.mrb[4].mxu0  ;;  %v389_v27 = vpop.f32.mrb[4].mxu1 }
  0xf5   : > { %3012 = vpow2.f32 %v523_v17  ;;  %v525_v33 = vmul.f32 1.442695, %v2886_v21  ;;  %v557_v34 = vmul.f32 1.442695, %v2902_v22  ;;  %v429_v35 = vmul.f32 %v3457_v38, %v341_v26  ;;  %v343_v36 = vpop.f32.mrb[5].mxu0  ;;  %v391_v37 = vpop.f32.mrb[5].mxu1 }
  0xf6   : > { %3014 = vpow2.f32 %v555_v18  ;;  %v527_v39 = vmul.f32 1.442695, %v2887_v24  ;;  %v559_v40 = vmul.f32 1.442695, %v2903_v25  ;;  %v445_v43 = vmul.f32 %v3457_v38, %v389_v27 }
  0xf7   : > { %3016 = vpow2.f32 %v525_v33  ;;  %v2888_v44 = vclamps-f32 %v429_v35, 10.0  ;;  %v430_v47 = vmul.f32 %v3457_v38, %v343_v36  ;;  %v446_v48 = vmul.f32 %v3457_v38, %v391_v37 }
  0xf8   : > { %3018 = vpow2.f32 %v557_v34  ;;  %v2904_v49 = vclamps-f32 %v445_v43, 10.0  ;;  %v347_v50 = vpop.f32.mrb[6].mxu0  ;;  %v395_v54 = vpop.f32.mrb[6].mxu1  ;;  %v3537_v25 = vadd.s32 %v3450_v32, %v2233_v56 }
  0xf9   : > { %3020 = vpow2.f32 %v527_v39  ;;  %v529_v57 = vmul.f32 1.442695, %v2888_v44  ;;  %v2889_v58 = vclamps-f32 %v430_v47, 10.0  ;;  %v2905_v61 = vclamps-f32 %v446_v48, 10.0  ;;  %v349_v62 = vpop.f32.mrb[7].mxu0  ;;  %v397_v1 = vpop.f32.mrb[7].mxu1 }
  0xfa   : > { %3022 = vpow2.f32 %v559_v40  ;;  %v561_v2 = vmul.f32 1.442695, %v2904_v49  ;;  %v431_v5 = vmul.f32 %v3457_v38, %v347_v50  ;;  %v447_v6 = vmul.f32 %v3457_v38, %v395_v54 }
  0xfb   : > { %3024 = vpow2.f32 %v529_v57  ;;  %v531_v7 = vmul.f32 1.442695, %v2889_v58  ;;  %v563_v8 = vmul.f32 1.442695, %v2905_v61  ;;  %v432_v10 = vmul.f32 %v3457_v38, %v349_v62 }
  0xfc   : > { %3026 = vpow2.f32 %v561_v2  ;;  %v2890_v11 = vclamps-f32 %v431_v5, 10.0  ;;  %v2906_v12 = vclamps-f32 %v447_v6, 10.0  ;;  %v448_v13 = vmul.f32 %v3457_v38, %v397_v1  ;;  %v353_v14 = vpop.f32.mrb[8].mxu0  ;;  %v401_v15 = vpop.f32.mrb[8].mxu1 }
  0xfd   : > { %v3009_v16 = vpop.eup %3008  ;;  %3028 = vpow2.f32 %v531_v7  ;;  %v2891_v17 = vclamps-f32 %v432_v10, 10.0  ;;  %v433_v18 = vmul.f32 %v3457_v38, %v353_v14  ;;  %v449_v19 = vmul.f32 %v3457_v38, %v401_v15  ;;  %v355_v20 = vpop.f32.mrb[9].mxu0 }
  0xfe   : > { %v403_v21 = vpop.f32.mrb[9].mxu1  ;;  %v3011_v22 = vpop.eup %3010  ;;  %3030 = vpow2.f32 %v563_v8  ;;  %v533_v23 = vmul.f32 1.442695, %v2890_v11  ;;  %v565_v24 = vmul.f32 1.442695, %v2906_v12  ;;  %v3539_v27 = vadd.f32 1.0, %v3009_v16 }
  0xff   : > { %v3013_v26 = vpop.eup %3012  ;;  %v535_v33 = vmul.f32 1.442695, %v2891_v17  ;;  %v2907_v34 = vclamps-f32 %v448_v13, 10.0  ;;  %v2892_v35 = vclamps-f32 %v433_v18, 10.0  ;;  %v3541_v37 = vadd.f32 1.0, %v3011_v22 }
 0x100   : > { %v3015_v36 = vpop.eup %3014  ;;  %3032 = vpow2.f32 %v533_v23  ;;  %v2908_v39 = vclamps-f32 %v449_v19, 10.0  ;;  %v434_v40 = vmul.f32 %v3457_v38, %v355_v20  ;;  %v359_v43 = vpop.f32.mrb[10].mxu0  ;;  %v3544_v48 = vadd.f32 1.0, %v3013_v26 }
 0x101   : > { %v407_v44 = vpop.f32.mrb[10].mxu1  ;;  %v3017_v47 = vpop.eup %3016  ;;  %3034 = vpow2.f32 %v565_v24  ;;  %v567_v32 = vmul.f32 1.442695, %v2907_v34  ;;  %v537_v49 = vmul.f32 1.442695, %v2892_v35  ;;  %v3548_v1 = vadd.f32 1.0, %v3015_v36 }
 0x102   : > { %v361_v50 = vpop.f32.mrb[11].mxu0  ;;  %v3019_v54 = vpop.eup %3018  ;;  %v3546_v56 = vadd.f32 1.0, %v3017_v47  ;;  %3036 = vpow2.f32 %v535_v33  ;;  %v569_v57 = vmul.f32 1.442695, %v2908_v39  ;;  %v2893_v58 = vclamps-f32 %v434_v40, 10.0 }
 0x103   : > { %v409_v61 = vpop.f32.mrb[11].mxu1  ;;  %v3021_v62 = vpop.eup %3020  ;;  %3038 = vpow2.f32 %v567_v32  ;;  %v450_v2 = vmul.f32 %v3457_v38, %v403_v21  ;;  %v435_v5 = vmul.f32 %v3457_v38, %v359_v43  ;;  %v3552_v7 = vadd.f32 1.0, %v3019_v54 }
 0x104   : > { %v3023_v6 = vpop.eup %3022  ;;  %v3554_v8 = vadd.f32 1.0, %v3021_v62  ;;  %3040 = vpow2.f32 %v537_v49  ;;  %v539_v10 = vmul.f32 1.442695, %v2893_v58  ;;  %v365_v11 = vpop.f32.mrb[12].mxu0  ;;  %v2579_v14 = vadd.f32 %v3546_v56, %v3539_v27 }
 0x105   : > { %6153 = vst [vmem:[#allocation5_spill] sm:$0xff] %v3552_v7  ;;  %v413_v12 = vpop.f32.mrb[12].mxu1  ;;  %v3025_v13 = vpop.eup %3024  ;;  %3042 = vpow2.f32 %v569_v57  ;;  %v2909_v15 = vclamps-f32 %v450_v2, 10.0  ;;  %v2894_v16 = vclamps-f32 %v435_v5, 10.0  ;;  %v3558_v20 = vadd.f32 1.0, %v3023_v6 }
 0x106   : > { %v367_v17 = vpop.f32.mrb[13].mxu0  ;;  %v415_v18 = vpop.f32.mrb[13].mxu1  ;;  %v3560_v21 = vadd.f32 1.0, %v3025_v13  ;;  %3044 = vpow2.f32 %v539_v10  ;;  %v451_v22 = vmul.f32 %v3457_v38, %v407_v44  ;;  %v2600_v24 = vadd.f32 %v3554_v8, %v3544_v48 }
 0x107   : > { %v3027_v19 = vpop.eup %3026  ;;  %6154 = vst [vmem:[#allocation6_spill] sm:$0xff] %v3558_v20  ;;  %v571_v26 = vmul.f32 1.442695, %v2909_v15  ;;  %v541_v33 = vmul.f32 1.442695, %v2894_v16  ;;  %v436_v34 = vmul.f32 %v3457_v38, %v361_v50  ;;  %v452_v43 = vmul.f32 %v3457_v38, %v409_v61 }
 0x108   : > { %6155 = vst [vmem:[#allocation7_spill] sm:$0xff] %v3560_v21  ;;  %v3029_v23 = vpop.eup %3028  ;;  %v3566_v36 = vadd.f32 1.0, %v3027_v19  ;;  %v2910_v40 = vclamps-f32 %v451_v22, 10.0  ;;  %v371_v47 = vpop.f32.mrb[14].mxu0  ;;  %v2580_v44 = vadd.f32 %v2579_v14, %v3560_v21  ;;  %v2367_v54 = vadd.f32 %v3544_v48, %v3539_v27 }
 0x109   : > { %v3031_v35 = vpop.eup %3030  ;;  %v3568_v39 = vadd.f32 1.0, %v3029_v23  ;;  %v419_v32 = vpop.f32.mrb[14].mxu1  ;;  %3046 = vpow2.f32 %v571_v26  ;;  %v2895_v49 = vclamps-f32 %v436_v34, 10.0  ;;  %v2911_v5 = vclamps-f32 %v452_v43, 10.0 }
 0x10a   : > { %6156 = vst [vmem:[#allocation8_spill] sm:$0xff] %v3566_v36  ;;  %v373_v57 = vpop.f32.mrb[15].mxu0  ;;  %v3574_v58 = vpop.f32.mrb[15].mxu1  ;;  %v3576_v62 = vadd.f32 1.0, %v3031_v35  ;;  %3048 = vpow2.f32 %v541_v33  ;;  %v573_v2 = vmul.f32 1.442695, %v2910_v40  ;;  %2368 = vadd.xlane.f32.xlu0 %v2367_v54  ;;  %v437_v13 = vmul.f32 %v3457_v38, %v365_v11 }
 0x10b   : > { %6157 = vst [vmem:[#allocation9_spill] sm:$0xff] %v3568_v39  ;;  %v3033_v50 = vpop.eup %3032  ;;  %v543_v10 = vmul.f32 1.442695, %v2895_v49  ;;  %v453_v14 = vmul.f32 %v3457_v38, %v413_v12  ;;  %v2601_v16 = vadd.f32 %v2600_v24, %v3568_v39  ;;  %v575_v19 = vmul.f32 1.442695, %v2911_v5 }
 0x10c   : > { %6158 = vst [vmem:[#allocation10_spill] sm:$0xff] %v3576_v62  ;;  %v3035_v61 = vpop.eup %3034  ;;  %v3580_v6 = vadd.f32 1.0, %v3033_v50  ;;  %3050 = vpow2.f32 %v573_v2  ;;  %v438_v22 = vmul.f32 %v3457_v38, %v367_v17  ;;  %v2896_v34 = vclamps-f32 %v437_v13, 10.0 }
 0x10d   : > { %v3037_v15 = vpop.eup %3036  ;;  %v3588_v26 = vadd.f32 1.0, %v3035_v61  ;;  %3052 = vpow2.f32 %v543_v10  ;;  %v2912_v35 = vclamps-f32 %v453_v14, 10.0  ;;  %v454_v54 = vmul.f32 %v3457_v38, %v415_v18 }
 0x10e   : > { %6159 = vst [vmem:[#allocation11_spill] sm:$0xff] %v3580_v6  ;;  %v3039_v23 = vpop.eup %3038  ;;  %v3590_v33 = vadd.f32 1.0, %v3037_v15  ;;  %v2581_v12 = vadd.f32 %v2580_v44, %v3580_v6  ;;  %3054 = vpow2.f32 %v575_v19  ;;  %v2897_v40 = vclamps-f32 %v438_v22, 10.0 }
 0x10f   : > { %6160 = vst [vmem:[#allocation12_spill] sm:$0xff] %v3588_v26  ;;  %v3041_v11 = vpop.eup %3040  ;;  %v3597_v24 = vadd.f32 1.0, %v3039_v23  ;;  %v545_v49 = vmul.f32 1.442695, %v2896_v34  ;;  %v577_v2 = vmul.f32 1.442695, %v2912_v35  ;;  %v2391_v61 = vadd.f32 %v3548_v1, %v3541_v37 }
 0x110   : > { %6161 = vst [vmem:[#allocation13_spill] sm:$0xff] %v3590_v33  ;;  %v3043_v17 = vpop.eup %3042  ;;  %v3599_v43 = vadd.f32 1.0, %v3041_v11  ;;  %v2602_v50 = vadd.f32 %v2601_v16, %v3590_v33  ;;  %v547_v5 = vmul.f32 1.442695, %v2897_v40  ;;  %v2913_v13 = vclamps-f32 %v454_v54, 10.0 }
 0x111   : > { %6162 = vst [vmem:[#allocation14_spill] sm:$0xff] %v3597_v24  ;;  %v3045_v44 = vpop.eup %3044  ;;  %v3613_v18 = vadd.f32 1.0, %v3043_v17  ;;  %3056 = vpow2.f32 %v545_v49  ;;  %2392 = vadd.xlane.f32.xlu0 %v2391_v61  ;;  %v2370_v14 = vadd.f32 %v3554_v8, %v3546_v56  ;;  %v439_v15 = vmul.f32 %v3457_v38, %v371_v47 }
 0x112   : > { %6163 = vst [vmem:[#allocation15_spill] sm:$0xff] %v3599_v43  ;;  %v3615_v10 = vadd.f32 1.0, %v3045_v44  ;;  %3058 = vpow2.f32 %v577_v2  ;;  %v455_v16 = vmul.f32 %v3457_v38, %v419_v32  ;;  %v2582_v22 = vadd.f32 %v2581_v12, %v3599_v43 }
 0x113   : > { %6164 = vst [vmem:[#allocation16_spill] sm:$0xff] %v3613_v18  ;;  %v3047_v19 = vpop.eup %3046  ;;  %3060 = vpow2.f32 %v547_v5  ;;  %v579_v23 = vmul.f32 1.442695, %v2913_v13  ;;  %v440_v34 = vmul.f32 %v3457_v38, %v373_v57  ;;  %2371 = vadd.xlane.f32.xlu1 %v2370_v14  ;;  %v2898_v40 = vclamps-f32 %v439_v15, 10.0 }
 0x114   : > { %6165 = vst [vmem:[#allocation17_spill] sm:$0xff] %v3615_v10  ;;  %v3049_v11 = vpop.eup %3048  ;;  %v2603_v35 = vadd.f32 %v2602_v50, %v3615_v10  ;;  %v2914_v17 = vclamps-f32 %v455_v16, 10.0  ;;  %v456_v47 = vmul.f32 %v3457_v38, %v3574_v58  ;;  %v2287_v12 = vsel %vm2255_vm1, %v3539_v27, 0.0 }
 0x115   : > { %v3636_v32 = vadd.f32 1.0, %v3049_v11  ;;  %3062 = vpow2.f32 %v579_v23  ;;  %v2899_v57 = vclamps-f32 %v440_v34, 10.0  ;;  %v549_v58 = vmul.f32 1.442695, %v2898_v40 }
 0x116   : > { %v3051_v38 = vpop.eup %3050  ;;  %v581_v49 = vmul.f32 1.442695, %v2914_v17  ;;  %v2915_v54 = vclamps-f32 %v456_v47, 10.0  ;;  %v2288_v44 = vsel %vm2256_vm2, %v3544_v48, 0.0  ;;  %v3652_v2 = vadd.f32 1.0, %v3047_v19 }
 0x117   : > { %6166 = vst [vmem:[#allocation18_spill] sm:$0xff] %v3636_v32  ;;  %v3053_v50 = vpop.eup %3052  ;;  %v2583_v5 = vadd.f32 %v2582_v22, %v3636_v32  ;;  %v551_v61 = vmul.f32 1.442695, %v2899_v57  ;;  %v2319_v13 = vadd.f32 %v2288_v44, %v2287_v12  ;;  %vm2263_vm1 = vcmp.eq.s32.totalorder %v3499_v63, %v3448_v31 }
 0x118   : > { %6167 = vst [vmem:[#allocation19_spill] sm:$0xff] %v3652_v2  ;;  %v3055_v14 = vpop.eup %3054  ;;  %v3657_v15 = vadd.f32 1.0, %v3053_v50  ;;  %3064 = vpow2.f32 %v549_v58  ;;  %v583_v41 = vmul.f32 1.442695, %v2915_v54  ;;  %v2394_v16 = vadd.f32 %v3558_v20, %v3552_v7 }
 0x119   : > { %v3665_v19 = vadd.f32 1.0, %v3051_v38  ;;  %3066 = vpow2.f32 %v581_v49  ;;  %2320 = vadd.xlane.f32.xlu0 %v2319_v13  ;;  %v2303_v22 = vsel %vm2271_vm3, %v3541_v37, 0.0  ;;  %v2304_v23 = vsel %vm2272_vm4, %v3548_v1, 0.0 }
 0x11a   : > { %6168 = vst [vmem:[#allocation20_spill] sm:$0xff] %v3657_v15  ;;  %vm2280_vm2 = vcmp.eq.s32.totalorder %v3502_v0, %v3466_v42  ;;  %v3679_v34 = vadd.f32 1.0, %v3055_v14  ;;  %3068 = vpow2.f32 %v551_v61  ;;  %2395 = vadd.xlane.f32.xlu1 %v2394_v16  ;;  %v2343_v11 = vadd.f32 %v2304_v23, %v2303_v22 }
 0x11b   : > { %6169 = vst [vmem:[#allocation21_spill] sm:$0xff] %v3665_v19  ;;  %v2305_v40 = vsel %vm2273_vm5, %v3552_v7, 0.0  ;;  %vm2266_vm3 = vcmp.eq.s32.totalorder %v3505_v3, %v3466_v42  ;;  %v3057_v45 = vpop.eup %3056  ;;  %3070 = vpow2.f32 %v583_v41  ;;  %v2306_v17 = vsel %vm2274_vm6, %v3558_v20, 0.0 }
 0x11c   : > { %6170 = vst [vmem:[#allocation22_spill] sm:$0xff] %v3679_v34  ;;  %v2289_v47 = vsel %vm2257_vm7, %v3546_v56, 0.0  ;;  %v2290_v57 = vsel %vm2258_vm8, %v3554_v8, 0.0  ;;  %vm2281_vm4 = vcmp.eq.s32.totalorder %v3508_v4, %v3448_v31  ;;  %vm2282_vm5 = vcmp.eq.s32.totalorder %v3508_v4, %v3466_v42  ;;  %v3059_v12 = vpop.eup %3058 }
 0x11d   : > { %v2604_v51 = vadd.f32 %v2603_v35, %v3657_v15  ;;  %v3704_v38 = vadd.f32 1.0, %v3057_v45  ;;  %v2346_v58 = vadd.f32 %v2306_v17, %v2305_v40  ;;  %v2291_v49 = vsel %vm2259_vm9, %v3560_v21, 0.0  ;;  %v3061_v54 = vpop.eup %3060  ;;  %2344 = vadd.xlane.f32.xlu0 %v2343_v11 }
 0x11e   : > { %v3710_v46 = vadd.f32 1.0, %v3059_v12  ;;  %v2322_v44 = vadd.f32 %v2290_v57, %v2289_v47  ;;  %v2292_v50 = vsel %vm2260_vm10, %v3568_v39, 0.0  ;;  %v2373_v35 = vadd.f32 %v3568_v39, %v3560_v21 }
 0x11f   : > { %6171 = vst [vmem:[#allocation23_spill] sm:$0xff] %v3704_v38  ;;  %vm2267_vm6 = vcmp.eq.s32.totalorder %v3511_v9, %v3448_v31  ;;  %vm2268_vm7 = vcmp.eq.s32.totalorder %v3511_v9, %v3466_v42  ;;  %v2584_v61 = vadd.f32 %v2583_v5, %v3704_v38  ;;  %v3723_v13 = vadd.f32 1.0, %v3061_v54  ;;  %2347 = vadd.xlane.f32.xlu1 %v2346_v58  ;;  %v3063_v52 = vpop.eup %3062 }
 0x120   : > { %6172 = vst [vmem:[#allocation24_spill] sm:$0xff] %v3710_v46  ;;  %v2325_v14 = vadd.f32 %v2292_v50, %v2291_v49  ;;  %v2376_v41 = vadd.f32 %v3590_v33, %v3580_v6  ;;  %vm2283_vm8 = vcmp.eq.s32.totalorder %v3520_v28, %v3448_v31  ;;  %v2397_v16 = vadd.f32 %v3576_v62, %v3566_v36 }
 0x121   : > { %6173 = vst [vmem:[#allocation25_spill] sm:$0xff] %v3723_v13  ;;  %v2307_v22 = vsel %vm2275_vm11, %v3566_v36, 0.0  ;;  %v2308_v5 = vsel %vm2276_vm12, %v3576_v62, 0.0  ;;  %v2293_v23 = vsel %vm2261_vm13, %v3580_v6, 0.0  ;;  %vm2284_vm9 = vcmp.eq.s32.totalorder %v3520_v28, %v3466_v42  ;;  %2323 = vadd.xlane.f32.xlu0 %v2322_v44 }
 0x122   : > { %vm2269_vm10 = vcmp.eq.s32.totalorder %v3527_v55, %v3448_v31  ;;  %v2605_v11 = vadd.f32 %v2604_v51, %v3723_v13  ;;  %v3748_v40 = vadd.f32 1.0, %v3063_v52  ;;  %v2400_v45 = vadd.f32 %v3597_v24, %v3588_v26  ;;  %v3065_v51 = vpop.eup %3064 }
 0x123   : > { %v2294_v53 = vsel %vm2262_vm14, %v3590_v33, 0.0  ;;  %vm2270_vm11 = vcmp.eq.s32.totalorder %v3527_v55, %v3466_v42  ;;  %v2349_v17 = vadd.f32 %v2308_v5, %v2307_v22  ;;  %v2309_v57 = vsel %vm2277_vm15, %v3588_v26, 0.0  ;;  %2326 = vadd.xlane.f32.xlu1 %v2325_v14  ;;  %v3067_v44 = vpop.eup %3066 }
 0x124   : > { %6174 = vst [vmem:[#allocation26_spill] sm:$0xff] %v3748_v40  ;;  %v3758_v47 = vadd.f32 %v2294_v53, %v2293_v23  ;;  %vm6175_vm12 = vcmp.eq.s32.totalorder %v3494_v60, %v3466_v42  ;;  %v3772_v58 = vadd.f32 %v3615_v10, %v3599_v43  ;;  %v3776_v49 = vadd.f32 %v3652_v2, %v3613_v18  ;;  %v3069_v22 = vpop.eup %3068 }
 0x125   : > { %v2310_v12 = vsel %vm6175_vm12, %v3597_v24, 0.0  ;;  %v2295_v54 = vsel %vm2263_vm1, %v3599_v43, 0.0  ;;  %v3782_v60 = vadd.f32 1.0, %v3065_v51  ;;  %v3786_v50 = vadd.f32 %v3657_v15, %v3636_v32  ;;  %2374 = vadd.xlane.f32.xlu0 %v2373_v35 }
 0x126   : > { %v3768_v59 = vadd.f32 %v2310_v12, %v2309_v57  ;;  %vm6177_vm13 = vcmp.eq.s32.totalorder %v3499_v63, %v3466_v42  ;;  %vm6178_vm14 = vcmp.eq.s32.totalorder %v3502_v0, %v3448_v31  ;;  %v3796_v5 = vadd.f32 1.0, %v3067_v44  ;;  %v3071_v57 = vpop.eup %3070 }
 0x127   : > { %6176 = vst [vmem:[#allocation27_spill] sm:$0xff] %v3782_v60  ;;  %v2296_v14 = vsel %vm6177_vm13, %v3615_v10, 0.0  ;;  %v2311_v52 = vsel %vm6178_vm14, %v3613_v18, 0.0  ;;  %v3800_v23 = vadd.f32 %v3679_v34, %v3665_v19  ;;  %v2312_v53 = vsel %vm2280_vm2, %v3652_v2, 0.0  ;;  %2377 = vadd.xlane.f32.xlu1 %v2376_v41 }
 0x128   : > { %6179 = vst [vmem:[#allocation28_spill] sm:$0xff] %v3796_v5  ;;  %v2297_v63 = vsel %vm2265_vm0, %v3636_v32, 0.0  ;;  %v2585_v12 = vadd.f32 %v2584_v61, %v3782_v60  ;;  %v3811_v51 = vadd.f32 1.0, %v3069_v22  ;;  %v3813_v44 = vadd.f32 %v2296_v14, %v2295_v54 }
 0x129   : > { %v2298_v29 = vsel %vm2266_vm3, %v3657_v15, 0.0  ;;  %v3819_v0 = vadd.f32 1.0, %v3071_v57  ;;  %v3821_v30 = vadd.f32 %v2312_v53, %v2311_v52  ;;  %v2313_v61 = vsel %vm2281_vm4, %v3665_v19, 0.0  ;;  %2398 = vadd.xlane.f32.xlu0 %v2397_v16 }
 0x12a   : > { %6180 = vst [vmem:[#allocation29_spill] sm:$0xff] %v3811_v51  ;;  %v2314_v35 = vsel %vm2282_vm5, %v3679_v34, 0.0  ;;  %vm2285_vm15 = vcmp.eq.s32.totalorder %v3537_v25, %v3448_v31  ;;  %v3834_v3 = vadd.f32 %v2585_v12, %v3541_v37  ;;  %v2606_v41 = vadd.f32 %v2605_v11, %v3811_v51 }
 0x12b   : > { %6181 = vst [vmem:[#allocation30_spill] sm:$0xff] %v3819_v0  ;;  %v3837_v54 = vadd.f32 %v2298_v29, %v2297_v63  ;;  %v3839_v14 = vadd.f32 %v2314_v35, %v2313_v61  ;;  %vm2286_vm0 = vcmp.eq.s32.totalorder %v3537_v25, %v3466_v42  ;;  %v3845_v52 = vadd.f32 %v3723_v13, %v3704_v38 }
 0x12c   : > { %6182 = vst [vmem:[#allocation31_spill] sm:$0xff] %v3834_v3  ;;  %v3849_v4 = vadd.f32 %v3748_v40, %v3710_v46  ;;  %v2299_v11 = vsel %vm2267_vm6, %v3704_v38, 0.0  ;;  %v2300_v29 = vsel %vm2268_vm7, %v3723_v13, 0.0  ;;  %v3860_v22 = vadd.f32 %v2606_v41, %v3548_v1  ;;  %2401 = vadd.xlane.f32.xlu1 %v2400_v45 }
 0x12d   : > { %v3864_v53 = vadd.f32 %v3811_v51, %v3782_v60  ;;  %v3866_v63 = vadd.f32 %v2300_v29, %v2299_v11  ;;  %v2315_v57 = vsel %vm2283_vm8, %v3710_v46, 0.0  ;;  %v3874_v9 = vadd.f32 %v3819_v0, %v3796_v5  ;;  %2350 = vadd.xlane.f32.xlu0 %v2349_v17 }
 0x12e   : > { %6183 = vst [vmem:[#allocation32_spill] sm:$0xff] %v3860_v22  ;;  %v2316_v16 = vsel %vm2284_vm9, %v3748_v40, 0.0  ;;  %v2301_v12 = vsel %vm2269_vm10, %v3782_v60, 0.0  ;;  %v617_v61 = vadd.f32 1.0, %v3539_v27  ;;  %v2302_v45 = vsel %vm2270_vm11, %v3811_v51, 0.0 }
 0x12f   : > { %v3885_v35 = vadd.f32 %v2316_v16, %v2315_v57  ;;  %v618_v41 = vadd.f32 1.0, %v3544_v48  ;;  %v649_v11 = vadd.f32 2.0, %v3539_v27  ;;  %v650_v28 = vadd.f32 2.0, %v3544_v48 }
 0x130   : > { %v681_v29 = vadd.f32 3.0, %v3539_v27  ;;  %v682_v22 = vadd.f32 3.0, %v3544_v48  ;;  %v3897_v3 = vadd.f32 4.0, %v3539_v27  ;;  %v3900_v57 = vadd.f32 4.0, %v3544_v48  ;;  %2329 = vadd.xlane.f32.xlu1 %v3758_v47 }
 0x131   : > { %v745_v55 = vmul.f32 %v617_v61, %v3539_v27  ;;  %v746_v16 = vmul.f32 %v618_v41, %v3544_v48  ;;  %v841_v40 = vadd.f32 %v617_v61, %v3539_v27  ;;  %v842_v60 = vadd.f32 %v618_v41, %v3544_v48  ;;  %2380 = vadd.xlane.f32.xlu0 %v3772_v58 }
 0x132   : > { %v777_v46 = vmul.f32 %v681_v29, %v649_v11  ;;  %v778_v51 = vmul.f32 %v682_v22, %v650_v28  ;;  %v873_v13 = vadd.f32 %v681_v29, %v649_v11  ;;  %v3907_v38 = vadd.f32 %v2302_v45, %v2301_v12 }
 0x133   : > { %v874_v34 = vadd.f32 %v682_v22, %v650_v28  ;;  %3072 = vrcp.f32 %v3897_v3  ;;  %v3911_v17 = vadd.f32 -1.0, %v3539_v27  ;;  %v2317_v22 = vsel %vm2285_vm15, %v3796_v5, 0.0 }
 0x134   : > { %v3913_v19 = vmul.f32 %v777_v46, %v745_v55  ;;  %v3915_v15 = vmul.f32 %v778_v51, %v746_v16  ;;  %v905_v61 = vmul.f32 %v841_v40, %v777_v46  ;;  %v906_v32 = vmul.f32 %v842_v60, %v778_v51  ;;  %2353 = vadd.xlane.f32.xlu1 %v3768_v59 }
 0x135   : > { %v937_v47 = vmul.f32 %v873_v13, %v745_v55  ;;  %v938_v2 = vmul.f32 %v874_v34, %v746_v16  ;;  %3074 = vrcp.f32 %v3900_v57  ;;  %v2318_v27 = vsel %vm2286_vm0, %v3819_v0, 0.0  ;;  %2404 = vadd.xlane.f32.xlu0 %v3776_v49 }
 0x136   : > { %3076 = vrcp.f32 %v3913_v19  ;;  %v633_v46 = vadd.f32 1.0, %v3541_v37  ;;  %v634_v34 = vadd.f32 1.0, %v3548_v1  ;;  %v3937_v31 = vadd.f32 -1.0, %v3544_v48 }
 0x137   : > { %v3931_v13 = vadd.f32 %v937_v47, %v905_v61  ;;  %v3933_v40 = vadd.f32 %v938_v2, %v906_v32  ;;  %3078 = vrcp.f32 %v3915_v15  ;;  %v665_v59 = vadd.f32 2.0, %v3541_v37 }
 0x138   : > { %3080 = vlog2.f32 %v3897_v3  ;;  %v666_v42 = vadd.f32 2.0, %v3548_v1  ;;  %v697_v25 = vadd.f32 3.0, %v3541_v37  ;;  %v3945_v58 = vadd.f32 %v2318_v27, %v2317_v22  ;;  %2383 = vadd.xlane.f32.xlu1 %v3786_v50 }
 0x139   : > { %3082 = vlog2.f32 %v3900_v57  ;;  %v698_v32 = vadd.f32 3.0, %v3548_v1  ;;  %v3949_v2 = vadd.f32 4.0, %v3541_v37  ;;  %v761_v48 = vmul.f32 %v633_v46, %v3541_v37  ;;  %2332 = vadd.xlane.f32.xlu0 %v3813_v44 }
 0x13a   : > { %v762_v60 = vmul.f32 %v634_v34, %v3548_v1  ;;  %v793_v51 = vmul.f32 %v697_v25, %v665_v59  ;;  %v857_v12 = vadd.f32 %v633_v46, %v3541_v37  ;;  %v858_v49 = vadd.f32 %v634_v34, %v3548_v1 }
 0x13b   : > { %v794_v45 = vmul.f32 %v698_v32, %v666_v42  ;;  %v889_v41 = vadd.f32 %v697_v25, %v665_v59  ;;  %v890_v11 = vadd.f32 %v698_v32, %v666_v42  ;;  %v3957_v28 = vadd.f32 4.0, %v3548_v1 }
 0x13c   : > { %v3959_v29 = vmul.f32 %v793_v51, %v761_v48  ;;  %v921_v55 = vmul.f32 %v857_v12, %v793_v51  ;;  %3084 = vrcp.f32 %v3949_v2  ;;  %2407 = vadd.xlane.f32.xlu1 %v3800_v23  ;;  %v3969_v46 = vadd.f32 -1.0, %v3541_v37 }
 0x13d   : > { %6184 = vst [vmem:[#allocation33_spill] sm:$0xff] %v3957_v28  ;;  %v3073_v50 = vpop.eup %3072  ;;  %v3963_v16 = vmul.f32 %v794_v45, %v762_v60  ;;  %v922_v61 = vmul.f32 %v858_v49, %v794_v45  ;;  %v953_v47 = vmul.f32 %v889_v41, %v761_v48  ;;  %v954_v22 = vmul.f32 %v890_v11, %v762_v60 }
 0x13e   : > { %6185 = vst [vmem:[#allocation34_spill] sm:$0xff] %v3959_v29  ;;  %v1257_v27 = vmul.f32 %v3073_v50, %v3897_v3  ;;  %3086 = vrcp.f32 %v3959_v29  ;;  %v3972_v34 = vadd.f32 -1.0, %v3548_v1  ;;  %v3980_v25 = vadd.f32 1.0, %v3546_v56  ;;  %2356 = vadd.xlane.f32.xlu0 %v3821_v30 }
 0x13f   : > { %6186 = vst [vmem:[#allocation35_spill] sm:$0xff] %v3963_v16  ;;  %v3075_v59 = vpop.eup %3074  ;;  %v3974_v42 = vadd.f32 %v953_v47, %v921_v55  ;;  %v3976_v44 = vadd.f32 %v954_v22, %v922_v61  ;;  %3088 = vrcp.f32 %v3963_v16  ;;  %v3985_v37 = vadd.f32 1.0, %v3554_v8 }
 0x140   : > { %v3077_v23 = vpop.eup %3076  ;;  %v1258_v32 = vmul.f32 %v3075_v59, %v3900_v57  ;;  %v1289_v48 = vsub.f32 2.0, %v1257_v27  ;;  %3090 = vrcp.f32 %v3957_v28  ;;  %v3991_v51 = vadd.f32 2.0, %v3546_v56  ;;  %2335 = vadd.xlane.f32.xlu1 %v3837_v54 }
 0x141   : > { %v3079_v1 = vpop.eup %3078  ;;  %v1097_v60 = vmul.f32 %v3077_v23, %v3913_v19  ;;  %3092 = vlog2.f32 %v3949_v2  ;;  %v3994_v12 = vadd.f32 2.0, %v3554_v8  ;;  %v4004_v47 = vadd.f32 3.0, %v3546_v56 }
 0x142   : > { %v3081_v45 = vpop.eup %3080  ;;  %v1098_v49 = vmul.f32 %v3079_v1, %v3915_v15  ;;  %v1290_v41 = vsub.f32 2.0, %v1258_v32  ;;  %v3998_v11 = vmul.f32 %v3073_v50, %v1289_v48  ;;  %3094 = vlog2.f32 %v3957_v28  ;;  %2386 = vadd.xlane.f32.xlu0 %v3845_v52 }
 0x143   : > { %v3083_v30 = vpop.eup %3082  ;;  %v1129_v55 = vsub.f32 2.0, %v1097_v60  ;;  %v4001_v61 = vmul.f32 0.6931472, %v3081_v45  ;;  %v4007_v22 = vadd.f32 3.0, %v3554_v8  ;;  %v4016_v50 = vadd.f32 4.0, %v3546_v56 }
 0x144   : > { %v1130_v27 = vsub.f32 2.0, %v1098_v49  ;;  %v4009_v0 = vmul.f32 %v3075_v59, %v1290_v41  ;;  %v4013_v54 = vmul.f32 %v3998_v11, %v3998_v11  ;;  %v4019_v48 = vmul.f32 0.6931472, %v3083_v30  ;;  %2359 = vadd.xlane.f32.xlu1 %v3839_v14 }
 0x145   : > { %v1161_v32 = vmul.f32 %v3077_v23, %v1129_v55  ;;  %v1865_v60 = vmul.f32 0.5, %v3998_v11  ;;  %v4023_v45 = vadd.f32 4.0, %v3554_v8  ;;  %v4039_v18 = vmul.f32 %v3980_v25, %v3546_v56 }
 0x146   : > { %v3085_v49 = vpop.eup %3084  ;;  %v1162_v59 = vmul.f32 %v3079_v1, %v1130_v27  ;;  %v4028_v41 = vmul.f32 %v4009_v0, %v4009_v0  ;;  %v1866_v5 = vmul.f32 0.5, %v4009_v0  ;;  %v1929_v52 = vmul.f32 0.003968254, %v4013_v54  ;;  %2410 = vadd.xlane.f32.xlu0 %v3849_v4 }
 0x147   : > { %v4033_v23 = vmul.f32 %v1161_v32, %v3931_v13  ;;  %v1897_v30 = vsub.f32 %v4001_v61, %v1865_v60  ;;  %v1273_v55 = vmul.f32 %v3085_v49, %v3949_v2  ;;  %v748_v43 = vmul.f32 %v3985_v37, %v3554_v8 }
 0x148   : > { %v3087_v14 = vpop.eup %3086  ;;  %v4042_v1 = vmul.f32 %v1162_v59, %v3933_v40  ;;  %v1930_v27 = vmul.f32 0.003968254, %v4028_v41  ;;  %v1961_v10 = vsub.f32 0.008333334, %v1929_v52  ;;  %v1898_v32 = vsub.f32 %v4019_v48, %v1866_v5  ;;  %2389 = vadd.xlane.f32.xlu1 %v3864_v53 }
 0x149   : > { %v3089_v13 = vpop.eup %3088  ;;  %v1113_v60 = vmul.f32 %v3087_v14, %v3959_v29  ;;  %v1305_v24 = vsub.f32 2.0, %v1273_v55  ;;  %v779_v26 = vmul.f32 %v4004_v47, %v3991_v51  ;;  %v780_v6 = vmul.f32 %v4007_v22, %v3994_v12 }
 0x14a   : > { %v3091_v33 = vpop.eup %3090  ;;  %v1962_v40 = vsub.f32 0.008333334, %v1930_v27  ;;  %v1993_v59 = vmul.f32 %v1961_v10, %v4013_v54  ;;  %v1114_v52 = vmul.f32 %v3089_v13, %v3963_v16  ;;  %v843_v55 = vadd.f32 %v3980_v25, %v3546_v56  ;;  %2338 = vadd.xlane.f32.xlu0 %v3866_v63 }
 0x14b   : > { %v3093_v4 = vpop.eup %3092  ;;  %v1145_v62 = vsub.f32 2.0, %v1113_v60  ;;  %v1274_v5 = vmul.f32 %v3091_v33, %v3957_v28  ;;  %v4058_v36 = vmul.f32 %v3085_v49, %v1305_v24  ;;  %v4064_v10 = vmul.f32 %v779_v26, %v4039_v18 }
 0x14c   : > { %v3095_v39 = vpop.eup %3094  ;;  %v1994_v53 = vmul.f32 %v1962_v40, %v4028_v41  ;;  %v2025_v27 = vsub.f32 0.083333336, %v1993_v59  ;;  %v1146_v21 = vsub.f32 2.0, %v1114_v52  ;;  %v4071_v24 = vmul.f32 0.6931472, %v3093_v4  ;;  %2413 = vadd.xlane.f32.xlu1 %v3874_v9 }
 0x14d   : > { %v1177_v16 = vmul.f32 %v3087_v14, %v1145_v62  ;;  %v1306_v29 = vsub.f32 2.0, %v1274_v5  ;;  %v4069_v60 = vmul.f32 %v4058_v36, %v4058_v36  ;;  %v4075_v59 = vmul.f32 0.6931472, %v3095_v39 }
 0x14e   : > { %v2026_v25 = vsub.f32 0.083333336, %v1994_v53  ;;  %v2057_v49 = vmul.f32 %v2025_v27, %v4013_v54  ;;  %v1178_v40 = vmul.f32 %v3089_v13, %v1146_v21  ;;  %v1881_v62 = vmul.f32 0.5, %v4058_v36  ;;  %2362 = vadd.xlane.f32.xlu0 %v3885_v35 }
 0x14f   : > { %v1209_v52 = vmul.f32 %v1177_v16, %v3974_v42  ;;  %v4078_v28 = vmul.f32 %v3091_v33, %v1306_v29  ;;  %v1945_v63 = vmul.f32 0.003968254, %v4069_v60  ;;  %v4086_v9 = vmul.f32 %v780_v6, %v748_v43 }
 0x150   : > { %v2058_v14 = vmul.f32 %v2026_v25, %v4028_v41  ;;  %v2089_v4 = vsub.f32 %v1897_v30, %v2057_v49  ;;  %v4084_v5 = vmul.f32 %v1178_v40, %v3976_v44  ;;  %v844_v29 = vadd.f32 %v3985_v37, %v3554_v8  ;;  %2341 = vadd.xlane.f32.xlu1 %v3907_v38 }
 0x151   : > { %v4091_v21 = vmul.f32 %v4078_v28, %v4078_v28  ;;  %v1882_v39 = vmul.f32 0.5, %v4078_v28  ;;  %v1977_v33 = vsub.f32 0.008333334, %v1945_v63  ;;  %v875_v44 = vadd.f32 %v4004_v47, %v3991_v51 }
 0x152   : > { %v2090_v16 = vsub.f32 %v1898_v32, %v2058_v14  ;;  %v2121_v42 = vsub.f32 %v2089_v4, %v4033_v23  ;;  %v876_v35 = vadd.f32 %v4007_v22, %v3994_v12  ;;  %v1913_v30 = vsub.f32 %v4071_v24, %v1881_v62 }
 0x153   : > { %v1946_v13 = vmul.f32 0.003968254, %v4091_v21  ;;  %v2009_v53 = vmul.f32 %v1977_v33, %v4069_v60  ;;  %v907_v27 = vmul.f32 %v843_v55, %v779_v26  ;;  %v908_v32 = vmul.f32 %v844_v29, %v780_v6 }
 0x154   : > { %v2122_v37 = vsub.f32 %v2090_v16, %v4042_v1  ;;  %v4107_v38 = vmul.f32 %v3911_v17, %v2121_v42  ;;  %v939_v23 = vmul.f32 %v875_v44, %v4039_v18  ;;  %v940_v47 = vmul.f32 %v876_v35, %v748_v43  ;;  %2365 = vadd.xlane.f32.xlu1 %v3945_v58 }
 0x155   : > { %v1978_v25 = vsub.f32 0.008333334, %v1946_v13  ;;  %v2041_v51 = vsub.f32 0.083333336, %v2009_v53  ;;  %3096 = vrcp.f32 %v4064_v10  ;;  %v1914_v26 = vsub.f32 %v4075_v59, %v1882_v39 }
 0x156   : > { %v4112_v12 = vmul.f32 %v3937_v31, %v2122_v37  ;;  %v4116_v22 = vadd.f32 %v939_v23, %v907_v27  ;;  %3098 = vrcp.f32 %v4086_v9  ;;  %v4123_v43 = vadd.f32 -1.0, %v3546_v56 }
 0x157   : > { %v2010_v6 = vmul.f32 %v1978_v25, %v4091_v21  ;;  %v2073_v18 = vmul.f32 %v2041_v51, %v4069_v60  ;;  %3100 = vrcp.f32 %v4016_v50  ;;  %v4127_v31 = vadd.f32 %v940_v47, %v908_v32 }
 0x158   : > { %v2497_v17 = vadd.f32 %v4112_v12, %v4107_v38  ;;  %3102 = vrcp.f32 %v4023_v45  ;;  %v2916_v58 = vadd.f32 -0.5, %v3897_v3  ;;  %v2917_v49 = vadd.f32 -0.5, %v3900_v57 }
 0x159   : > { %v2042_v1 = vsub.f32 0.083333336, %v2010_v6  ;;  %v2105_v55 = vsub.f32 %v1913_v30, %v2073_v18  ;;  %3104 = vlog2.f32 %v4016_v50  ;;  %v1577_v40 = vmul.f32 0.0005952381, %v4013_v54 }
 0x15a   : > { %2498 = vadd.xlane.f32.xlu0 %v2497_v17  ;;  %3106 = vlog2.f32 %v4023_v45  ;;  %v1481_v56 = vmul.f32 %v2916_v58, %v4001_v61  ;;  %v1578_v62 = vmul.f32 0.0005952381, %v4028_v41  ;;  %v1482_v4 = vmul.f32 %v2917_v49, %v4019_v48 }
 0x15b   : > { %v2074_v63 = vmul.f32 %v2042_v1, %v4091_v21  ;;  %v2137_v14 = vsub.f32 %v2105_v55, %v1209_v52  ;;  %3108 = vlog2.f32 %v3913_v19  ;;  %v1609_v33 = vsub.f32 0.0007936508, %v1577_v40 }
 0x15c   : > { %3110 = vlog2.f32 %v3915_v15  ;;  %v1513_v39 = vsub.f32 %v1481_v56, %v3897_v3  ;;  %v1610_v29 = vsub.f32 0.0007936508, %v1578_v62  ;;  %v4146_v42 = vadd.f32 -1.0, %v3554_v8 }
 0x15d   : > { %v2106_v16 = vsub.f32 %v1914_v26, %v2074_v63  ;;  %v4143_v61 = vmul.f32 %v3969_v46, %v2137_v14  ;;  %v1514_v44 = vsub.f32 %v1482_v4, %v3900_v57  ;;  %v1641_v19 = vmul.f32 %v1609_v33, %v4013_v54 }
 0x15e   : > { %v1545_v52 = vadd.f32 0.9189385, %v1513_v39  ;;  %v1642_v48 = vmul.f32 %v1610_v29, %v4028_v41  ;;  %v4152_v15 = vadd.f32 1.0, %v3552_v7  ;;  %v636_v46 = vadd.f32 1.0, %v3558_v20 }
 0x15f   : > { %v3097_v3 = vpop.eup %3096  ;;  %v2138_v35 = vsub.f32 %v2106_v16, %v4084_v5  ;;  %v1546_v30 = vadd.f32 0.9189385, %v1514_v44  ;;  %v4157_v13 = vadd.f32 2.0, %v3552_v7  ;;  %v1673_v53 = vadd.f32 -0.0027777778, %v1641_v19 }
 0x160   : > { %v3099_v8 = vpop.eup %3098  ;;  %v1099_v57 = vmul.f32 %v3097_v3, %v4064_v10  ;;  %v1674_v27 = vadd.f32 -0.0027777778, %v1642_v48  ;;  %v668_v37 = vadd.f32 2.0, %v3558_v20  ;;  %v699_v5 = vadd.f32 3.0, %v3552_v7 }
 0x161   : > { %v3101_v32 = vpop.eup %3100  ;;  %v4162_v23 = vmul.f32 %v3972_v34, %v2138_v35  ;;  %v1100_v25 = vmul.f32 %v3099_v8, %v4086_v9  ;;  %v700_v51 = vadd.f32 3.0, %v3558_v20  ;;  %v1705_v18 = vmul.f32 %v1673_v53, %v4013_v54 }
 0x162   : > { %v3103_v47 = vpop.eup %3102  ;;  %v1131_v26 = vsub.f32 2.0, %v1099_v57  ;;  %v1259_v6 = vmul.f32 %v3101_v32, %v4016_v50  ;;  %v1706_v17 = vmul.f32 %v1674_v27, %v4028_v41  ;;  %v4174_v49 = vadd.f32 4.0, %v3552_v7 }
 0x163   : > { %v3105_v58 = vpop.eup %3104  ;;  %v2521_v1 = vadd.f32 %v4162_v23, %v4143_v61  ;;  %v1132_v34 = vsub.f32 2.0, %v1100_v25  ;;  %v1260_v55 = vmul.f32 %v3103_v47, %v4023_v45  ;;  %v1737_v63 = vadd.f32 0.083333336, %v1705_v18 }
 0x164   : > { %v3107_v56 = vpop.eup %3106  ;;  %v1163_v40 = vmul.f32 %v3097_v3, %v1131_v26  ;;  %v1291_v62 = vsub.f32 2.0, %v1259_v6  ;;  %v4177_v14 = vadd.f32 4.0, %v3558_v20  ;;  %v4179_v39 = vmul.f32 0.6931472, %v3105_v58 }
 0x165   : > { %v3109_v54 = vpop.eup %3108  ;;  %2522 = vadd.xlane.f32.xlu0 %v2521_v1  ;;  %v1164_v41 = vmul.f32 %v3099_v8, %v1132_v34  ;;  %v1292_v4 = vsub.f32 2.0, %v1260_v55  ;;  %v1738_v33 = vadd.f32 0.083333336, %v1706_v17  ;;  %v4186_v19 = vmul.f32 0.6931472, %v3107_v56 }
 0x166   : > { %v3111_v29 = vpop.eup %3110  ;;  %v4182_v16 = vmul.f32 %v1163_v40, %v4116_v22  ;;  %v4184_v44 = vmul.f32 %v3101_v32, %v1291_v62  ;;  %v1769_v48 = vmul.f32 %v1737_v63, %v3998_v11  ;;  %v1002_v8 = vmul.f32 0.6931472, %v3109_v54 }
 0x167   : > { %v4190_v3 = vmul.f32 %v1164_v41, %v4127_v31  ;;  %v4192_v35 = vmul.f32 %v3103_v47, %v1292_v4  ;;  %v1770_v57 = vmul.f32 %v1738_v33, %v4009_v0  ;;  %v763_v32 = vmul.f32 %v4152_v15, %v3552_v7 }
 0x168   : > { %v4197_v53 = vmul.f32 %v4184_v44, %v4184_v44  ;;  %v1867_v22 = vmul.f32 0.5, %v4184_v44  ;;  %v1801_v27 = vadd.f32 %v1769_v48, %v1545_v52  ;;  %v1004_v31 = vmul.f32 0.6931472, %v3111_v29 }
 0x169   : > { %v4204_v11 = vmul.f32 %v4192_v35, %v4192_v35  ;;  %v1802_v25 = vadd.f32 %v1770_v57, %v1546_v30  ;;  %v764_v47 = vmul.f32 %v636_v46, %v3558_v20  ;;  %v1868_v0 = vmul.f32 0.5, %v4192_v35 }
 0x16a   : > { %v1931_v26 = vmul.f32 0.003968254, %v4197_v53  ;;  %v4209_v6 = vsub.f32 %v1801_v27, %v1002_v8  ;;  %v795_v18 = vmul.f32 %v699_v5, %v4157_v13  ;;  %v1899_v52 = vsub.f32 %v4179_v39, %v1867_v22 }
 0x16b   : > { %v1932_v17 = vmul.f32 0.003968254, %v4204_v11  ;;  %v4214_v58 = vsub.f32 %v1802_v25, %v1004_v31  ;;  %v796_v1 = vmul.f32 %v700_v51, %v668_v37  ;;  %v859_v30 = vadd.f32 %v4152_v15, %v3552_v7 }
 0x16c   : > { %v1963_v34 = vsub.f32 0.008333334, %v1931_v26  ;;  %v4216_v55 = vmul.f32 %v795_v18, %v763_v32  ;;  %v860_v56 = vadd.f32 %v636_v46, %v3558_v20  ;;  %v891_v54 = vadd.f32 %v699_v5, %v4157_v13 }
 0x16d   : > { %v1964_v40 = vsub.f32 0.008333334, %v1932_v17  ;;  %v2432_v62 = vadd.f32 %v4214_v58, %v4209_v6  ;;  %v4223_v63 = vmul.f32 %v796_v1, %v764_v47  ;;  %v1900_v41 = vsub.f32 %v4186_v19, %v1868_v0 }
 0x16e   : > { %v1995_v4 = vmul.f32 %v1963_v34, %v4197_v53  ;;  %v892_v33 = vadd.f32 %v700_v51, %v668_v37  ;;  %v923_v29 = vmul.f32 %v859_v30, %v795_v18  ;;  %v924_v15 = vmul.f32 %v860_v56, %v796_v1  ;;  %v6188_v34 = vld [vmem:[#allocation34_spill] sm:$0xff] }
 0x16f   : > { %v1996_v48 = vmul.f32 %v1964_v40, %v4204_v11  ;;  %2433 = vadd.xlane.f32.xlu0 %v2432_v62  ;;  %v955_v8 = vmul.f32 %v891_v54, %v763_v32  ;;  %3112 = vrcp.f32 %v4216_v55  ;;  %v4232_v22 = vadd.f32 -1.0, %v3552_v7  ;;  %v6187_v32 = vld [vmem:[#allocation33_spill] sm:$0xff]  ;;  %v6189_v62 = vld [vmem:[#allocation35_spill] sm:$0xff] }
 0x170   : > { %v2027_v46 = vsub.f32 0.083333336, %v1995_v4  ;;  %v956_v57 = vmul.f32 %v892_v33, %v764_v47  ;;  %3114 = vrcp.f32 %v4223_v63  ;;  %v4236_v37 = vadd.f32 -1.0, %v3558_v20 }
 0x171   : > { %v2028_v13 = vsub.f32 0.083333336, %v1996_v48  ;;  %3116 = vrcp.f32 %v4174_v49  ;;  %v2932_v5 = vadd.f32 -0.5, %v3949_v2  ;;  %v4240_v27 = vadd.f32 %v955_v8, %v923_v29 }
 0x172   : > { %v2059_v51 = vmul.f32 %v2027_v46, %v4197_v53  ;;  %3118 = vrcp.f32 %v4177_v14  ;;  %v2933_v31 = vadd.f32 -0.5, %v6187_v32  ;;  %v1593_v0 = vmul.f32 0.0005952381, %v4069_v60 }
 0x173   : > { %v2060_v25 = vmul.f32 %v2028_v13, %v4204_v11  ;;  %3120 = vlog2.f32 %v4174_v49  ;;  %v1497_v47 = vmul.f32 %v2932_v5, %v4071_v24  ;;  %v1594_v17 = vmul.f32 0.0005952381, %v4091_v21 }
 0x174   : > { %v2091_v26 = vsub.f32 %v1899_v52, %v2059_v51  ;;  %3122 = vlog2.f32 %v4177_v14  ;;  %v1498_v18 = vmul.f32 %v2933_v31, %v4075_v59  ;;  %v1625_v56 = vsub.f32 0.0007936508, %v1593_v0 }
 0x175   : > { %v2092_v1 = vsub.f32 %v1900_v41, %v2060_v25  ;;  %3124 = vlog2.f32 %v6188_v34  ;;  %v1529_v30 = vsub.f32 %v1497_v47, %v3949_v2  ;;  %v1626_v54 = vsub.f32 0.0007936508, %v1594_v17 }
 0x176   : > { %v2123_v40 = vsub.f32 %v2091_v26, %v4182_v16  ;;  %3126 = vlog2.f32 %v6189_v62  ;;  %v1530_v24 = vsub.f32 %v1498_v18, %v6187_v32  ;;  %v988_v4 = vadd.f32 %v956_v57, %v924_v15 }
 0x177   : > { %v2124_v52 = vsub.f32 %v2092_v1, %v4190_v3  ;;  %v1657_v59 = vmul.f32 %v1625_v56, %v4069_v60  ;;  %3128 = vlog2.f32 %v4064_v10  ;;  %v1561_v33 = vadd.f32 0.9189385, %v1529_v30 }
 0x178   : > { %v2187_v41 = vmul.f32 %v4123_v43, %v2123_v40  ;;  %v1562_v29 = vadd.f32 0.9189385, %v1530_v24  ;;  %v1658_v2 = vmul.f32 %v1626_v54, %v4091_v21  ;;  %3130 = vlog2.f32 %v4086_v9 }
 0x179   : > { %v3113_v48 = vpop.eup %3112  ;;  %v2188_v16 = vmul.f32 %v4146_v42, %v2124_v52  ;;  %v1689_v8 = vadd.f32 -0.0027777778, %v1657_v59  ;;  %v2918_v46 = vadd.f32 -0.5, %v4016_v50  ;;  %v2919_v43 = vadd.f32 -0.5, %v4023_v45 }
 0x17a   : > { %v3115_v3 = vpop.eup %3114  ;;  %v4265_v15 = vadd.f32 %v2187_v41, %v4107_v38  ;;  %v1115_v10 = vmul.f32 %v3113_v48, %v4216_v55  ;;  %v1690_v57 = vadd.f32 -0.0027777778, %v1658_v2  ;;  %v1579_v47 = vmul.f32 0.0005952381, %v4197_v53 }
 0x17b   : > { %v3117_v13 = vpop.eup %3116  ;;  %v2500_v5 = vadd.f32 %v2188_v16, %v2187_v41  ;;  %v4270_v51 = vadd.f32 %v2188_v16, %v4112_v12  ;;  %v1116_v42 = vmul.f32 %v3115_v3, %v4223_v63  ;;  %v1721_v9 = vmul.f32 %v1689_v8, %v4069_v60 }
 0x17c   : > { %v3119_v32 = vpop.eup %3118  ;;  %v1147_v31 = vsub.f32 2.0, %v1115_v10  ;;  %v1275_v25 = vmul.f32 %v3117_v13, %v4174_v49  ;;  %v1722_v38 = vmul.f32 %v1690_v57, %v4091_v21  ;;  %v1483_v12 = vmul.f32 %v2918_v46, %v4179_v39 }
 0x17d   : > { %v3121_v0 = vpop.eup %3120  ;;  %2501 = vadd.xlane.f32.xlu1 %v2500_v5  ;;  %v1148_v26 = vsub.f32 2.0, %v1116_v42  ;;  %v1276_v18 = vmul.f32 %v3119_v32, %v4177_v14  ;;  %v1753_v17 = vadd.f32 0.083333336, %v1721_v9  ;;  %v1484_v56 = vmul.f32 %v2919_v43, %v4186_v19 }
 0x17e   : > { %v3123_v1 = vpop.eup %3122  ;;  %v1179_v34 = vmul.f32 %v3113_v48, %v1147_v31  ;;  %v1307_v30 = vsub.f32 2.0, %v1275_v25  ;;  %v1754_v60 = vadd.f32 0.083333336, %v1722_v38  ;;  %v4280_v21 = vmul.f32 0.6931472, %v3121_v0 }
 0x17f   : > { %v3125_v40 = vpop.eup %3124  ;;  %v1180_v62 = vmul.f32 %v3115_v3, %v1148_v26  ;;  %v1308_v24 = vsub.f32 2.0, %v1276_v18  ;;  %v1785_v54 = vmul.f32 %v1753_v17, %v4058_v36  ;;  %v4288_v39 = vmul.f32 0.6931472, %v3123_v1 }
 0x180   : > { %v3127_v52 = vpop.eup %3126  ;;  %v4284_v59 = vmul.f32 %v1179_v34, %v4240_v27  ;;  %v4286_v41 = vmul.f32 %v3117_v13, %v1307_v30  ;;  %v1786_v2 = vmul.f32 %v1754_v60, %v4078_v28  ;;  %v1034_v8 = vmul.f32 0.6931472, %v3125_v40  ;;  %v6192_v30 = vld [vmem:[#allocation7_spill] sm:$0xff]  ;;  %v6193_v60 = vld [vmem:[#allocation9_spill] sm:$0xff] }
 0x181   : > { %v3129_v48 = vpop.eup %3128  ;;  %v4291_v16 = vmul.f32 %v1180_v62, %v988_v4  ;;  %v4293_v19 = vmul.f32 %v3119_v32, %v1308_v24  ;;  %v1817_v46 = vadd.f32 %v1785_v54, %v1561_v33  ;;  %v1036_v3 = vmul.f32 0.6931472, %v3127_v52 }
 0x182   : > { %v4297_v36 = vmul.f32 %v4286_v41, %v4286_v41  ;;  %v1883_v27 = vmul.f32 0.5, %v4286_v41  ;;  %v1818_v10 = vadd.f32 %v1786_v2, %v1562_v29  ;;  %v4300_v57 = vpop.eup %3130  ;;  %v4309_v13 = vmul.f32 0.6931472, %v3129_v48 }
 0x183   : > { %v4304_v28 = vmul.f32 %v4293_v19, %v4293_v19  ;;  %v1884_v4 = vmul.f32 0.5, %v4293_v19  ;;  %v4307_v43 = vsub.f32 %v1817_v46, %v1034_v8  ;;  %v1515_v29 = vsub.f32 %v1483_v12, %v4016_v50 }
 0x184   : > { %v1915_v33 = vsub.f32 %v4280_v21, %v1883_v27  ;;  %v1947_v5 = vmul.f32 0.003968254, %v4297_v36  ;;  %v4313_v42 = vsub.f32 %v1818_v10, %v1036_v3  ;;  %v1516_v31 = vsub.f32 %v1484_v56, %v4023_v45 }
 0x185   : > { %6190 = vst [vmem:[#allocation33_spill] sm:$0xff] %v4307_v43  ;;  %v1916_v9 = vsub.f32 %v4288_v39, %v1884_v4  ;;  %v1948_v32 = vmul.f32 0.003968254, %v4304_v28  ;;  %v1580_v25 = vmul.f32 0.0005952381, %v4204_v11  ;;  %3132 = vlog2.f32 %v4216_v55 }
 0x186   : > { %6191 = vst [vmem:[#allocation34_spill] sm:$0xff] %v4313_v42  ;;  %v1979_v38 = vsub.f32 0.008333334, %v1947_v5  ;;  %v2456_v0 = vadd.f32 %v4313_v42, %v4307_v43  ;;  %v1547_v26 = vadd.f32 0.9189385, %v1515_v29  ;;  %v621_v45 = vadd.f32 1.0, %v6192_v30 }
 0x187   : > { %v1611_v18 = vsub.f32 0.0007936508, %v1579_v47  ;;  %v1980_v17 = vsub.f32 0.008333334, %v1948_v32  ;;  %v1548_v1 = vadd.f32 0.9189385, %v1516_v31 }
 0x188   : > { %v1612_v34 = vsub.f32 0.0007936508, %v1580_v25  ;;  %v2011_v50 = vmul.f32 %v1979_v38, %v4297_v36  ;;  %2457 = vadd.xlane.f32.xlu0 %v2456_v0  ;;  %v622_v56 = vadd.f32 1.0, %v6193_v60  ;;  %v653_v47 = vadd.f32 2.0, %v6192_v30 }
 0x189   : > { %v1643_v12 = vmul.f32 %v1611_v18, %v4197_v53  ;;  %v2012_v40 = vmul.f32 %v1980_v17, %v4304_v28  ;;  %v654_v24 = vadd.f32 2.0, %v6193_v60  ;;  %v685_v55 = vadd.f32 3.0, %v6192_v30 }
 0x18a   : > { %v1644_v62 = vmul.f32 %v1612_v34, %v4204_v11  ;;  %v2043_v54 = vsub.f32 0.083333336, %v2011_v50  ;;  %v686_v2 = vadd.f32 3.0, %v6193_v60  ;;  %v4334_v46 = vadd.f32 4.0, %v6192_v30 }
 0x18b   : > { %v1675_v52 = vadd.f32 -0.0027777778, %v1643_v12  ;;  %v2044_v48 = vsub.f32 0.083333336, %v2012_v40  ;;  %v4337_v27 = vadd.f32 4.0, %v6193_v60  ;;  %v749_v4 = vmul.f32 %v621_v45, %v6192_v30 }
 0x18c   : > { %v1676_v8 = vadd.f32 -0.0027777778, %v1644_v62  ;;  %v2075_v3 = vmul.f32 %v2043_v54, %v4297_v36  ;;  %v750_v5 = vmul.f32 %v622_v56, %v6193_v60  ;;  %v781_v31 = vmul.f32 %v685_v55, %v653_v47 }
 0x18d   : > { %v1707_v10 = vmul.f32 %v1675_v52, %v4197_v53  ;;  %v2076_v29 = vmul.f32 %v2044_v48, %v4304_v28  ;;  %v782_v25 = vmul.f32 %v686_v2, %v654_v24  ;;  %v845_v18 = vadd.f32 %v621_v45, %v6192_v30 }
 0x18e   : > { %v1708_v32 = vmul.f32 %v1676_v8, %v4204_v11  ;;  %v2107_v38 = vsub.f32 %v1915_v33, %v2075_v3  ;;  %v846_v17 = vadd.f32 %v622_v56, %v6193_v60  ;;  %v4347_v12 = vmul.f32 %v781_v31, %v749_v4 }
 0x18f   : > { %v1739_v0 = vadd.f32 0.083333336, %v1707_v10  ;;  %v2108_v34 = vsub.f32 %v1916_v9, %v2076_v29  ;;  %v4349_v53 = vmul.f32 %v782_v25, %v750_v5  ;;  %v877_v54 = vadd.f32 %v685_v55, %v653_v47  ;;  %v3133_v52 = vpop.eup %3132 }
 0x190   : > { %v1740_v50 = vadd.f32 0.083333336, %v1708_v32  ;;  %v2139_v40 = vsub.f32 %v2107_v38, %v4284_v59  ;;  %v878_v11 = vadd.f32 %v686_v2, %v654_v24  ;;  %v909_v45 = vmul.f32 %v845_v18, %v781_v31 }
 0x191   : > { %v1771_v62 = vmul.f32 %v1739_v0, %v4184_v44  ;;  %v2140_v33 = vsub.f32 %v2108_v34, %v4291_v16  ;;  %v910_v8 = vmul.f32 %v846_v17, %v782_v25  ;;  %v941_v3 = vmul.f32 %v877_v54, %v749_v4 }
 0x192   : > { %v1772_v48 = vmul.f32 %v1740_v50, %v4192_v35  ;;  %v4356_v9 = vmul.f32 %v4232_v22, %v2139_v40  ;;  %v942_v10 = vmul.f32 %v878_v11, %v750_v5  ;;  %v1008_v44 = vmul.f32 0.6931472, %v4300_v57  ;;  %v6194_v5 = vld [vmem:[#allocation8_spill] sm:$0xff] }
 0x193   : > { %v1803_v56 = vadd.f32 %v1771_v62, %v1547_v26  ;;  %v4359_v29 = vmul.f32 %v4236_v37, %v2140_v33  ;;  %3134 = vrcp.f32 %v4347_v12  ;;  %v4364_v47 = vadd.f32 %v941_v3, %v909_v45 }
 0x194   : > { %v1804_v59 = vadd.f32 %v1772_v48, %v1548_v1  ;;  %3136 = vrcp.f32 %v4349_v53  ;;  %v4368_v35 = vadd.f32 -1.0, %v6192_v30  ;;  %v4372_v37 = vadd.f32 %v942_v10, %v910_v8 }
 0x195   : > { %v1835_v16 = vsub.f32 %v1803_v56, %v4309_v13  ;;  %v2524_v22 = vadd.f32 %v4359_v29, %v4356_v9  ;;  %3138 = vrcp.f32 %v4334_v46  ;;  %v4380_v13 = vadd.f32 -1.0, %v6193_v60 }
 0x196   : > { %v1836_v26 = vsub.f32 %v1804_v59, %v1008_v44  ;;  %3140 = vrcp.f32 %v4337_v27  ;;  %v2934_v1 = vadd.f32 -0.5, %v4174_v49  ;;  %v2935_v55 = vadd.f32 -0.5, %v4177_v14 }
 0x197   : > { %v4376_v57 = vadd.f32 %v1835_v16, %v4209_v6  ;;  %2525 = vadd.xlane.f32.xlu1 %v2524_v22  ;;  %3142 = vlog2.f32 %v4334_v46  ;;  %v1595_v2 = vmul.f32 0.0005952381, %v4297_v36  ;;  %v1596_v60 = vmul.f32 0.0005952381, %v4304_v28 }
 0x198   : > { %v2435_v30 = vadd.f32 %v1836_v26, %v1835_v16  ;;  %v4384_v24 = vadd.f32 %v1836_v26, %v4214_v58  ;;  %3144 = vlog2.f32 %v4337_v27  ;;  %v1499_v6 = vmul.f32 %v2934_v1, %v4280_v21  ;;  %v6195_v58 = vld [vmem:[#allocation10_spill] sm:$0xff] }
 0x199   : > { %3146 = vlog2.f32 %v4223_v63  ;;  %v1500_v4 = vmul.f32 %v2935_v55, %v4288_v39  ;;  %v637_v32 = vadd.f32 1.0, %v6194_v5  ;;  %v638_v31 = vadd.f32 1.0, %v6195_v58 }
 0x19a   : > { %v1531_v25 = vsub.f32 %v1499_v6, %v4174_v49  ;;  %v1627_v38 = vsub.f32 0.0007936508, %v1595_v2  ;;  %v1628_v0 = vsub.f32 0.0007936508, %v1596_v60  ;;  %v669_v18 = vadd.f32 2.0, %v6194_v5 }
 0x19b   : > { %2436 = vadd.xlane.f32.xlu1 %v2435_v30  ;;  %v1532_v21 = vsub.f32 %v1500_v4, %v4177_v14  ;;  %v670_v17 = vadd.f32 2.0, %v6195_v58  ;;  %v701_v34 = vadd.f32 3.0, %v6194_v5  ;;  %v702_v63 = vadd.f32 3.0, %v6195_v58 }
 0x19c   : > { %v1038_v39 = vmul.f32 0.6931472, %v3133_v52  ;;  %v1563_v50 = vadd.f32 0.9189385, %v1531_v25  ;;  %v1659_v40 = vmul.f32 %v1627_v38, %v4297_v36  ;;  %v1660_v62 = vmul.f32 %v1628_v0, %v4304_v28 }
 0x19d   : > { %v3135_v49 = vpop.eup %3134  ;;  %v1564_v54 = vadd.f32 0.9189385, %v1532_v21  ;;  %v4405_v11 = vadd.f32 4.0, %v6194_v5  ;;  %v765_v33 = vmul.f32 %v637_v32, %v6194_v5  ;;  %v766_v14 = vmul.f32 %v638_v31, %v6195_v58 }
 0x19e   : > { %v3137_v48 = vpop.eup %3136  ;;  %v1101_v45 = vmul.f32 %v3135_v49, %v4347_v12  ;;  %v1691_v8 = vadd.f32 -0.0027777778, %v1659_v40  ;;  %v1692_v56 = vadd.f32 -0.0027777778, %v1660_v62  ;;  %v797_v52 = vmul.f32 %v701_v34, %v669_v18 }
 0x19f   : > { %v3139_v3 = vpop.eup %3138  ;;  %v1102_v10 = vmul.f32 %v3137_v48, %v4349_v53  ;;  %v4412_v44 = vadd.f32 4.0, %v6195_v58  ;;  %v798_v59 = vmul.f32 %v702_v63, %v670_v17  ;;  %v861_v16 = vadd.f32 %v637_v32, %v6194_v5 }
 0x1a0   : > { %v3141_v22 = vpop.eup %3140  ;;  %v1133_v26 = vsub.f32 2.0, %v1101_v45  ;;  %v1261_v1 = vmul.f32 %v3139_v3, %v4334_v46  ;;  %v1723_v30 = vmul.f32 %v1691_v8, %v4297_v36  ;;  %v1724_v55 = vmul.f32 %v1692_v56, %v4304_v28 }
 0x1a1   : > { %v3143_v6 = vpop.eup %3142  ;;  %v1134_v2 = vsub.f32 2.0, %v1102_v10  ;;  %v1262_v60 = vmul.f32 %v3141_v22, %v4337_v27  ;;  %v4419_v4 = vmul.f32 %v797_v52, %v765_v33  ;;  %v862_v25 = vadd.f32 %v638_v31, %v6195_v58 }
 0x1a2   : > { %v3145_v38 = vpop.eup %3144  ;;  %v1165_v0 = vmul.f32 %v3135_v49, %v1133_v26  ;;  %v1293_v21 = vsub.f32 2.0, %v1261_v1  ;;  %v1755_v32 = vadd.f32 0.083333336, %v1723_v30  ;;  %v4422_v40 = vmul.f32 %v798_v59, %v766_v14 }
 0x1a3   : > { %v3147_v62 = vpop.eup %3146  ;;  %v1166_v45 = vmul.f32 %v3137_v48, %v1134_v2  ;;  %v1294_v20 = vsub.f32 2.0, %v1262_v60  ;;  %v4424_v36 = vmul.f32 0.6931472, %v3143_v6  ;;  %v1756_v28 = vadd.f32 0.083333336, %v1724_v55 }
 0x1a4   : > { %v4427_v8 = vmul.f32 %v1165_v0, %v4364_v47  ;;  %v4429_v56 = vmul.f32 %v3139_v3, %v1293_v21  ;;  %v4431_v10 = vmul.f32 0.6931472, %v3145_v38  ;;  %v1787_v31 = vmul.f32 %v1755_v32, %v4286_v41  ;;  %v6199_v32 = vld [vmem:[#allocation13_spill] sm:$0xff] }
 0x1a5   : > { %v4434_v49 = vmul.f32 %v3141_v22, %v1294_v20  ;;  %v1040_v26 = vmul.f32 0.6931472, %v3147_v62  ;;  %v1788_v1 = vmul.f32 %v1756_v28, %v4293_v19  ;;  %v893_v30 = vadd.f32 %v701_v34, %v669_v18 }
 0x1a6   : > { %v4439_v48 = vmul.f32 %v4429_v56, %v4429_v56  ;;  %v1869_v55 = vmul.f32 0.5, %v4429_v56  ;;  %v1819_v47 = vadd.f32 %v1787_v31, %v1563_v50  ;;  %v894_v6 = vadd.f32 %v702_v63, %v670_v17 }
 0x1a7   : > { %v4443_v3 = vmul.f32 %v1166_v45, %v4372_v37  ;;  %v4447_v41 = vmul.f32 %v4434_v49, %v4434_v49  ;;  %v1870_v20 = vmul.f32 0.5, %v4434_v49  ;;  %v1820_v22 = vadd.f32 %v1788_v1, %v1564_v54 }
 0x1a8   : > { %v1933_v19 = vmul.f32 0.003968254, %v4439_v48  ;;  %v4451_v18 = vsub.f32 %v1819_v47, %v1038_v39  ;;  %v925_v34 = vmul.f32 %v861_v16, %v797_v52  ;;  %v926_v2 = vmul.f32 %v862_v25, %v798_v59  ;;  %v6198_v25 = vld [vmem:[#allocation11_spill] sm:$0xff] }
 0x1a9   : > { %v1901_v60 = vsub.f32 %v4424_v36, %v1869_v55  ;;  %v1934_v17 = vmul.f32 0.003968254, %v4447_v41  ;;  %v4455_v63 = vsub.f32 %v1820_v22, %v1040_v26  ;;  %v957_v37 = vmul.f32 %v893_v30, %v765_v33 }
 0x1aa   : > { %6196 = vst [vmem:[#allocation35_spill] sm:$0xff] %v4451_v18  ;;  %v1902_v50 = vsub.f32 %v4431_v10, %v1870_v20  ;;  %v1965_v38 = vsub.f32 0.008333334, %v1933_v19  ;;  %v958_v0 = vmul.f32 %v894_v6, %v766_v14  ;;  %3148 = vrcp.f32 %v4419_v4 }
 0x1ab   : > { %6197 = vst [vmem:[#allocation7_spill] sm:$0xff] %v4455_v63  ;;  %v1966_v54 = vsub.f32 0.008333334, %v1934_v17  ;;  %v2459_v39 = vadd.f32 %v4455_v63, %v4451_v18  ;;  %3150 = vrcp.f32 %v4422_v40  ;;  %v4463_v52 = vadd.f32 -1.0, %v6194_v5 }
 0x1ac   : > { %v1997_v59 = vmul.f32 %v1965_v38, %v4439_v48  ;;  %v4466_v16 = vadd.f32 %v957_v37, %v925_v34  ;;  %v4468_v33 = vadd.f32 %v958_v0, %v926_v2  ;;  %3152 = vrcp.f32 %v4405_v11 }
 0x1ad   : > { %v1998_v14 = vmul.f32 %v1966_v54, %v4447_v41  ;;  %2460 = vadd.xlane.f32.xlu1 %v2459_v39  ;;  %3154 = vrcp.f32 %v4412_v44  ;;  %v623_v21 = vadd.f32 1.0, %v6198_v25  ;;  %v624_v62 = vadd.f32 1.0, %v6199_v32 }
 0x1ae   : > { %v2029_v45 = vsub.f32 0.083333336, %v1997_v59  ;;  %3156 = vlog2.f32 %v4405_v11  ;;  %v655_v28 = vadd.f32 2.0, %v6198_v25  ;;  %v656_v31 = vadd.f32 2.0, %v6199_v32 }
 0x1af   : > { %v2030_v26 = vsub.f32 0.083333336, %v1998_v14  ;;  %3158 = vlog2.f32 %v4412_v44  ;;  %v687_v1 = vadd.f32 3.0, %v6198_v25  ;;  %v688_v30 = vadd.f32 3.0, %v6199_v32 }
 0x1b0   : > { %v2061_v55 = vmul.f32 %v2029_v45, %v4439_v48  ;;  %v4483_v47 = vadd.f32 -1.0, %v6195_v58  ;;  %v4486_v6 = vadd.f32 4.0, %v6198_v25  ;;  %v751_v20 = vmul.f32 %v623_v21, %v6198_v25 }
 0x1b1   : > { %v2062_v22 = vmul.f32 %v2030_v26, %v4447_v41  ;;  %v752_v19 = vmul.f32 %v624_v62, %v6199_v32  ;;  %v783_v34 = vmul.f32 %v687_v1, %v655_v28  ;;  %v784_v2 = vmul.f32 %v688_v30, %v656_v31 }
 0x1b2   : > { %v2093_v17 = vsub.f32 %v1901_v60, %v2061_v55  ;;  %v847_v37 = vadd.f32 %v623_v21, %v6198_v25  ;;  %v848_v38 = vadd.f32 %v624_v62, %v6199_v32  ;;  %v879_v0 = vadd.f32 %v687_v1, %v655_v28 }
 0x1b3   : > { %v2094_v54 = vsub.f32 %v1902_v50, %v2062_v22  ;;  %v4493_v39 = vmul.f32 %v783_v34, %v751_v20  ;;  %v4495_v59 = vmul.f32 %v784_v2, %v752_v19  ;;  %v880_v14 = vadd.f32 %v688_v30, %v656_v31 }
 0x1b4   : > { %v3149_v45 = vpop.eup %3148  ;;  %v2125_v58 = vsub.f32 %v2093_v17, %v4427_v8  ;;  %v4499_v26 = vadd.f32 4.0, %v6199_v32  ;;  %v911_v5 = vmul.f32 %v847_v37, %v783_v34  ;;  %v943_v7 = vmul.f32 %v879_v0, %v751_v20 }
 0x1b5   : > { %v3151_v60 = vpop.eup %3150  ;;  %v2126_v21 = vsub.f32 %v2094_v54, %v4443_v3  ;;  %v1117_v62 = vmul.f32 %v3149_v45, %v4419_v4  ;;  %v912_v28 = vmul.f32 %v848_v38, %v784_v2  ;;  %3160 = vrcp.f32 %v4493_v39 }
 0x1b6   : > { %v3153_v50 = vpop.eup %3152  ;;  %v2189_v1 = vmul.f32 %v4368_v35, %v2125_v58  ;;  %v1118_v31 = vmul.f32 %v3151_v60, %v4422_v40  ;;  %v944_v30 = vmul.f32 %v880_v14, %v752_v19  ;;  %3162 = vrcp.f32 %v4495_v59 }
 0x1b7   : > { %v3155_v8 = vpop.eup %3154  ;;  %v2190_v55 = vmul.f32 %v4380_v13, %v2126_v21  ;;  %v1149_v20 = vsub.f32 2.0, %v1117_v62  ;;  %v1277_v22 = vmul.f32 %v3153_v50, %v4405_v11  ;;  %v4509_v3 = vadd.f32 %v943_v7, %v911_v5 }
 0x1b8   : > { %v3157_v34 = vpop.eup %3156  ;;  %v4512_v2 = vadd.f32 %v4265_v15, %v2189_v1  ;;  %v1150_v17 = vsub.f32 2.0, %v1118_v31  ;;  %v1278_v35 = vmul.f32 %v3155_v8, %v4412_v44  ;;  %3164 = vrcp.f32 %v4486_v6 }
 0x1b9   : > { %v3159_v58 = vpop.eup %3158  ;;  %v2503_v19 = vadd.f32 %v2190_v55, %v2189_v1  ;;  %v4517_v37 = vadd.f32 %v4270_v51, %v2190_v55  ;;  %v1181_v13 = vmul.f32 %v3149_v45, %v1149_v20  ;;  %v1309_v38 = vsub.f32 2.0, %v1277_v22 }
 0x1ba   : > { %v1182_v0 = vmul.f32 %v3151_v60, %v1150_v17  ;;  %v1310_v54 = vsub.f32 2.0, %v1278_v35  ;;  %v4519_v7 = vmul.f32 0.6931472, %v3157_v34  ;;  %v976_v5 = vadd.f32 %v944_v30, %v912_v28 }
 0x1bb   : > { %2504 = vadd.xlane.f32.xlu0 %v2503_v19  ;;  %v4522_v15 = vmul.f32 %v1181_v13, %v4466_v16  ;;  %v4524_v14 = vmul.f32 %v3153_v50, %v1309_v38  ;;  %v4526_v21 = vmul.f32 0.6931472, %v3159_v58  ;;  %3166 = vrcp.f32 %v4499_v26 }
 0x1bc   : > { %v4530_v51 = vmul.f32 %v1182_v0, %v4468_v33  ;;  %v4532_v45 = vmul.f32 %v3155_v8, %v1310_v54  ;;  %3168 = vlog2.f32 %v4486_v6  ;;  %v4536_v60 = vadd.f32 -1.0, %v6198_v25 }
 0x1bd   : > { %v4540_v16 = vmul.f32 %v4524_v14, %v4524_v14  ;;  %v1885_v62 = vmul.f32 0.5, %v4524_v14  ;;  %3170 = vlog2.f32 %v4499_v26  ;;  %v2920_v28 = vadd.f32 -0.5, %v4334_v46 }
 0x1be   : > { %v4547_v33 = vmul.f32 %v4532_v45, %v4532_v45  ;;  %v4550_v50 = vadd.f32 -1.0, %v6199_v32  ;;  %3172 = vlog2.f32 %v4347_v12  ;;  %v2921_v25 = vadd.f32 -0.5, %v4337_v27 }
 0x1bf   : > { %v3161_v1 = vpop.eup %3160  ;;  %v1886_v31 = vmul.f32 0.5, %v4532_v45  ;;  %v1949_v30 = vmul.f32 0.003968254, %v4540_v16  ;;  %3174 = vlog2.f32 %v4349_v53  ;;  %v1485_v8 = vmul.f32 %v2920_v28, %v4424_v36 }
 0x1c0   : > { %v3163_v55 = vpop.eup %3162  ;;  %v1917_v20 = vsub.f32 %v4519_v7, %v1885_v62  ;;  %v1950_v22 = vmul.f32 0.003968254, %v4547_v33  ;;  %v1103_v32 = vmul.f32 %v3161_v1, %v4493_v39  ;;  %v1486_v12 = vmul.f32 %v2921_v25, %v4431_v10 }
 0x1c1   : > { %v1981_v34 = vsub.f32 0.008333334, %v1949_v30  ;;  %v1104_v17 = vmul.f32 %v3163_v55, %v4495_v59  ;;  %v1517_v35 = vsub.f32 %v1485_v8, %v4334_v46  ;;  %v1581_v58 = vmul.f32 0.0005952381, %v4439_v48 }
 0x1c2   : > { %v3165_v19 = vpop.eup %3164  ;;  %v1982_v53 = vsub.f32 0.008333334, %v1950_v22  ;;  %v1135_v13 = vsub.f32 2.0, %v1103_v32  ;;  %v1518_v36 = vsub.f32 %v1486_v12, %v4337_v27  ;;  %v1582_v38 = vmul.f32 0.0005952381, %v4447_v41 }
 0x1c3   : > { %v1918_v0 = vsub.f32 %v4526_v21, %v1886_v31  ;;  %v2013_v54 = vmul.f32 %v1981_v34, %v4540_v16  ;;  %v1136_v62 = vsub.f32 2.0, %v1104_v17  ;;  %v1263_v10 = vmul.f32 %v3165_v19, %v4486_v6 }
 0x1c4   : > { %v2014_v28 = vmul.f32 %v1982_v53, %v4547_v33  ;;  %v1167_v25 = vmul.f32 %v3161_v1, %v1135_v13  ;;  %v1549_v46 = vadd.f32 0.9189385, %v1517_v35  ;;  %v1613_v30 = vsub.f32 0.0007936508, %v1581_v58 }
 0x1c5   : > { %v3167_v8 = vpop.eup %3166  ;;  %v2045_v63 = vsub.f32 0.083333336, %v2013_v54  ;;  %v1168_v22 = vmul.f32 %v3163_v55, %v1136_v62  ;;  %v1295_v32 = vsub.f32 2.0, %v1263_v10  ;;  %v1614_v18 = vsub.f32 0.0007936508, %v1582_v38 }
 0x1c6   : > { %v3169_v27 = vpop.eup %3168  ;;  %v2046_v12 = vsub.f32 0.083333336, %v2014_v28  ;;  %v1264_v42 = vmul.f32 %v3167_v8, %v4499_v26  ;;  %v1550_v31 = vadd.f32 0.9189385, %v1518_v36  ;;  %v1645_v34 = vmul.f32 %v1613_v30, %v4439_v48 }
 0x1c7   : > { %v3171_v17 = vpop.eup %3170  ;;  %v2077_v43 = vmul.f32 %v2045_v63, %v4540_v16  ;;  %v4575_v53 = vmul.f32 %v1167_v25, %v4509_v3  ;;  %v4577_v1 = vmul.f32 %v1168_v22, %v976_v5  ;;  %v4579_v35 = vmul.f32 %v3165_v19, %v1295_v32 }
 0x1c8   : > { %v3173_v55 = vpop.eup %3172  ;;  %v2078_v58 = vmul.f32 %v2046_v12, %v4547_v33  ;;  %v1296_v13 = vsub.f32 2.0, %v1264_v42  ;;  %v4582_v38 = vmul.f32 0.6931472, %v3169_v27  ;;  %v1646_v36 = vmul.f32 %v1614_v18, %v4447_v41 }
 0x1c9   : > { %v3175_v54 = vpop.eup %3174  ;;  %v2109_v62 = vsub.f32 %v1917_v20, %v2077_v43  ;;  %v4587_v63 = vmul.f32 %v4579_v35, %v4579_v35  ;;  %v4589_v3 = vmul.f32 0.6931472, %v3171_v17  ;;  %v1871_v5 = vmul.f32 0.5, %v4579_v35 }
 0x1ca   : > { %v2110_v19 = vsub.f32 %v1918_v0, %v2078_v58  ;;  %v4592_v10 = vmul.f32 %v3167_v8, %v1296_v13  ;;  %v1010_v28 = vmul.f32 0.6931472, %v3173_v55  ;;  %v1677_v25 = vadd.f32 -0.0027777778, %v1645_v34  ;;  %v6202_v55 = vld [vmem:[#allocation12_spill] sm:$0xff] }
 0x1cb   : > { %v2141_v42 = vsub.f32 %v2109_v62, %v4522_v15  ;;  %v1935_v30 = vmul.f32 0.003968254, %v4587_v63  ;;  %v1012_v18 = vmul.f32 0.6931472, %v3175_v54  ;;  %v1678_v22 = vadd.f32 -0.0027777778, %v1646_v36 }
 0x1cc   : > { %v2142_v43 = vsub.f32 %v2110_v19, %v4530_v51  ;;  %v4599_v20 = vmul.f32 %v4592_v10, %v4592_v10  ;;  %v1903_v32 = vsub.f32 %v4582_v38, %v1871_v5  ;;  %v1709_v0 = vmul.f32 %v1677_v25, %v4439_v48  ;;  %v6203_v48 = vld [vmem:[#allocation14_spill] sm:$0xff] }
 0x1cd   : > { %v4604_v8 = vmul.f32 %v4463_v52, %v2141_v42  ;;  %v1872_v27 = vmul.f32 0.5, %v4592_v10  ;;  %v1967_v15 = vsub.f32 0.008333334, %v1935_v30  ;;  %v1710_v12 = vmul.f32 %v1678_v22, %v4447_v41 }
 0x1ce   : > { %v4609_v34 = vmul.f32 %v4483_v47, %v2142_v43  ;;  %v1936_v51 = vmul.f32 0.003968254, %v4599_v20  ;;  %v1741_v17 = vadd.f32 0.083333336, %v1709_v0  ;;  %v639_v58 = vadd.f32 1.0, %v6202_v55 }
 0x1cf   : > { %6200 = vst [vmem:[#allocation9_spill] sm:$0xff] %v4604_v8  ;;  %v1999_v13 = vmul.f32 %v1967_v15, %v4587_v63  ;;  %v1742_v36 = vadd.f32 0.083333336, %v1710_v12  ;;  %v640_v54 = vadd.f32 1.0, %v6203_v48  ;;  %v671_v52 = vadd.f32 2.0, %v6202_v55 }
 0x1d0   : > { %6201 = vst [vmem:[#allocation11_spill] sm:$0xff] %v4609_v34  ;;  %v2527_v62 = vadd.f32 %v4609_v34, %v4604_v8  ;;  %v1968_v5 = vsub.f32 0.008333334, %v1936_v51  ;;  %v1773_v41 = vmul.f32 %v1741_v17, %v4429_v56  ;;  %v672_v47 = vadd.f32 2.0, %v6203_v48 }
 0x1d1   : > { %v2031_v19 = vsub.f32 0.083333336, %v1999_v13  ;;  %v1774_v25 = vmul.f32 %v1742_v36, %v4434_v49  ;;  %v703_v42 = vadd.f32 3.0, %v6202_v55  ;;  %v704_v30 = vadd.f32 3.0, %v6203_v48 }
 0x1d2   : > { %2528 = vadd.xlane.f32.xlu0 %v2527_v62  ;;  %v1904_v22 = vsub.f32 %v4589_v3, %v1872_v27  ;;  %v2000_v43 = vmul.f32 %v1968_v5, %v4599_v20  ;;  %v1805_v0 = vadd.f32 %v1773_v41, %v1549_v46  ;;  %v4626_v15 = vadd.f32 4.0, %v6202_v55 }
 0x1d3   : > { %v2063_v56 = vmul.f32 %v2031_v19, %v4587_v63  ;;  %v1806_v12 = vadd.f32 %v1774_v25, %v1550_v31  ;;  %v767_v51 = vmul.f32 %v639_v58, %v6202_v55  ;;  %v768_v49 = vmul.f32 %v640_v54, %v6203_v48 }
 0x1d4   : > { %v2032_v17 = vsub.f32 0.083333336, %v2000_v43  ;;  %v1837_v13 = vsub.f32 %v1805_v0, %v1010_v28  ;;  %v799_v36 = vmul.f32 %v703_v42, %v671_v52  ;;  %v800_v34 = vmul.f32 %v704_v30, %v672_v47 }
 0x1d5   : > { %v2095_v62 = vsub.f32 %v1903_v32, %v2063_v56  ;;  %v1838_v8 = vsub.f32 %v1806_v12, %v1012_v18  ;;  %v863_v27 = vadd.f32 %v639_v58, %v6202_v55  ;;  %v864_v46 = vadd.f32 %v640_v54, %v6203_v48 }
 0x1d6   : > { %v2064_v5 = vmul.f32 %v2032_v17, %v4599_v20  ;;  %v4635_v41 = vadd.f32 %v4376_v57, %v1837_v13  ;;  %v831_v31 = vmul.f32 %v799_v36, %v767_v51  ;;  %v4637_v19 = vmul.f32 %v800_v34, %v768_v49 }
 0x1d7   : > { %v2127_v25 = vsub.f32 %v2095_v62, %v4575_v53  ;;  %v2438_v43 = vadd.f32 %v1838_v8, %v1837_v13  ;;  %v4641_v28 = vadd.f32 %v4384_v24, %v1838_v8  ;;  %v895_v32 = vadd.f32 %v703_v42, %v671_v52 }
 0x1d8   : > { %v2096_v18 = vsub.f32 %v1904_v22, %v2064_v5  ;;  %v4644_v58 = vadd.f32 4.0, %v6203_v48  ;;  %v896_v54 = vadd.f32 %v704_v30, %v672_v47  ;;  %v927_v0 = vmul.f32 %v863_v27, %v799_v36 }
 0x1d9   : > { %v2191_v56 = vmul.f32 %v4536_v60, %v2127_v25  ;;  %2439 = vadd.xlane.f32.xlu0 %v2438_v43  ;;  %v928_v57 = vmul.f32 %v864_v46, %v800_v34  ;;  %v959_v12 = vmul.f32 %v895_v32, %v767_v51  ;;  %3176 = vrcp.f32 %v831_v31 }
 0x1da   : > { %v2128_v17 = vsub.f32 %v2096_v18, %v4577_v1  ;;  %v960_v53 = vmul.f32 %v896_v54, %v768_v49  ;;  %3178 = vrcp.f32 %v4637_v19  ;;  %v4650_v24 = vadd.f32 -1.0, %v6202_v55 }
 0x1db   : > { %v4653_v8 = vadd.f32 %v4512_v2, %v2191_v56  ;;  %3180 = vrcp.f32 %v4626_v15  ;;  %v4657_v52 = vadd.f32 -1.0, %v6203_v48  ;;  %v2936_v60 = vadd.f32 -0.5, %v4405_v11 }
 0x1dc   : > { %v2192_v34 = vmul.f32 %v4550_v50, %v2128_v17  ;;  %v4661_v47 = vadd.f32 %v959_v12, %v927_v0  ;;  %3182 = vrcp.f32 %v4644_v58  ;;  %v2937_v1 = vadd.f32 -0.5, %v4412_v44 }
 0x1dd   : > { %3184 = vlog2.f32 %v4626_v15  ;;  %v1501_v2 = vmul.f32 %v2936_v60, %v4519_v7  ;;  %v1597_v42 = vmul.f32 0.0005952381, %v4540_v16  ;;  %v1598_v30 = vmul.f32 0.0005952381, %v4547_v33 }
 0x1de   : > { %v2506_v22 = vadd.f32 %v2192_v34, %v2191_v56  ;;  %v4670_v51 = vadd.f32 %v4517_v37, %v2192_v34  ;;  %3186 = vlog2.f32 %v4644_v58  ;;  %v1502_v50 = vmul.f32 %v2937_v1, %v4526_v21 }
 0x1df   : > { %3188 = vlog2.f32 %v4419_v4  ;;  %v1533_v49 = vsub.f32 %v1501_v2, %v4405_v11  ;;  %v1629_v13 = vsub.f32 0.0007936508, %v1597_v42  ;;  %v1630_v36 = vsub.f32 0.0007936508, %v1598_v30 }
 0x1e0   : > { %2507 = vadd.xlane.f32.xlu1 %v2506_v22  ;;  %3190 = vlog2.f32 %v4422_v40  ;;  %v1534_v7 = vsub.f32 %v1502_v50, %v4412_v44  ;;  %v2922_v62 = vadd.f32 -0.5, %v4486_v6  ;;  %v2923_v37 = vadd.f32 -0.5, %v4499_v26 }
 0x1e1   : > { %v1565_v27 = vadd.f32 0.9189385, %v1533_v49  ;;  %v1661_v46 = vmul.f32 %v1629_v13, %v4540_v16  ;;  %v1662_v21 = vmul.f32 %v1630_v36, %v4547_v33  ;;  %3192 = vlog2.f32 %v4493_v39 }
 0x1e2   : > { %v1566_v4 = vadd.f32 0.9189385, %v1534_v7  ;;  %3194 = vlog2.f32 %v4495_v59  ;;  %v1487_v11 = vmul.f32 %v2922_v62, %v4582_v38  ;;  %v1488_v40 = vmul.f32 %v2923_v37, %v4589_v3 }
 0x1e3   : > { %v3177_v5 = vpop.eup %3176  ;;  %v992_v44 = vadd.f32 %v960_v53, %v928_v57  ;;  %v1693_v25 = vadd.f32 -0.0027777778, %v1661_v46  ;;  %v1694_v43 = vadd.f32 -0.0027777778, %v1662_v21  ;;  %v1583_v32 = vmul.f32 0.0005952381, %v4587_v63 }
 0x1e4   : > { %v3179_v18 = vpop.eup %3178  ;;  %v1119_v54 = vmul.f32 %v3177_v5, %v831_v31  ;;  %v1519_v0 = vsub.f32 %v1487_v11, %v4486_v6  ;;  %v1520_v56 = vsub.f32 %v1488_v40, %v4499_v26  ;;  %3196 = vlog2.f32 %v831_v31 }
 0x1e5   : > { %v3181_v39 = vpop.eup %3180  ;;  %v1120_v59 = vmul.f32 %v3179_v18, %v4637_v19  ;;  %v1725_v38 = vmul.f32 %v1693_v25, %v4540_v16  ;;  %v1726_v3 = vmul.f32 %v1694_v43, %v4547_v33  ;;  %v1584_v57 = vmul.f32 0.0005952381, %v4599_v20 }
 0x1e6   : > { %v3183_v12 = vpop.eup %3182  ;;  %v1151_v17 = vsub.f32 2.0, %v1119_v54  ;;  %v1279_v53 = vmul.f32 %v3181_v39, %v4626_v15  ;;  %v4694_v60 = vadd.f32 0.9189385, %v1519_v0  ;;  %v1615_v34 = vsub.f32 0.0007936508, %v1583_v32 }
 0x1e7   : > { %v3185_v6 = vpop.eup %3184  ;;  %v1152_v1 = vsub.f32 2.0, %v1120_v59  ;;  %v1280_v26 = vmul.f32 %v3183_v12, %v4644_v58  ;;  %v1757_v31 = vadd.f32 0.083333336, %v1725_v38  ;;  %v1758_v2 = vadd.f32 0.083333336, %v1726_v3 }
 0x1e8   : > { %v3187_v42 = vpop.eup %3186  ;;  %v1183_v30 = vmul.f32 %v3177_v5, %v1151_v17  ;;  %v1311_v16 = vsub.f32 2.0, %v1279_v53  ;;  %v4697_v22 = vmul.f32 0.6931472, %v3185_v6  ;;  %v4699_v33 = vadd.f32 0.9189385, %v1520_v56  ;;  %v6206_v53 = vld [vmem:[#allocation15_spill] sm:$0xff] }
 0x1e9   : > { %v3189_v50 = vpop.eup %3188  ;;  %v1184_v49 = vmul.f32 %v3179_v18, %v1152_v1  ;;  %v1312_v13 = vsub.f32 2.0, %v1280_v26  ;;  %v1789_v36 = vmul.f32 %v1757_v31, %v4524_v14  ;;  %v1616_v7 = vsub.f32 0.0007936508, %v1584_v57 }
 0x1ea   : > { %v3191_v62 = vpop.eup %3190  ;;  %v4703_v37 = vmul.f32 %v1183_v30, %v4661_v47  ;;  %v4705_v46 = vmul.f32 %v3181_v39, %v1311_v16  ;;  %v4707_v21 = vmul.f32 0.6931472, %v3187_v42  ;;  %v1790_v11 = vmul.f32 %v1758_v2, %v4532_v45  ;;  %v6207_v2 = vld [vmem:[#allocation17_spill] sm:$0xff] }
 0x1eb   : > { %v3193_v40 = vpop.eup %3192  ;;  %v4710_v5 = vmul.f32 %v1184_v49, %v992_v44  ;;  %v4712_v25 = vmul.f32 %v3183_v12, %v1312_v13  ;;  %v1042_v43 = vmul.f32 0.6931472, %v3189_v50  ;;  %v1821_v32 = vadd.f32 %v1789_v36, %v1565_v27 }
 0x1ec   : > { %v3195_v18 = vpop.eup %3194  ;;  %v4716_v14 = vmul.f32 %v4705_v46, %v4705_v46  ;;  %v1887_v47 = vmul.f32 0.5, %v4705_v46  ;;  %v1044_v54 = vmul.f32 0.6931472, %v3191_v62  ;;  %v1822_v0 = vadd.f32 %v1790_v11, %v1566_v4 }
 0x1ed   : > { %v4721_v56 = vmul.f32 %v4712_v25, %v4712_v25  ;;  %v1888_v45 = vmul.f32 0.5, %v4712_v25  ;;  %v4724_v44 = vsub.f32 %v1821_v32, %v1042_v43  ;;  %v1014_v39 = vmul.f32 0.6931472, %v3193_v40 }
 0x1ee   : > { %v4726_v59 = vpop.eup %3196  ;;  %v1951_v27 = vmul.f32 0.003968254, %v4716_v14  ;;  %v4729_v38 = vsub.f32 %v1822_v0, %v1044_v54  ;;  %v1016_v3 = vmul.f32 0.6931472, %v3195_v18  ;;  %v1647_v57 = vmul.f32 %v1615_v34, %v4587_v63 }
 0x1ef   : > { %6204 = vst [vmem:[#allocation13_spill] sm:$0xff] %v4724_v44  ;;  %v1919_v4 = vsub.f32 %v4697_v22, %v1887_v47  ;;  %v1952_v12 = vmul.f32 0.003968254, %v4721_v56  ;;  %v1648_v17 = vmul.f32 %v1616_v7, %v4599_v20  ;;  %v625_v6 = vadd.f32 1.0, %v6206_v53 }
 0x1f0   : > { %6205 = vst [vmem:[#allocation36_spill] sm:$0xff] %v4729_v38  ;;  %v1983_v1 = vsub.f32 0.008333334, %v1951_v27  ;;  %v2462_v26 = vadd.f32 %v4729_v38, %v4724_v44  ;;  %v1679_v31 = vadd.f32 -0.0027777778, %v1647_v57  ;;  %v626_v42 = vadd.f32 1.0, %v6207_v2 }
 0x1f1   : > { %v1984_v30 = vsub.f32 0.008333334, %v1952_v12  ;;  %v1680_v16 = vadd.f32 -0.0027777778, %v1648_v17  ;;  %v657_v50 = vadd.f32 2.0, %v6206_v53  ;;  %v658_v34 = vadd.f32 2.0, %v6207_v2 }
 0x1f2   : > { %v2015_v49 = vmul.f32 %v1983_v1, %v4716_v14  ;;  %2463 = vadd.xlane.f32.xlu0 %v2462_v26  ;;  %v1711_v13 = vmul.f32 %v1679_v31, %v4587_v63  ;;  %v689_v36 = vadd.f32 3.0, %v6206_v53  ;;  %v690_v7 = vadd.f32 3.0, %v6207_v2 }
 0x1f3   : > { %v1920_v62 = vsub.f32 %v4707_v21, %v1888_v45  ;;  %v2016_v11 = vmul.f32 %v1984_v30, %v4721_v56  ;;  %v1712_v40 = vmul.f32 %v1680_v16, %v4599_v20  ;;  %v4749_v43 = vadd.f32 4.0, %v6206_v53 }
 0x1f4   : > { %v2047_v32 = vsub.f32 0.083333336, %v2015_v49  ;;  %v1743_v18 = vadd.f32 0.083333336, %v1711_v13  ;;  %v753_v47 = vmul.f32 %v625_v6, %v6206_v53  ;;  %v754_v54 = vmul.f32 %v626_v42, %v6207_v2 }
 0x1f5   : > { %v2048_v63 = vsub.f32 0.083333336, %v2016_v11  ;;  %v1744_v0 = vadd.f32 0.083333336, %v1712_v40  ;;  %v785_v27 = vmul.f32 %v689_v36, %v657_v50  ;;  %v786_v57 = vmul.f32 %v690_v7, %v658_v34 }
 0x1f6   : > { %v2079_v12 = vmul.f32 %v2047_v32, %v4716_v14  ;;  %v1775_v45 = vmul.f32 %v1743_v18, %v4579_v35  ;;  %v849_v17 = vadd.f32 %v625_v6, %v6206_v53  ;;  %v850_v20 = vadd.f32 %v626_v42, %v6207_v2 }
 0x1f7   : > { %v2080_v1 = vmul.f32 %v2048_v63, %v4721_v56  ;;  %v1776_v26 = vmul.f32 %v1744_v0, %v4592_v10  ;;  %v4759_v31 = vmul.f32 %v785_v27, %v753_v47  ;;  %v4761_v30 = vmul.f32 %v786_v57, %v754_v54 }
 0x1f8   : > { %v2111_v16 = vsub.f32 %v1919_v4, %v2079_v12  ;;  %v1807_v49 = vadd.f32 %v1775_v45, %v4694_v60  ;;  %v881_v13 = vadd.f32 %v689_v36, %v657_v50  ;;  %v882_v11 = vadd.f32 %v690_v7, %v658_v34  ;;  %v6210_v34 = vld [vmem:[#allocation16_spill] sm:$0xff] }
 0x1f9   : > { %v2112_v40 = vsub.f32 %v1920_v62, %v2080_v1  ;;  %v1808_v35 = vadd.f32 %v1776_v26, %v4699_v33  ;;  %v913_v32 = vmul.f32 %v849_v17, %v785_v27  ;;  %v914_v6 = vmul.f32 %v850_v20, %v786_v57 }
 0x1fa   : > { %v2143_v42 = vsub.f32 %v2111_v16, %v4703_v37  ;;  %v1839_v18 = vsub.f32 %v1807_v49, %v1014_v39  ;;  %v945_v63 = vmul.f32 %v881_v13, %v753_v47  ;;  %v946_v48 = vmul.f32 %v882_v11, %v754_v54  ;;  %v6211_v47 = vld [vmem:[#allocation19_spill] sm:$0xff] }
 0x1fb   : > { %v2144_v10 = vsub.f32 %v2112_v40, %v4710_v5  ;;  %v1840_v0 = vsub.f32 %v1808_v35, %v1016_v3  ;;  %v4768_v55 = vadd.f32 4.0, %v6207_v2  ;;  %3198 = vrcp.f32 %v4759_v31 }
 0x1fc   : > { %v4772_v60 = vmul.f32 %v4650_v24, %v2143_v42  ;;  %v4775_v33 = vadd.f32 %v4635_v41, %v1839_v18  ;;  %v4778_v4 = vadd.f32 -1.0, %v6206_v53  ;;  %3200 = vrcp.f32 %v4761_v30 }
 0x1fd   : > { %v4781_v37 = vmul.f32 %v4657_v52, %v2144_v10  ;;  %v2441_v39 = vadd.f32 %v1840_v0, %v1839_v18  ;;  %v4784_v5 = vadd.f32 %v4641_v28, %v1840_v0  ;;  %v4787_v3 = vadd.f32 %v945_v63, %v913_v32 }
 0x1fe   : > { %6208 = vst [vmem:[#allocation15_spill] sm:$0xff] %v4772_v60  ;;  %v4789_v50 = vadd.f32 %v946_v48, %v914_v6  ;;  %3202 = vrcp.f32 %v4749_v43  ;;  %v2938_v41 = vadd.f32 -0.5, %v4626_v15  ;;  %v2939_v52 = vadd.f32 -0.5, %v4644_v58 }
 0x1ff   : > { %6209 = vst [vmem:[#allocation17_spill] sm:$0xff] %v4781_v37  ;;  %v2530_v24 = vadd.f32 %v4781_v37, %v4772_v60  ;;  %3204 = vrcp.f32 %v4768_v55  ;;  %v1599_v28 = vmul.f32 0.0005952381, %v4716_v14  ;;  %v1600_v48 = vmul.f32 0.0005952381, %v4721_v56 }
 0x200   : > { %3206 = vlog2.f32 %v4749_v43  ;;  %v1503_v53 = vmul.f32 %v2938_v41, %v4697_v22  ;;  %v641_v36 = vadd.f32 1.0, %v6210_v34  ;;  %v1504_v7 = vmul.f32 %v2939_v52, %v4707_v21 }
 0x201   : > { %2531 = vadd.xlane.f32.xlu1 %v2530_v24  ;;  %3208 = vlog2.f32 %v4768_v55  ;;  %v1631_v62 = vsub.f32 0.0007936508, %v1599_v28  ;;  %v642_v54 = vadd.f32 1.0, %v6211_v47  ;;  %v1632_v57 = vsub.f32 0.0007936508, %v1600_v48 }
 0x202   : > { %3210 = vlog2.f32 %v4637_v19  ;;  %v1535_v27 = vsub.f32 %v1503_v53, %v4626_v15  ;;  %v673_v12 = vadd.f32 2.0, %v6210_v34  ;;  %v1536_v22 = vsub.f32 %v1504_v7, %v4644_v58 }
 0x203   : > { %v1663_v45 = vmul.f32 %v1631_v62, %v4716_v14  ;;  %v674_v17 = vadd.f32 2.0, %v6211_v47  ;;  %v705_v20 = vadd.f32 3.0, %v6210_v34  ;;  %v4813_v21 = vadd.f32 -1.0, %v6207_v2 }
 0x204   : > { %v1046_v1 = vmul.f32 0.6931472, %v4726_v59  ;;  %v1664_v19 = vmul.f32 %v1632_v57, %v4721_v56  ;;  %v706_v15 = vadd.f32 3.0, %v6211_v47  ;;  %v1567_v16 = vadd.f32 0.9189385, %v1535_v27 }
 0x205   : > { %v3199_v26 = vpop.eup %3198  ;;  %2442 = vadd.xlane.f32.xlu1 %v2441_v39  ;;  %v1695_v49 = vadd.f32 -0.0027777778, %v1663_v45  ;;  %v4819_v58 = vadd.f32 4.0, %v6210_v34  ;;  %v769_v13 = vmul.f32 %v641_v36, %v6210_v34  ;;  %v770_v2 = vmul.f32 %v642_v54, %v6211_v47 }
 0x206   : > { %v1105_v11 = vmul.f32 %v3199_v26, %v4759_v31  ;;  %v1696_v40 = vadd.f32 -0.0027777778, %v1664_v19  ;;  %v801_v35 = vmul.f32 %v705_v20, %v673_v12  ;;  %v3201_v59 = vpop.eup %3200  ;;  %v1568_v32 = vadd.f32 0.9189385, %v1536_v22 }
 0x207   : > { %v1727_v6 = vmul.f32 %v1695_v49, %v4716_v14  ;;  %v4826_v42 = vadd.f32 4.0, %v6211_v47  ;;  %v802_v18 = vmul.f32 %v706_v15, %v674_v17  ;;  %v1106_v10 = vmul.f32 %v3201_v59, %v4761_v30 }
 0x208   : > { %v3203_v63 = vpop.eup %3202  ;;  %v1137_v0 = vsub.f32 2.0, %v1105_v11  ;;  %v1728_v39 = vmul.f32 %v1696_v40, %v4721_v56  ;;  %v865_v41 = vadd.f32 %v641_v36, %v6210_v34  ;;  %v4832_v53 = vmul.f32 %v801_v35, %v769_v13 }
 0x209   : > { %v3205_v24 = vpop.eup %3204  ;;  %v1265_v52 = vmul.f32 %v3203_v63, %v4749_v43  ;;  %v1759_v28 = vadd.f32 0.083333336, %v1727_v6  ;;  %v866_v14 = vadd.f32 %v642_v54, %v6211_v47  ;;  %v1138_v7 = vsub.f32 2.0, %v1106_v10 }
 0x20a   : > { %v3207_v48 = vpop.eup %3206  ;;  %v1266_v62 = vmul.f32 %v3205_v24, %v4768_v55  ;;  %v1760_v27 = vadd.f32 0.083333336, %v1728_v39  ;;  %v4836_v57 = vmul.f32 %v802_v18, %v770_v2  ;;  %v1169_v45 = vmul.f32 %v3199_v26, %v1137_v0 }
 0x20b   : > { %v3209_v22 = vpop.eup %3208  ;;  %v1297_v56 = vsub.f32 2.0, %v1265_v52  ;;  %v1791_v36 = vmul.f32 %v1759_v28, %v4705_v46  ;;  %v897_v19 = vadd.f32 %v705_v20, %v673_v12  ;;  %v1170_v11 = vmul.f32 %v3201_v59, %v1138_v7 }
 0x20c   : > { %v3211_v49 = vpop.eup %3210  ;;  %v1298_v40 = vsub.f32 2.0, %v1266_v62  ;;  %v4839_v6 = vmul.f32 0.6931472, %v3207_v48  ;;  %v898_v38 = vadd.f32 %v706_v15, %v674_v17  ;;  %v4843_v10 = vmul.f32 0.6931472, %v3209_v22  ;;  %v6215_v48 = vld [vmem:[#allocation20_spill] sm:$0xff] }
 0x20d   : > { %v4841_v54 = vmul.f32 %v3203_v63, %v1297_v56  ;;  %v1792_v39 = vmul.f32 %v1760_v27, %v4712_v25  ;;  %v1823_v44 = vadd.f32 %v1791_v36, %v1567_v16  ;;  %v1048_v26 = vmul.f32 0.6931472, %v3211_v49 }
 0x20e   : > { %v4846_v37 = vmul.f32 %v3205_v24, %v1298_v40  ;;  %v929_v0 = vmul.f32 %v865_v41, %v801_v35  ;;  %v930_v52 = vmul.f32 %v866_v14, %v802_v18  ;;  %v961_v16 = vmul.f32 %v897_v19, %v769_v13 }
 0x20f   : > { %v4850_v46 = vmul.f32 %v4841_v54, %v4841_v54  ;;  %v1873_v12 = vmul.f32 0.5, %v4841_v54  ;;  %v1824_v20 = vadd.f32 %v1792_v39, %v1568_v32  ;;  %v4853_v17 = vsub.f32 %v1823_v44, %v1046_v1 }
 0x210   : > { %v4857_v15 = vmul.f32 %v4846_v37, %v4846_v37  ;;  %v1874_v25 = vmul.f32 0.5, %v4846_v37  ;;  %v962_v59 = vmul.f32 %v898_v38, %v770_v2  ;;  %v1201_v35 = vmul.f32 %v1169_v45, %v4787_v3 }
 0x211   : > { %6212 = vst [vmem:[#allocation37_spill] sm:$0xff] %v4853_v17  ;;  %v1937_v18 = vmul.f32 0.003968254, %v4850_v46  ;;  %v4862_v63 = vsub.f32 %v1824_v20, %v1048_v26  ;;  %3212 = vrcp.f32 %v4832_v53  ;;  %v4866_v32 = vmul.f32 %v1170_v11, %v4789_v50  ;;  %v6214_v50 = vld [vmem:[#allocation18_spill] sm:$0xff] }
 0x212   : > { %v1905_v44 = vsub.f32 %v4839_v6, %v1873_v12  ;;  %v1906_v1 = vsub.f32 %v4843_v10, %v1874_v25  ;;  %v1938_v41 = vmul.f32 0.003968254, %v4857_v15  ;;  %v4873_v3 = vadd.f32 %v961_v16, %v929_v0 }
 0x213   : > { %6213 = vst [vmem:[#allocation38_spill] sm:$0xff] %v4862_v63  ;;  %v1969_v24 = vsub.f32 0.008333334, %v1937_v18  ;;  %v2465_v38 = vadd.f32 %v4862_v63, %v4853_v17  ;;  %3214 = vrcp.f32 %v4836_v57  ;;  %v4876_v2 = vadd.f32 %v962_v59, %v930_v52 }
 0x214   : > { %v1970_v13 = vsub.f32 0.008333334, %v1938_v41  ;;  %3216 = vrcp.f32 %v4819_v58  ;;  %v627_v28 = vadd.f32 1.0, %v6214_v50  ;;  %v628_v7 = vadd.f32 1.0, %v6215_v48 }
 0x215   : > { %v2001_v14 = vmul.f32 %v1969_v24, %v4850_v46  ;;  %2466 = vadd.xlane.f32.xlu1 %v2465_v38  ;;  %3218 = vrcp.f32 %v4826_v42  ;;  %v659_v62 = vadd.f32 2.0, %v6214_v50  ;;  %v660_v22 = vadd.f32 2.0, %v6215_v48 }
 0x216   : > { %v2002_v27 = vmul.f32 %v1970_v13, %v4857_v15  ;;  %3220 = vlog2.f32 %v4819_v58  ;;  %v691_v45 = vadd.f32 3.0, %v6214_v50  ;;  %v4890_v36 = vadd.f32 -1.0, %v6210_v34 }
 0x217   : > { %v2033_v56 = vsub.f32 0.083333336, %v2001_v14  ;;  %3222 = vlog2.f32 %v4826_v42  ;;  %v692_v19 = vadd.f32 3.0, %v6215_v48  ;;  %v4894_v11 = vadd.f32 -1.0, %v6211_v47 }
 0x218   : > { %v2034_v49 = vsub.f32 0.083333336, %v2002_v27  ;;  %v755_v40 = vmul.f32 %v627_v28, %v6214_v50  ;;  %v756_v39 = vmul.f32 %v628_v7, %v6215_v48  ;;  %v787_v0 = vmul.f32 %v691_v45, %v659_v62 }
 0x219   : > { %v2065_v26 = vmul.f32 %v2033_v56, %v4850_v46  ;;  %v788_v52 = vmul.f32 %v692_v19, %v660_v22  ;;  %v851_v12 = vadd.f32 %v627_v28, %v6214_v50  ;;  %v852_v25 = vadd.f32 %v628_v7, %v6215_v48 }
 0x21a   : > { %v2066_v20 = vmul.f32 %v2034_v49, %v4857_v15  ;;  %v883_v16 = vadd.f32 %v691_v45, %v659_v62  ;;  %v884_v59 = vadd.f32 %v692_v19, %v660_v22  ;;  %v4903_v24 = vadd.f32 4.0, %v6214_v50 }
 0x21b   : > { %v3213_v18 = vpop.eup %3212  ;;  %v2097_v41 = vsub.f32 %v1905_v44, %v2065_v26  ;;  %v4905_v38 = vmul.f32 %v787_v0, %v755_v40  ;;  %v4907_v13 = vmul.f32 %v788_v52, %v756_v39  ;;  %v4911_v28 = vadd.f32 4.0, %v6215_v48 }
 0x21c   : > { %v2098_v14 = vsub.f32 %v1906_v1, %v2066_v20  ;;  %v1121_v27 = vmul.f32 %v3213_v18, %v4832_v53  ;;  %v915_v56 = vmul.f32 %v851_v12, %v787_v0  ;;  %v916_v62 = vmul.f32 %v852_v25, %v788_v52 }
 0x21d   : > { %v3215_v49 = vpop.eup %3214  ;;  %v2129_v7 = vsub.f32 %v2097_v41, %v1201_v35  ;;  %v947_v22 = vmul.f32 %v883_v16, %v755_v40  ;;  %3224 = vrcp.f32 %v4905_v38  ;;  %v948_v47 = vmul.f32 %v884_v59, %v756_v39 }
 0x21e   : > { %v3217_v44 = vpop.eup %3216  ;;  %v2130_v45 = vsub.f32 %v2098_v14, %v4866_v32  ;;  %v1122_v19 = vmul.f32 %v3215_v49, %v4836_v57  ;;  %v1153_v26 = vsub.f32 2.0, %v1121_v27  ;;  %3226 = vrcp.f32 %v4907_v13 }
 0x21f   : > { %v3219_v1 = vpop.eup %3218  ;;  %v2193_v20 = vmul.f32 %v4778_v4, %v2129_v7  ;;  %v1281_v34 = vmul.f32 %v3217_v44, %v4819_v58  ;;  %v4920_v35 = vadd.f32 -1.0, %v6214_v50  ;;  %v4927_v4 = vadd.f32 %v947_v22, %v915_v56 }
 0x220   : > { %v3221_v40 = vpop.eup %3220  ;;  %v2194_v0 = vmul.f32 %v4813_v21, %v2130_v45  ;;  %v1154_v52 = vsub.f32 2.0, %v1122_v19  ;;  %v1185_v12 = vmul.f32 %v3213_v18, %v1153_v26  ;;  %v1282_v32 = vmul.f32 %v3219_v1, %v4826_v42 }
 0x221   : > { %v3223_v25 = vpop.eup %3222  ;;  %v4925_v39 = vadd.f32 %v4653_v8, %v2193_v20  ;;  %v1313_v16 = vsub.f32 2.0, %v1281_v34  ;;  %3228 = vrcp.f32 %v4903_v24  ;;  %v4933_v14 = vadd.f32 %v948_v47, %v916_v62 }
 0x222   : > { %v2509_v59 = vadd.f32 %v2194_v0, %v2193_v20  ;;  %v4931_v50 = vadd.f32 %v4670_v51, %v2194_v0  ;;  %v1186_v41 = vmul.f32 %v3215_v49, %v1154_v52  ;;  %v1314_v21 = vsub.f32 2.0, %v1282_v32 }
 0x223   : > { %v4935_v18 = vmul.f32 %v3217_v44, %v1313_v16  ;;  %v4937_v27 = vmul.f32 0.6931472, %v3221_v40  ;;  %3230 = vrcp.f32 %v4911_v28  ;;  %v4941_v8 = vmul.f32 %v1185_v12, %v4873_v3 }
 0x224   : > { %2510 = vadd.xlane.f32.xlu0 %v2509_v59  ;;  %v4943_v34 = vmul.f32 0.6931472, %v3223_v25  ;;  %3232 = vlog2.f32 %v4903_v24  ;;  %v2924_v51 = vadd.f32 -0.5, %v4749_v43  ;;  %v4947_v56 = vmul.f32 %v3219_v1, %v1314_v21 }
 0x225   : > { %v4951_v47 = vmul.f32 %v4935_v18, %v4935_v18  ;;  %v1889_v49 = vmul.f32 0.5, %v4935_v18  ;;  %3234 = vlog2.f32 %v4911_v28  ;;  %v4956_v7 = vmul.f32 %v1186_v41, %v4876_v2 }
 0x226   : > { %3236 = vlog2.f32 %v4759_v31  ;;  %v2925_v3 = vadd.f32 -0.5, %v4768_v55  ;;  %v1489_v62 = vmul.f32 %v2924_v51, %v4839_v6  ;;  %v4963_v44 = vmul.f32 %v4947_v56, %v4947_v56 }
 0x227   : > { %v3225_v22 = vpop.eup %3224  ;;  %v1890_v45 = vmul.f32 0.5, %v4947_v56  ;;  %v1953_v19 = vmul.f32 0.003968254, %v4951_v47  ;;  %v1585_v26 = vmul.f32 0.0005952381, %v4850_v46  ;;  %3238 = vlog2.f32 %v4761_v30 }
 0x228   : > { %v1107_v2 = vmul.f32 %v3225_v22, %v4905_v38  ;;  %v1490_v31 = vmul.f32 %v2925_v3, %v4843_v10  ;;  %v1521_v1 = vsub.f32 %v1489_v62, %v4749_v43  ;;  %v3227_v6 = vpop.eup %3226  ;;  %v1921_v20 = vsub.f32 %v4937_v27, %v1889_v49 }
 0x229   : > { %v1954_v40 = vmul.f32 0.003968254, %v4963_v44  ;;  %v1985_v0 = vsub.f32 0.008333334, %v1953_v19  ;;  %v1586_v52 = vmul.f32 0.0005952381, %v4857_v15  ;;  %v1922_v12 = vsub.f32 %v4943_v34, %v1890_v45 }
 0x22a   : > { %v1108_v32 = vmul.f32 %v3227_v6, %v4907_v13  ;;  %v1139_v25 = vsub.f32 2.0, %v1107_v2  ;;  %v1522_v16 = vsub.f32 %v1490_v31, %v4768_v55  ;;  %v1617_v43 = vsub.f32 0.0007936508, %v1585_v26 }
 0x22b   : > { %v3229_v30 = vpop.eup %3228  ;;  %v1986_v59 = vsub.f32 0.008333334, %v1954_v40  ;;  %v2017_v10 = vmul.f32 %v1985_v0, %v4951_v47  ;;  %v1618_v41 = vsub.f32 0.0007936508, %v1586_v52  ;;  %v1553_v3 = vadd.f32 0.9189385, %v1521_v1 }
 0x22c   : > { %v1140_v21 = vsub.f32 2.0, %v1108_v32  ;;  %v1171_v51 = vmul.f32 %v3225_v22, %v1139_v25  ;;  %v1267_v49 = vmul.f32 %v3229_v30, %v4903_v24  ;;  %v1649_v63 = vmul.f32 %v1617_v43, %v4850_v46 }
 0x22d   : > { %v3231_v62 = vpop.eup %3230  ;;  %v2018_v19 = vmul.f32 %v1986_v59, %v4963_v44  ;;  %v2049_v45 = vsub.f32 0.083333336, %v2017_v10  ;;  %v1650_v2 = vmul.f32 %v1618_v41, %v4857_v15  ;;  %v1554_v0 = vadd.f32 0.9189385, %v1522_v16 }
 0x22e   : > { %v3233_v55 = vpop.eup %3232  ;;  %v4983_v31 = vmul.f32 %v3227_v6, %v1140_v21  ;;  %v1268_v40 = vmul.f32 %v3231_v62, %v4911_v28  ;;  %v1299_v26 = vsub.f32 2.0, %v1267_v49  ;;  %v4988_v1 = vmul.f32 %v1171_v51, %v4927_v4 }
 0x22f   : > { %v3235_v52 = vpop.eup %3234  ;;  %v2050_v22 = vsub.f32 0.083333336, %v2018_v19  ;;  %v2081_v32 = vmul.f32 %v2049_v45, %v4951_v47  ;;  %v1681_v25 = vadd.f32 -0.0027777778, %v1649_v63  ;;  %v4992_v41 = vmul.f32 0.6931472, %v3233_v55 }
 0x230   : > { %v3237_v59 = vpop.eup %3236  ;;  %v1300_v10 = vsub.f32 2.0, %v1268_v40  ;;  %v4990_v43 = vmul.f32 %v3229_v30, %v1299_v26  ;;  %v4994_v6 = vmul.f32 0.6931472, %v3235_v52  ;;  %v1682_v17 = vadd.f32 -0.0027777778, %v1650_v2 }
 0x231   : > { %v2082_v21 = vmul.f32 %v2050_v22, %v4963_v44  ;;  %v2113_v49 = vsub.f32 %v1921_v20, %v2081_v32  ;;  %v1018_v16 = vmul.f32 0.6931472, %v3237_v59  ;;  %v3239_v19 = vpop.eup %3238  ;;  %v1713_v30 = vmul.f32 %v1681_v25, %v4850_v46  ;;  %v6217_v32 = vld [vmem:[#allocation21_spill] sm:$0xff] }
 0x232   : > { %v4997_v60 = vmul.f32 %v3231_v62, %v1300_v10  ;;  %v5001_v4 = vmul.f32 %v4990_v43, %v4990_v43  ;;  %v1875_v63 = vmul.f32 0.5, %v4990_v43  ;;  %v1020_v55 = vmul.f32 0.6931472, %v3239_v19 }
 0x233   : > { %v2114_v51 = vsub.f32 %v1922_v12, %v2082_v21  ;;  %v2145_v45 = vsub.f32 %v2113_v49, %v4941_v8  ;;  %v1714_v40 = vmul.f32 %v1682_v17, %v4857_v15  ;;  %v1745_v12 = vadd.f32 0.083333336, %v1713_v30 }
 0x234   : > { %v5009_v20 = vmul.f32 %v4997_v60, %v4997_v60  ;;  %v1876_v62 = vmul.f32 0.5, %v4997_v60  ;;  %v1907_v2 = vsub.f32 %v4992_v41, %v1875_v63  ;;  %v1939_v26 = vmul.f32 0.003968254, %v5001_v4 }
 0x235   : > { %v2146_v52 = vsub.f32 %v2114_v51, %v4956_v7  ;;  %v5016_v46 = vmul.f32 %v4890_v36, %v2145_v45  ;;  %v1746_v8 = vadd.f32 0.083333336, %v1714_v40  ;;  %v643_v25 = vadd.f32 1.0, %v6217_v32  ;;  %v6219_v7 = vld [vmem:[#allocation22_spill] sm:$0xff] }
 0x236   : > { %v1908_v22 = vsub.f32 %v4994_v6, %v1876_v62  ;;  %v1940_v17 = vmul.f32 0.003968254, %v5009_v20  ;;  %v1971_v15 = vsub.f32 0.008333334, %v1939_v26  ;;  %v1777_v10 = vmul.f32 %v1745_v12, %v4841_v54 }
 0x237   : > { %6216 = vst [vmem:[#allocation18_spill] sm:$0xff] %v5016_v46  ;;  %v5022_v59 = vmul.f32 %v4894_v11, %v2146_v52  ;;  %v1778_v21 = vmul.f32 %v1746_v8, %v4846_v37  ;;  %v644_v49 = vadd.f32 1.0, %v6219_v7  ;;  %v675_v63 = vadd.f32 2.0, %v6217_v32 }
 0x238   : > { %v1972_v36 = vsub.f32 0.008333334, %v1940_v17  ;;  %v2003_v19 = vmul.f32 %v1971_v15, %v5001_v4  ;;  %v676_v30 = vadd.f32 2.0, %v6219_v7  ;;  %v1809_v45 = vadd.f32 %v1777_v10, %v1553_v3 }
 0x239   : > { %6218 = vst [vmem:[#allocation20_spill] sm:$0xff] %v5022_v59  ;;  %v2533_v51 = vadd.f32 %v5022_v59, %v5016_v46  ;;  %v1810_v40 = vadd.f32 %v1778_v21, %v1554_v0  ;;  %v707_v11 = vadd.f32 3.0, %v6217_v32  ;;  %v708_v37 = vadd.f32 3.0, %v6219_v7 }
 0x23a   : > { %v2004_v54 = vmul.f32 %v1972_v36, %v5009_v20  ;;  %v2035_v62 = vsub.f32 0.083333336, %v2003_v19  ;;  %v5036_v26 = vadd.f32 4.0, %v6217_v32  ;;  %v1841_v52 = vsub.f32 %v1809_v45, %v1018_v16 }
 0x23b   : > { %2534 = vadd.xlane.f32.xlu0 %v2533_v51  ;;  %v1842_v12 = vsub.f32 %v1810_v40, %v1020_v55  ;;  %v5039_v8 = vadd.f32 4.0, %v6219_v7  ;;  %v771_v17 = vmul.f32 %v643_v25, %v6217_v32  ;;  %v772_v15 = vmul.f32 %v644_v49, %v6219_v7 }
 0x23c   : > { %v2036_v3 = vsub.f32 0.083333336, %v2004_v54  ;;  %v2067_v0 = vmul.f32 %v2035_v62, %v5001_v4  ;;  %v803_v10 = vmul.f32 %v707_v11, %v675_v63  ;;  %v5045_v36 = vadd.f32 %v4775_v33, %v1841_v52 }
 0x23d   : > { %v2444_v21 = vadd.f32 %v1842_v12, %v1841_v52  ;;  %v5048_v19 = vadd.f32 %v4784_v5, %v1842_v12  ;;  %v804_v16 = vmul.f32 %v708_v37, %v676_v30  ;;  %v867_v40 = vadd.f32 %v643_v25, %v6217_v32 }
 0x23e   : > { %v2068_v55 = vmul.f32 %v2036_v3, %v5009_v20  ;;  %v2099_v51 = vsub.f32 %v1907_v2, %v2067_v0  ;;  %v5051_v45 = vmul.f32 %v803_v10, %v771_v17  ;;  %v868_v62 = vadd.f32 %v644_v49, %v6219_v7 }
 0x23f   : > { %2445 = vadd.xlane.f32.xlu0 %v2444_v21  ;;  %v5054_v54 = vmul.f32 %v804_v16, %v772_v15  ;;  %v899_v59 = vadd.f32 %v707_v11, %v675_v63  ;;  %v900_v46 = vadd.f32 %v708_v37, %v676_v30  ;;  %v1204_v33 = vmul.f32 %v4983_v31, %v4933_v14 }
 0x240   : > { %v2100_v5 = vsub.f32 %v1908_v22, %v2068_v55  ;;  %v2131_v52 = vsub.f32 %v2099_v51, %v4988_v1  ;;  %3240 = vrcp.f32 %v5051_v45  ;;  %v2959_v2 = vadd.f32 -1.0, %v6215_v48 }
 0x241   : > { %3242 = vrcp.f32 %v5054_v54  ;;  %v931_v3 = vmul.f32 %v867_v40, %v803_v10  ;;  %v932_v49 = vmul.f32 %v868_v62, %v804_v16  ;;  %v963_v63 = vmul.f32 %v899_v59, %v771_v17 }
 0x242   : > { %v2132_v25 = vsub.f32 %v2100_v5, %v1204_v33  ;;  %v2195_v12 = vmul.f32 %v4920_v35, %v2131_v52  ;;  %3244 = vrcp.f32 %v5036_v26  ;;  %v964_v30 = vmul.f32 %v900_v46, %v772_v15 }
 0x243   : > { %3246 = vrcp.f32 %v5039_v8  ;;  %v2940_v48 = vadd.f32 -0.5, %v4819_v58  ;;  %v2941_v35 = vadd.f32 -0.5, %v4826_v42  ;;  %v1601_v1 = vmul.f32 0.0005952381, %v4951_v47 }
 0x244   : > { %v2196_v14 = vmul.f32 %v2959_v2, %v2132_v25  ;;  %v5067_v31 = vadd.f32 %v4925_v39, %v2195_v12  ;;  %3248 = vlog2.f32 %v5036_v26  ;;  %v1602_v22 = vmul.f32 0.0005952381, %v4963_v44 }
 0x245   : > { %3250 = vlog2.f32 %v5039_v8  ;;  %v1505_v39 = vmul.f32 %v2940_v48, %v4937_v27  ;;  %v1506_v11 = vmul.f32 %v2941_v35, %v4943_v34  ;;  %v1633_v37 = vsub.f32 0.0007936508, %v1601_v1 }
 0x246   : > { %v2512_v59 = vadd.f32 %v2196_v14, %v2195_v12  ;;  %v5076_v46 = vadd.f32 %v4931_v50, %v2196_v14  ;;  %3252 = vlog2.f32 %v4832_v53  ;;  %v1634_v17 = vsub.f32 0.0007936508, %v1602_v22 }
 0x247   : > { %3254 = vlog2.f32 %v4836_v57  ;;  %v5083_v0 = vadd.f32 -1.0, %v6217_v32  ;;  %v1537_v15 = vsub.f32 %v1505_v39, %v4819_v58  ;;  %v2926_v10 = vadd.f32 -0.5, %v4903_v24 }
 0x248   : > { %2513 = vadd.xlane.f32.xlu1 %v2512_v59  ;;  %v2927_v50 = vadd.f32 -0.5, %v4911_v28  ;;  %v995_v21 = vadd.f32 %v963_v63, %v931_v3  ;;  %v996_v53 = vadd.f32 %v964_v30, %v932_v49  ;;  %v1665_v27 = vmul.f32 %v1633_v37, %v4951_v47 }
 0x249   : > { %v1666_v57 = vmul.f32 %v1634_v17, %v4963_v44  ;;  %v5091_v34 = vadd.f32 -1.0, %v6219_v7  ;;  %v1538_v55 = vsub.f32 %v1506_v11, %v4826_v42  ;;  %v1491_v51 = vmul.f32 %v2926_v10, %v4992_v41 }
 0x24a   : > { %v3241_v16 = vpop.eup %3240  ;;  %v1492_v58 = vmul.f32 %v2927_v50, %v4994_v6  ;;  %v1697_v33 = vadd.f32 -0.0027777778, %v1665_v27  ;;  %3256 = vlog2.f32 %v4905_v38  ;;  %v1569_v25 = vadd.f32 0.9189385, %v1537_v15 }
 0x24b   : > { %v3243_v40 = vpop.eup %3242  ;;  %v1123_v62 = vmul.f32 %v3241_v16, %v5051_v45  ;;  %v1698_v5 = vadd.f32 -0.0027777778, %v1666_v57  ;;  %v1523_v12 = vsub.f32 %v1491_v51, %v4903_v24  ;;  %v1587_v3 = vmul.f32 0.0005952381, %v5001_v4 }
 0x24c   : > { %v3245_v52 = vpop.eup %3244  ;;  %v1124_v2 = vmul.f32 %v3243_v40, %v5054_v54  ;;  %v1729_v6 = vmul.f32 %v1697_v33, %v4951_v47  ;;  %v1570_v48 = vadd.f32 0.9189385, %v1538_v55  ;;  %v1524_v35 = vsub.f32 %v1492_v58, %v4911_v28 }
 0x24d   : > { %v3247_v42 = vpop.eup %3246  ;;  %v1155_v49 = vsub.f32 2.0, %v1123_v62  ;;  %v1283_v41 = vmul.f32 %v3245_v52, %v5036_v26  ;;  %v1730_v63 = vmul.f32 %v1698_v5, %v4963_v44  ;;  %3258 = vlog2.f32 %v4907_v13 }
 0x24e   : > { %v3249_v30 = vpop.eup %3248  ;;  %v1156_v14 = vsub.f32 2.0, %v1124_v2  ;;  %v1284_v38 = vmul.f32 %v3247_v42, %v5039_v8  ;;  %v1761_v24 = vadd.f32 0.083333336, %v1729_v6  ;;  %v1588_v59 = vmul.f32 0.0005952381, %v5009_v20 }
 0x24f   : > { %v3251_v1 = vpop.eup %3250  ;;  %v1315_v22 = vsub.f32 2.0, %v1283_v41  ;;  %v1187_v11 = vmul.f32 %v3241_v16, %v1155_v49  ;;  %v1762_v17 = vadd.f32 0.083333336, %v1730_v63  ;;  %v5111_v27 = vadd.f32 0.9189385, %v1523_v12  ;;  %v6222_v63 = vld [vmem:[#allocation23_spill] sm:$0xff] }
 0x250   : > { %v3253_v39 = vpop.eup %3252  ;;  %v1188_v37 = vmul.f32 %v3243_v40, %v1156_v14  ;;  %v1316_v47 = vsub.f32 2.0, %v1284_v38  ;;  %v1793_v50 = vmul.f32 %v1761_v24, %v4935_v18  ;;  %v5116_v55 = vadd.f32 0.9189385, %v1524_v35  ;;  %v6223_v14 = vld [vmem:[#allocation25_spill] sm:$0xff] }
 0x251   : > { %v3255_v44 = vpop.eup %3254  ;;  %v5108_v15 = vmul.f32 %v3245_v52, %v1315_v22  ;;  %v1050_v10 = vmul.f32 0.6931472, %v3253_v39  ;;  %v1794_v13 = vmul.f32 %v1762_v17, %v4947_v56  ;;  %v5122_v51 = vmul.f32 0.6931472, %v3249_v30 }
 0x252   : > { %v5113_v28 = vmul.f32 %v3247_v42, %v1316_v47  ;;  %v1052_v57 = vmul.f32 0.6931472, %v3255_v44  ;;  %v5124_v58 = vmul.f32 0.6931472, %v3251_v1  ;;  %v1825_v40 = vadd.f32 %v1793_v50, %v1569_v25 }
 0x253   : > { %v5120_v16 = vmul.f32 %v5108_v15, %v5108_v15  ;;  %v5126_v62 = vmul.f32 %v1187_v11, %v995_v21  ;;  %v5128_v18 = vmul.f32 %v1188_v37, %v996_v53  ;;  %v1826_v56 = vadd.f32 %v1794_v13, %v1570_v48 }
 0x254   : > { %v5132_v33 = vmul.f32 %v5113_v28, %v5113_v28  ;;  %v3257_v5 = vpop.eup %3256  ;;  %v1891_v52 = vmul.f32 0.5, %v5108_v15  ;;  %v5136_v12 = vsub.f32 %v1825_v40, %v1050_v10  ;;  %v1619_v42 = vsub.f32 0.0007936508, %v1587_v3 }
 0x255   : > { %v1955_v2 = vmul.f32 0.003968254, %v5120_v16  ;;  %v1892_v49 = vmul.f32 0.5, %v5113_v28  ;;  %v5140_v25 = vsub.f32 %v1826_v56, %v1052_v57  ;;  %v1620_v53 = vsub.f32 0.0007936508, %v1588_v59 }
 0x256   : > { %6220 = vst [vmem:[#allocation39_spill] sm:$0xff] %v5136_v12  ;;  %v1956_v21 = vmul.f32 0.003968254, %v5132_v33  ;;  %v1651_v6 = vmul.f32 %v1619_v42, %v5001_v4  ;;  %v629_v30 = vadd.f32 1.0, %v6222_v63  ;;  %v630_v38 = vadd.f32 1.0, %v6223_v14 }
 0x257   : > { %6221 = vst [vmem:[#allocation40_spill] sm:$0xff] %v5140_v25  ;;  %v1987_v41 = vsub.f32 0.008333334, %v1955_v2  ;;  %v2468_v35 = vadd.f32 %v5140_v25, %v5136_v12  ;;  %v1652_v3 = vmul.f32 %v1620_v53, %v5009_v20  ;;  %v661_v1 = vadd.f32 2.0, %v6222_v63  ;;  %v3259_v22 = vpop.eup %3258 }
 0x258   : > { %v1988_v48 = vsub.f32 0.008333334, %v1956_v21  ;;  %v1683_v39 = vadd.f32 -0.0027777778, %v1651_v6  ;;  %v662_v59 = vadd.f32 2.0, %v6223_v14  ;;  %v693_v11 = vadd.f32 3.0, %v6222_v63 }
 0x259   : > { %v2019_v24 = vmul.f32 %v1987_v41, %v5120_v16  ;;  %v1923_v37 = vsub.f32 %v5122_v51, %v1891_v52  ;;  %2469 = vadd.xlane.f32.xlu0 %v2468_v35  ;;  %v1684_v17 = vadd.f32 -0.0027777778, %v1652_v3  ;;  %v694_v44 = vadd.f32 3.0, %v6223_v14 }
 0x25a   : > { %v2020_v47 = vmul.f32 %v1988_v48, %v5132_v33  ;;  %v1924_v10 = vsub.f32 %v5124_v58, %v1892_v49  ;;  %v1715_v57 = vmul.f32 %v1683_v39, %v5001_v4  ;;  %v757_v13 = vmul.f32 %v629_v30, %v6222_v63 }
 0x25b   : > { %v2051_v50 = vsub.f32 0.083333336, %v2019_v24  ;;  %v1716_v56 = vmul.f32 %v1684_v17, %v5009_v20  ;;  %v758_v2 = vmul.f32 %v630_v38, %v6223_v14  ;;  %v789_v42 = vmul.f32 %v693_v11, %v661_v1 }
 0x25c   : > { %v2052_v40 = vsub.f32 0.083333336, %v2020_v47  ;;  %v1022_v21 = vmul.f32 0.6931472, %v3257_v5  ;;  %v1747_v53 = vadd.f32 0.083333336, %v1715_v57  ;;  %v790_v41 = vmul.f32 %v694_v44, %v662_v59 }
 0x25d   : > { %v2083_v52 = vmul.f32 %v2051_v50, %v5120_v16  ;;  %v1748_v48 = vadd.f32 0.083333336, %v1716_v56  ;;  %v5163_v49 = vadd.f32 4.0, %v6222_v63  ;;  %v821_v4 = vmul.f32 %v789_v42, %v757_v13 }
 0x25e   : > { %v2084_v6 = vmul.f32 %v2052_v40, %v5132_v33  ;;  %v1779_v3 = vmul.f32 %v1747_v53, %v4990_v43  ;;  %v822_v24 = vmul.f32 %v790_v41, %v758_v2  ;;  %v853_v20 = vadd.f32 %v629_v30, %v6222_v63 }
 0x25f   : > { %v2115_v35 = vsub.f32 %v1923_v37, %v2083_v52  ;;  %v1780_v47 = vmul.f32 %v1748_v48, %v4997_v60  ;;  %v5169_v5 = vadd.f32 4.0, %v6223_v14  ;;  %v885_v17 = vadd.f32 %v693_v11, %v661_v1 }
 0x260   : > { %v2116_v39 = vsub.f32 %v1924_v10, %v2084_v6  ;;  %v1811_v57 = vadd.f32 %v1779_v3, %v5111_v27  ;;  %v854_v40 = vadd.f32 %v630_v38, %v6223_v14  ;;  %v886_v56 = vadd.f32 %v694_v44, %v662_v59 }
 0x261   : > { %v2147_v50 = vsub.f32 %v2115_v35, %v5126_v62  ;;  %v1024_v43 = vmul.f32 0.6931472, %v3259_v22  ;;  %v1812_v52 = vadd.f32 %v1780_v47, %v5116_v55  ;;  %3260 = vrcp.f32 %v821_v4  ;;  %v6226_v35 = vld [vmem:[#allocation27_spill] sm:$0xff] }
 0x262   : > { %v2148_v37 = vsub.f32 %v2116_v39, %v5128_v18  ;;  %v1843_v60 = vsub.f32 %v1811_v57, %v1022_v21  ;;  %v917_v10 = vmul.f32 %v853_v20, %v789_v42  ;;  %3262 = vrcp.f32 %v822_v24 }
 0x263   : > { %v5177_v30 = vmul.f32 %v5083_v0, %v2147_v50  ;;  %v1844_v62 = vsub.f32 %v1812_v52, %v1024_v43  ;;  %v949_v27 = vmul.f32 %v885_v17, %v757_v13  ;;  %3264 = vrcp.f32 %v5163_v49 }
 0x264   : > { %v5180_v1 = vmul.f32 %v5091_v34, %v2148_v37  ;;  %v5184_v38 = vadd.f32 %v5045_v36, %v1843_v60  ;;  %v918_v18 = vmul.f32 %v854_v40, %v790_v41  ;;  %v950_v22 = vmul.f32 %v886_v56, %v758_v2 }
 0x265   : > { %6224 = vst [vmem:[#allocation23_spill] sm:$0xff] %v5177_v30  ;;  %3266 = vrcp.f32 %v5169_v5  ;;  %v2447_v55 = vadd.f32 %v1844_v62, %v1843_v60  ;;  %v5190_v59 = vadd.f32 %v5048_v19, %v1844_v62  ;;  %v2942_v34 = vadd.f32 -0.5, %v5036_v26 }
 0x266   : > { %6225 = vst [vmem:[#allocation25_spill] sm:$0xff] %v5180_v1  ;;  %v2536_v0 = vadd.f32 %v5180_v1, %v5177_v30  ;;  %3268 = vlog2.f32 %v5163_v49  ;;  %v2943_v36 = vadd.f32 -0.5, %v5039_v8  ;;  %v1603_v11 = vmul.f32 0.0005952381, %v5120_v16 }
 0x267   : > { %3270 = vlog2.f32 %v5169_v5  ;;  %v5197_v44 = vadd.f32 %v949_v27, %v917_v10  ;;  %v1604_v13 = vmul.f32 0.0005952381, %v5132_v33  ;;  %v1507_v19 = vmul.f32 %v2942_v34, %v5122_v51 }
 0x268   : > { %2537 = vadd.xlane.f32.xlu1 %v2536_v0  ;;  %3272 = vlog2.f32 %v5051_v45  ;;  %v1508_v2 = vmul.f32 %v2943_v36, %v5124_v58  ;;  %v1635_v42 = vsub.f32 0.0007936508, %v1603_v11  ;;  %v5204_v21 = vadd.f32 %v950_v22, %v918_v18 }
 0x269   : > { %3274 = vlog2.f32 %v5054_v54  ;;  %v5207_v53 = vadd.f32 -1.0, %v6222_v63  ;;  %v5210_v41 = vadd.f32 -1.0, %v6223_v14  ;;  %v1636_v6 = vsub.f32 0.0007936508, %v1604_v13  ;;  %v6227_v14 = vld [vmem:[#allocation29_spill] sm:$0xff] }
 0x26a   : > { %v1667_v45 = vmul.f32 %v1635_v42, %v5120_v16  ;;  %3276 = vlog2.f32 %v821_v4  ;;  %v5214_v48 = vadd.f32 -0.5, %v5163_v49  ;;  %v5217_v54 = vadd.f32 -0.5, %v5169_v5 }
 0x26b   : > { %v3261_v51 = vpop.eup %3260  ;;  %v1539_v58 = vsub.f32 %v1507_v19, %v5036_v26  ;;  %v1668_v63 = vmul.f32 %v1636_v6, %v5132_v33  ;;  %v5222_v3 = vadd.f32 1.0, %v6226_v35  ;;  %v5225_v20 = vadd.f32 1.0, %v6227_v14 }
 0x26c   : > { %2448 = vadd.xlane.f32.xlu1 %v2447_v55  ;;  %v3263_v39 = vpop.eup %3262  ;;  %v1109_v47 = vmul.f32 %v3261_v51, %v821_v4  ;;  %v1540_v17 = vsub.f32 %v1508_v2, %v5039_v8  ;;  %v1699_v50 = vadd.f32 -0.0027777778, %v1667_v45  ;;  %3278 = vlog2.f32 %v822_v24 }
 0x26d   : > { %v3265_v57 = vpop.eup %3264  ;;  %v1110_v40 = vmul.f32 %v3263_v39, %v822_v24  ;;  %v1700_v56 = vadd.f32 -0.0027777778, %v1668_v63  ;;  %v5229_v37 = vadd.f32 2.0, %v6226_v35  ;;  %v5232_v26 = vadd.f32 2.0, %v6227_v14 }
 0x26e   : > { %v1141_v52 = vsub.f32 2.0, %v1109_v47  ;;  %v1269_v60 = vmul.f32 %v3265_v57, %v5163_v49  ;;  %v1731_v10 = vmul.f32 %v1699_v50, %v5120_v16  ;;  %v5237_v4 = vadd.f32 3.0, %v6226_v35 }
 0x26f   : > { %v3267_v43 = vpop.eup %3266  ;;  %v1142_v62 = vsub.f32 2.0, %v1110_v40  ;;  %v1571_v27 = vadd.f32 0.9189385, %v1539_v58  ;;  %v1732_v18 = vmul.f32 %v1700_v56, %v5132_v33  ;;  %v1572_v55 = vadd.f32 0.9189385, %v1540_v17 }
 0x270   : > { %v3269_v8 = vpop.eup %3268  ;;  %v1270_v24 = vmul.f32 %v3267_v43, %v5169_v5  ;;  %v1301_v0 = vsub.f32 2.0, %v1269_v60  ;;  %v1763_v34 = vadd.f32 0.083333336, %v1731_v10  ;;  %v5242_v36 = vadd.f32 3.0, %v6227_v14 }
 0x271   : > { %v3271_v22 = vpop.eup %3270  ;;  %v1173_v13 = vmul.f32 %v3261_v51, %v1141_v52  ;;  %v1764_v19 = vadd.f32 0.083333336, %v1732_v18  ;;  %v5245_v2 = vadd.f32 4.0, %v6226_v35  ;;  %v1174_v6 = vmul.f32 %v3263_v39, %v1142_v62 }
 0x272   : > { %v3273_v11 = vpop.eup %3272  ;;  %v1302_v16 = vsub.f32 2.0, %v1270_v24  ;;  %v5247_v45 = vmul.f32 %v3265_v57, %v1301_v0  ;;  %v1795_v33 = vmul.f32 %v1763_v34, %v5108_v15  ;;  %v5254_v50 = vadd.f32 4.0, %v6227_v14 }
 0x273   : > { %v3275_v42 = vpop.eup %3274  ;;  %v1054_v58 = vmul.f32 0.6931472, %v3273_v11  ;;  %v1796_v17 = vmul.f32 %v1764_v19, %v5113_v28  ;;  %v1410_v56 = vmul.f32 0.6931472, %v3269_v8  ;;  %v5260_v39 = vmul.f32 %v5222_v3, %v6226_v35 }
 0x274   : > { %v5250_v63 = vmul.f32 %v3267_v43, %v1302_v16  ;;  %v1056_v47 = vmul.f32 0.6931472, %v3275_v42  ;;  %v3277_v51 = vpop.eup %3276  ;;  %v1365_v40 = vmul.f32 %v5247_v45, %v5247_v45  ;;  %v1827_v52 = vadd.f32 %v1795_v33, %v1571_v27 }
 0x275   : > { %v5263_v15 = vmul.f32 %v1173_v13, %v5197_v44  ;;  %v1412_v28 = vmul.f32 0.6931472, %v3271_v22  ;;  %v1828_v43 = vadd.f32 %v1796_v17, %v1572_v55  ;;  %v5268_v10 = vmul.f32 %v1174_v6, %v5204_v21  ;;  %v5279_v13 = vpop.xlane.xlu0 %2368  ;;  %v5281_v21 = vpop.xlane.xlu1 %2371 }
 0x276   : > { %v1366_v57 = vmul.f32 %v5250_v63, %v5250_v63  ;;  %v3279_v60 = vpop.eup %3278  ;;  %v1877_v62 = vmul.f32 0.5, %v5247_v45  ;;  %v1941_v8 = vmul.f32 0.003968254, %v1365_v40  ;;  %v5271_v24 = vsub.f32 %v1827_v52, %v1054_v58  ;;  %6230 = vst [vmem:[#allocation41_spill] sm:$0xff] %v5279_v13  ;;  %6231 = vst [vmem:[#allocation42_spill] sm:$0xff] %v5281_v21 }
 0x277   : > { %v1878_v27 = vmul.f32 0.5, %v5250_v63  ;;  %v5274_v0 = vsub.f32 %v1828_v43, %v1056_v47  ;;  %v5276_v44 = vmul.f32 0.6931472, %v3277_v51  ;;  %v1493_v22 = vmul.f32 %v5214_v48, %v1410_v56 }
 0x278   : > { %6228 = vst [vmem:[#allocation27_spill] sm:$0xff] %v5271_v24  ;;  %v1942_v18 = vmul.f32 0.003968254, %v1366_v57  ;;  %v1973_v34 = vsub.f32 0.008333334, %v1941_v8  ;;  %v1494_v6 = vmul.f32 %v5217_v54, %v1412_v28  ;;  %v1909_v58 = vsub.f32 %v1410_v56, %v1877_v62 }
 0x279   : > { %6229 = vst [vmem:[#allocation29_spill] sm:$0xff] %v5274_v0  ;;  %v1589_v55 = vmul.f32 0.0005952381, %v1365_v40  ;;  %v1590_v11 = vmul.f32 0.0005952381, %v1366_v57  ;;  %v2471_v19 = vadd.f32 %v5274_v0, %v5271_v24  ;;  %v5290_v48 = vmul.f32 %v5225_v20, %v6227_v14  ;;  %v5297_v62 = vpop.xlane.xlu0 %2392 }
 0x27a   : > { %v1974_v16 = vsub.f32 0.008333334, %v1942_v18  ;;  %v5285_v42 = vmul.f32 0.6931472, %v3279_v60  ;;  %v2005_v33 = vmul.f32 %v1973_v34, %v1365_v40  ;;  %v791_v52 = vmul.f32 %v5237_v4, %v5229_v37  ;;  %6232 = vst [vmem:[#allocation43_spill] sm:$0xff] %v5297_v62  ;;  %v5299_v18 = vpop.xlane.xlu1 %2395 }
 0x27b   : > { %v1621_v47 = vsub.f32 0.0007936508, %v1589_v55  ;;  %v1622_v17 = vsub.f32 0.0007936508, %v1590_v11  ;;  %2472 = vadd.xlane.f32.xlu1 %v2471_v19  ;;  %v792_v43 = vmul.f32 %v5242_v36, %v5232_v26  ;;  %v1525_v8 = vsub.f32 %v1493_v22, %v5163_v49  ;;  %6233 = vst [vmem:[#allocation44_spill] sm:$0xff] %v5299_v18 }
 0x27c   : > { %v2006_v51 = vmul.f32 %v1974_v16, %v1366_v57  ;;  %v2037_v60 = vsub.f32 0.083333336, %v2005_v33  ;;  %v1910_v34 = vsub.f32 %v1412_v28, %v1878_v27  ;;  %v1526_v11 = vsub.f32 %v1494_v6, %v5169_v5 }
 0x27d   : > { %v1653_v54 = vmul.f32 %v1621_v47, %v1365_v40  ;;  %v1654_v56 = vmul.f32 %v1622_v17, %v1366_v57  ;;  %v5303_v16 = vmul.f32 %v791_v52, %v5260_v39  ;;  %v855_v33 = vadd.f32 %v5222_v3, %v6226_v35 }
 0x27e   : > { %v2038_v55 = vsub.f32 0.083333336, %v2006_v51  ;;  %v2069_v19 = vmul.f32 %v2037_v60, %v1365_v40  ;;  %v5308_v22 = vmul.f32 %v792_v43, %v5290_v48  ;;  %v856_v47 = vadd.f32 %v5225_v20, %v6227_v14  ;;  %v5314_v51 = vpop.xlane.xlu0 %2320  ;;  %v5316_v60 = vpop.xlane.xlu1 %2347 }
 0x27f   : > { %v1685_v21 = vadd.f32 -0.0027777778, %v1653_v54  ;;  %v1686_v13 = vadd.f32 -0.0027777778, %v1654_v56  ;;  %v887_v28 = vadd.f32 %v5237_v4, %v5229_v37  ;;  %v1557_v27 = vadd.f32 0.9189385, %v1525_v8 }
 0x280   : > { %v2070_v49 = vmul.f32 %v2038_v55, %v1366_v57  ;;  %v2101_v5 = vsub.f32 %v1909_v58, %v2069_v19  ;;  %6234 = vst [vmem:[#allocation45_spill] sm:$0xff] %v5314_v51  ;;  %6235 = vst [vmem:[#allocation46_spill] sm:$0xff] %v5316_v60  ;;  %v1558_v3 = vadd.f32 0.9189385, %v1526_v11  ;;  %v888_v56 = vadd.f32 %v5242_v36, %v5232_v26 }
 0x281   : > { %v1717_v6 = vmul.f32 %v1685_v21, %v1365_v40  ;;  %v1718_v17 = vmul.f32 %v1686_v13, %v1366_v57  ;;  %3280 = vrcp.f32 %v5303_v16  ;;  %v919_v37 = vmul.f32 %v855_v33, %v791_v52  ;;  %v6239_v52 = vld [vmem:[#allocation26_spill] sm:$0xff] }
 0x282   : > { %v2102_v54 = vsub.f32 %v1910_v34, %v2070_v49  ;;  %v2133_v20 = vsub.f32 %v2101_v5, %v5263_v15  ;;  %v920_v40 = vmul.f32 %v856_v47, %v792_v43  ;;  %v951_v57 = vmul.f32 %v887_v28, %v5260_v39  ;;  %v5329_v36 = vpop.xlane.xlu0 %2344  ;;  %v5331_v15 = vpop.xlane.xlu1 %2326 }
 0x283   : > { %v1749_v55 = vadd.f32 0.083333336, %v1717_v6  ;;  %v1750_v18 = vadd.f32 0.083333336, %v1718_v17  ;;  %3282 = vrcp.f32 %v5308_v22  ;;  %6236 = vst [vmem:[#allocation47_spill] sm:$0xff] %v5329_v36  ;;  %6237 = vst [vmem:[#allocation48_spill] sm:$0xff] %v5331_v15 }
 0x284   : > { %v2134_v4 = vsub.f32 %v2102_v54, %v5268_v10  ;;  %v2197_v13 = vmul.f32 %v5207_v53, %v2133_v20  ;;  %3284 = vrcp.f32 %v5245_v2  ;;  %v6238_v10 = vld [vmem:[#allocation24_spill] sm:$0xff]  ;;  %v5339_v43 = vadd.f32 1.0, %v6239_v52 }
 0x285   : > { %v1781_v21 = vmul.f32 %v1749_v55, %v5247_v45  ;;  %v1782_v26 = vmul.f32 %v1750_v18, %v5250_v63  ;;  %3286 = vrcp.f32 %v5254_v50  ;;  %v5336_v39 = vadd.f32 1.0, %v6238_v10 }
 0x286   : > { %v2198_v58 = vmul.f32 %v5210_v41, %v2134_v4  ;;  %v5342_v53 = vadd.f32 %v5067_v31, %v2197_v13  ;;  %3288 = vlog2.f32 %v5245_v2  ;;  %v5350_v41 = vadd.f32 2.0, %v6238_v10  ;;  %v5358_v33 = vpop.xlane.xlu0 %2323  ;;  %v5360_v49 = vpop.xlane.xlu1 %2377 }
 0x287   : > { %v1813_v45 = vadd.f32 %v1781_v21, %v1557_v27  ;;  %v1814_v63 = vadd.f32 %v1782_v26, %v1558_v3  ;;  %3290 = vlog2.f32 %v5254_v50  ;;  %v5355_v31 = vadd.f32 2.0, %v6239_v52  ;;  %6240 = vst [vmem:[#allocation24_spill] sm:$0xff] %v5358_v33  ;;  %6241 = vst [vmem:[#allocation26_spill] sm:$0xff] %v5360_v49 }
 0x288   : > { %v2515_v8 = vadd.f32 %v2198_v58, %v2197_v13  ;;  %v5346_v18 = vadd.f32 %v5076_v46, %v2198_v58  ;;  %v709_v19 = vadd.f32 3.0, %v6238_v10  ;;  %v952_v46 = vmul.f32 %v888_v56, %v5290_v48 }
 0x289   : > { %v1845_v34 = vsub.f32 %v1813_v45, %v5276_v44  ;;  %v1846_v11 = vsub.f32 %v1814_v63, %v5285_v42  ;;  %v710_v47 = vadd.f32 3.0, %v6239_v52  ;;  %v5365_v28 = vadd.f32 4.0, %v6238_v10 }
 0x28a   : > { %2516 = vadd.xlane.f32.xlu0 %v2515_v8  ;;  %v5368_v44 = vadd.f32 4.0, %v6239_v52  ;;  %v5378_v17 = vmul.f32 %v5336_v39, %v6238_v10  ;;  %v5382_v48 = vmul.f32 %v5339_v43, %v6239_v52  ;;  %v5393_v56 = vpop.xlane.xlu1 %2401  ;;  %v983_v55 = vadd.f32 %v951_v57, %v919_v37 }
 0x28b   : > { %v5371_v42 = vadd.f32 %v5184_v38, %v1845_v34  ;;  %v5374_v5 = vadd.f32 %v5190_v59, %v1846_v11  ;;  %v3281_v27 = vpop.eup %3280  ;;  %v2450_v6 = vadd.f32 %v1846_v11, %v1845_v34  ;;  %3292 = vrcp.f32 %v5365_v28  ;;  %v5391_v59 = vpop.xlane.xlu0 %2374  ;;  %6243 = vst [vmem:[#allocation50_spill] sm:$0xff] %v5393_v56 }
 0x28c   : > { %v1111_v54 = vmul.f32 %v3281_v27, %v5303_v16  ;;  %v805_v38 = vmul.f32 %v709_v19, %v5350_v41  ;;  %v5388_v3 = vmul.f32 %v710_v47, %v5355_v31  ;;  %3294 = vrcp.f32 %v5368_v44  ;;  %6242 = vst [vmem:[#allocation49_spill] sm:$0xff] %v5391_v59 }
 0x28d   : > { %v3283_v20 = vpop.eup %3282  ;;  %v984_v4 = vadd.f32 %v952_v46, %v920_v40  ;;  %v5396_v13 = vadd.f32 -1.0, %v6226_v35  ;;  %3296 = vlog2.f32 %v5365_v28  ;;  %v5401_v45 = vadd.f32 -1.0, %v6227_v14 }
 0x28e   : > { %2451 = vadd.xlane.f32.xlu0 %v2450_v6  ;;  %v3285_v21 = vpop.eup %3284  ;;  %v1112_v26 = vmul.f32 %v3283_v20, %v5308_v22  ;;  %v1143_v58 = vsub.f32 2.0, %v1111_v54  ;;  %3298 = vlog2.f32 %v5368_v44  ;;  %v2944_v37 = vadd.f32 -0.5, %v5365_v28  ;;  %v5420_v54 = vpop.xlane.xlu1 %2329 }
 0x28f   : > { %v3287_v63 = vpop.eup %3286  ;;  %v1271_v8 = vmul.f32 %v3285_v21, %v5245_v2  ;;  %v5407_v40 = vadd.f32 -0.5, %v5368_v44  ;;  %v2930_v35 = vadd.f32 -0.5, %v5245_v2  ;;  %v5412_v46 = vmul.f32 %v805_v38, %v5378_v17  ;;  %v5418_v6 = vpop.xlane.xlu0 %2398  ;;  %6245 = vst [vmem:[#allocation52_spill] sm:$0xff] %v5420_v54 }
 0x290   : > { %v3289_v57 = vpop.eup %3288  ;;  %v1144_v34 = vsub.f32 2.0, %v1112_v26  ;;  %v1272_v11 = vmul.f32 %v3287_v63, %v5254_v50  ;;  %v5416_v14 = vmul.f32 %v5388_v3, %v5382_v48  ;;  %6244 = vst [vmem:[#allocation51_spill] sm:$0xff] %v5418_v6  ;;  %v1175_v60 = vmul.f32 %v3281_v27, %v1143_v58 }
 0x291   : > { %v3291_v15 = vpop.eup %3290  ;;  %v1303_v33 = vsub.f32 2.0, %v1271_v8  ;;  %v5422_v36 = vmul.f32 0.6931472, %v3289_v57  ;;  %v2931_v26 = vadd.f32 -0.5, %v5254_v50  ;;  %3300 = vlog2.f32 %v5412_v46 }
 0x292   : > { %v1176_v51 = vmul.f32 %v3283_v20, %v1144_v34  ;;  %v1304_v56 = vsub.f32 2.0, %v1272_v11  ;;  %v869_v49 = vadd.f32 %v5336_v39, %v6238_v10  ;;  %v5430_v62 = vmul.f32 0.6931472, %v3291_v15  ;;  %v5444_v39 = vpop.xlane.xlu1 %2353 }
 0x293   : > { %v5428_v59 = vmul.f32 %v3285_v21, %v1303_v33  ;;  %3302 = vlog2.f32 %v5416_v14  ;;  %v870_v27 = vadd.f32 %v5339_v43, %v6239_v52  ;;  %v1495_v20 = vmul.f32 %v2930_v35, %v5422_v36  ;;  %v5442_v57 = vpop.xlane.xlu0 %2350  ;;  %6247 = vst [vmem:[#allocation54_spill] sm:$0xff] %v5444_v39 }
 0x294   : > { %v5435_v58 = vmul.f32 %v3287_v63, %v1304_v56  ;;  %3304 = vrcp.f32 %v5412_v46  ;;  %v5440_v8 = vadd.f32 %v709_v19, %v5350_v41  ;;  %6246 = vst [vmem:[#allocation53_spill] sm:$0xff] %v5442_v57  ;;  %v5446_v33 = vmul.f32 %v1175_v60, %v983_v55 }
 0x295   : > { %v3293_v15 = vpop.eup %3292  ;;  %v5450_v21 = vmul.f32 %v5428_v59, %v5428_v59  ;;  %3306 = vrcp.f32 %v5416_v14  ;;  %v5454_v43 = vadd.f32 %v710_v47, %v5355_v31  ;;  %v5456_v63 = vmul.f32 %v1176_v51, %v984_v4 }
 0x296   : > { %v3295_v56 = vpop.eup %3294  ;;  %v5460_v41 = vmul.f32 %v5435_v58, %v5435_v58  ;;  %v1285_v19 = vmul.f32 %v3293_v15, %v5365_v28  ;;  %v5463_v60 = vmul.f32 %v869_v49, %v805_v38  ;;  %v1879_v35 = vmul.f32 0.5, %v5428_v59  ;;  %v5475_v49 = vpop.xlane.xlu1 %2383 }
 0x297   : > { %v3297_v55 = vpop.eup %3296  ;;  %v1943_v34 = vmul.f32 0.003968254, %v5450_v21  ;;  %v1286_v11 = vmul.f32 %v3295_v56, %v5368_v44  ;;  %v1496_v31 = vmul.f32 %v2931_v26, %v5430_v62  ;;  %v1527_v54 = vsub.f32 %v1495_v20, %v5245_v2  ;;  %v5473_v57 = vpop.xlane.xlu0 %2380  ;;  %6249 = vst [vmem:[#allocation56_spill] sm:$0xff] %v5475_v49 }
 0x298   : > { %v3299_v47 = vpop.eup %3298  ;;  %v1944_v51 = vmul.f32 0.003968254, %v5460_v41  ;;  %v1317_v4 = vsub.f32 2.0, %v1285_v19  ;;  %v5470_v39 = vmul.f32 0.6931472, %v3297_v55  ;;  %6248 = vst [vmem:[#allocation55_spill] sm:$0xff] %v5473_v57  ;;  %3308 = vlog2.f32 %v5303_v16 }
 0x299   : > { %v1880_v38 = vmul.f32 0.5, %v5435_v58  ;;  %v1975_v6 = vsub.f32 0.008333334, %v1943_v34  ;;  %v1318_v0 = vsub.f32 2.0, %v1286_v11  ;;  %v5481_v25 = vmul.f32 0.6931472, %v3299_v47 }
 0x29a   : > { %v1976_v24 = vsub.f32 0.008333334, %v1944_v51  ;;  %v5479_v26 = vmul.f32 %v3293_v15, %v1317_v4  ;;  %3310 = vlog2.f32 %v5308_v22  ;;  %v1509_v20 = vmul.f32 %v2944_v37, %v5470_v39 }
 0x29b   : > { %v2007_v19 = vmul.f32 %v1975_v6, %v5450_v21  ;;  %v5485_v2 = vmul.f32 %v3295_v56, %v1318_v0  ;;  %v1528_v55 = vsub.f32 %v1496_v31, %v5254_v50  ;;  %v3301_v49 = vpop.eup %3300  ;;  %v1911_v34 = vsub.f32 %v5422_v36, %v1879_v35  ;;  %v5497_v22 = vpop.xlane.xlu0 %2404 }
 0x29c   : > { %v2008_v16 = vmul.f32 %v1976_v24, %v5460_v41  ;;  %v5493_v15 = vmul.f32 %v5479_v26, %v5479_v26  ;;  %v5495_v11 = vadd.f32 0.9189385, %v1527_v54  ;;  %6250 = vst [vmem:[#allocation57_spill] sm:$0xff] %v5497_v22  ;;  %v5499_v6 = vpop.xlane.xlu1 %2407  ;;  %v1912_v37 = vsub.f32 %v5430_v62, %v1880_v38 }
 0x29d   : > { %6251 = vst [vmem:[#allocation58_spill] sm:$0xff] %v5499_v6  ;;  %v3303_v0 = vpop.eup %3302  ;;  %v2039_v56 = vsub.f32 0.083333336, %v2007_v19  ;;  %v5504_v50 = vmul.f32 %v5485_v2, %v5485_v2  ;;  %v1591_v24 = vmul.f32 0.0005952381, %v5450_v21  ;;  %v1510_v54 = vmul.f32 %v5407_v40, %v5481_v25 }
 0x29e   : > { %v5507_v36 = vpop.eup %3304  ;;  %v2040_v35 = vsub.f32 0.083333336, %v2008_v16  ;;  %v1605_v31 = vmul.f32 0.0005952381, %v5493_v15  ;;  %v5513_v47 = vmul.f32 %v870_v27, %v5388_v3  ;;  %v5518_v4 = vmul.f32 0.6931472, %v3301_v49 }
 0x29f   : > { %v5515_v51 = vpop.eup %3306  ;;  %v2071_v62 = vmul.f32 %v2039_v56, %v5450_v21  ;;  %v1541_v38 = vsub.f32 %v1509_v20, %v5365_v28  ;;  %v1606_v19 = vmul.f32 0.0005952381, %v5504_v50  ;;  %v5523_v6 = vmul.f32 0.6931472, %v3303_v0  ;;  %v5526_v57 = vpop.xlane.xlu0 %2332 }
 0x2a0   : > { %v2072_v16 = vmul.f32 %v2040_v35, %v5460_v41  ;;  %v1637_v40 = vsub.f32 0.0007936508, %v1605_v31  ;;  %v1592_v22 = vmul.f32 0.0005952381, %v5460_v41  ;;  %6252 = vst [vmem:[#allocation59_spill] sm:$0xff] %v5526_v57  ;;  %v5528_v3 = vpop.xlane.xlu1 %2335  ;;  %v1542_v28 = vsub.f32 %v1510_v54, %v5368_v44 }
 0x2a1   : > { %6253 = vst [vmem:[#allocation60_spill] sm:$0xff] %v5528_v3  ;;  %v2103_v27 = vsub.f32 %v1911_v34, %v2071_v62  ;;  %v1638_v7 = vsub.f32 0.0007936508, %v1606_v19  ;;  %v1560_v56 = vadd.f32 0.9189385, %v1528_v55  ;;  %v965_v44 = vmul.f32 %v5440_v8, %v5378_v17 }
 0x2a2   : > { %v1623_v49 = vsub.f32 0.0007936508, %v1591_v24  ;;  %v2104_v32 = vsub.f32 %v1912_v37, %v2072_v16  ;;  %v1669_v20 = vmul.f32 %v1637_v40, %v5493_v15  ;;  %v1624_v12 = vsub.f32 0.0007936508, %v1592_v22  ;;  %v3309_v35 = vpop.eup %3308 }
 0x2a3   : > { %v2135_v0 = vsub.f32 %v2103_v27, %v5446_v33  ;;  %v1573_v31 = vadd.f32 0.9189385, %v1541_v38  ;;  %v1670_v1 = vmul.f32 %v1638_v7, %v5504_v50  ;;  %v5539_v37 = vpop.xlane.xlu0 %2356  ;;  %v1125_v7 = vmul.f32 %v5507_v36, %v5412_v46 }
 0x2a4   : > { %v1655_v57 = vmul.f32 %v1623_v49, %v5450_v21  ;;  %v3311_v30 = vpop.eup %3310  ;;  %v2136_v34 = vsub.f32 %v2104_v32, %v5456_v63  ;;  %v1701_v62 = vadd.f32 -0.0027777778, %v1669_v20  ;;  %v1656_v55 = vmul.f32 %v1624_v12, %v5460_v41  ;;  %6254 = vst [vmem:[#allocation61_spill] sm:$0xff] %v5539_v37  ;;  %v5541_v22 = vpop.xlane.xlu1 %2359 }
 0x2a5   : > { %6255 = vst [vmem:[#allocation62_spill] sm:$0xff] %v5541_v22  ;;  %v2199_v33 = vmul.f32 %v5396_v13, %v2135_v0  ;;  %v1702_v24 = vadd.f32 -0.0027777778, %v1670_v1  ;;  %v1126_v12 = vmul.f32 %v5515_v51, %v5416_v14  ;;  %v1574_v8 = vadd.f32 0.9189385, %v1542_v28 }
 0x2a6   : > { %v1687_v54 = vadd.f32 -0.0027777778, %v1655_v57  ;;  %v2200_v38 = vmul.f32 %v5401_v45, %v2136_v34  ;;  %v1733_v32 = vmul.f32 %v1701_v62, %v5493_v15  ;;  %v1688_v63 = vadd.f32 -0.0027777778, %v1656_v55 }
 0x2a7   : > { %v2712_v17 = vadd.f32 %v5342_v53, %v2199_v33  ;;  %v1734_v19 = vmul.f32 %v1702_v24, %v5504_v50  ;;  %v5555_v45 = vpop.xlane.xlu0 %2386  ;;  %v966_v53 = vmul.f32 %v5454_v43, %v5382_v48  ;;  %v1157_v14 = vsub.f32 2.0, %v1125_v7 }
 0x2a8   : > { %v1719_v13 = vmul.f32 %v1687_v54, %v5450_v21  ;;  %v2518_v1 = vadd.f32 %v2200_v38, %v2199_v33  ;;  %v2733_v57 = vadd.f32 %v5346_v18, %v2200_v38  ;;  %v1765_v16 = vadd.f32 0.083333336, %v1733_v32  ;;  %v5557_v40 = vpop.xlane.xlu1 %2389 }
 0x2a9   : > { %v1720_v46 = vmul.f32 %v1688_v63, %v5460_v41  ;;  %v1766_v27 = vadd.f32 0.083333336, %v1734_v19  ;;  %v2713_v28 = vadd.f32 %v2712_v17, %v4143_v61  ;;  %v1158_v18 = vsub.f32 2.0, %v1126_v12  ;;  %v6258_v19 = vld [vmem:[#allocation9_spill] sm:$0xff] }
 0x2aa   : > { %v1751_v49 = vadd.f32 0.083333336, %v1719_v13  ;;  %2519 = vadd.xlane.f32.xlu1 %v2518_v1  ;;  %v1797_v21 = vmul.f32 %v1765_v16, %v5479_v26  ;;  %v2734_v0 = vadd.f32 %v2733_v57, %v4162_v23  ;;  %v1030_v34 = vmul.f32 0.6931472, %v3309_v35  ;;  %v6259_v13 = vld [vmem:[#allocation11_spill] sm:$0xff]  ;;  %v6260_v57 = vld [vmem:[#allocation33_spill] sm:$0xff] }
 0x2ab   : > { %v1752_v20 = vadd.f32 0.083333336, %v1720_v46  ;;  %v1798_v41 = vmul.f32 %v1766_v27, %v5485_v2  ;;  %v1032_v33 = vmul.f32 0.6931472, %v3311_v30  ;;  %v997_v48 = vadd.f32 %v965_v44, %v5463_v60  ;;  %v5568_v43 = vpop.xlane.xlu0 %2410  ;;  %v6261_v27 = vld [vmem:[#allocation34_spill] sm:$0xff] }
 0x2ac   : > { %v1783_v62 = vmul.f32 %v1751_v49, %v5428_v59  ;;  %v1829_v55 = vadd.f32 %v1797_v21, %v1573_v31  ;;  %v5570_v61 = vpop.xlane.xlu1 %2413  ;;  %v998_v23 = vadd.f32 %v966_v53, %v5513_v47  ;;  %v1189_v38 = vmul.f32 %v5507_v36, %v1157_v14 }
 0x2ad   : > { %v1784_v24 = vmul.f32 %v1752_v20, %v5435_v58  ;;  %v1830_v54 = vadd.f32 %v1798_v41, %v1574_v8  ;;  %v2714_v35 = vadd.f32 %v2713_v28, %v4356_v9  ;;  %v1190_v58 = vmul.f32 %v5515_v51, %v1158_v18  ;;  %v6264_v18 = vld [vmem:[#allocation28_spill] sm:$0xff]  ;;  %v6265_v41 = vld [vmem:[#allocation30_spill] sm:$0xff] }
 0x2ae   : > { %v1815_v7 = vadd.f32 %v1783_v62, %v5495_v11  ;;  %v5577_v59 = vsub.f32 %v1829_v55, %v5518_v4  ;;  %v2735_v60 = vadd.f32 %v2734_v0, %v4359_v29  ;;  %v1957_v11 = vmul.f32 0.003968254, %v5493_v15 }
 0x2af   : > { %v1816_v30 = vadd.f32 %v1784_v24, %v1560_v56  ;;  %v5582_v31 = vsub.f32 %v1830_v54, %v5523_v6  ;;  %v1893_v47 = vmul.f32 0.5, %v5479_v26  ;;  %v1894_v36 = vmul.f32 0.5, %v5485_v2  ;;  %v5588_v4 = vpop.xlane.xlu0 %2338  ;;  %v6267_v54 = vld [vmem:[#allocation15_spill] sm:$0xff] }
 0x2b0   : > { %v1847_v44 = vsub.f32 %v1815_v7, %v1030_v34  ;;  %v1958_v9 = vmul.f32 0.003968254, %v5504_v50  ;;  %6256 = vst [vmem:[#allocation63_spill] sm:$0xff] %v5588_v4  ;;  %v5590_v56 = vpop.xlane.xlu1 %2341  ;;  %v1221_v51 = vmul.f32 %v1189_v38, %v997_v48  ;;  %v1989_v63 = vsub.f32 0.008333334, %v1957_v11  ;;  %v6268_v38 = vld [vmem:[#allocation7_spill] sm:$0xff] }
 0x2b1   : > { %v1848_v32 = vsub.f32 %v1816_v30, %v1032_v33  ;;  %6257 = vst [vmem:[#allocation64_spill] sm:$0xff] %v5590_v56  ;;  %v2474_v29 = vadd.f32 %v5582_v31, %v5577_v59  ;;  %v1222_v8 = vmul.f32 %v1190_v58, %v998_v23  ;;  %v2715_v2 = vadd.f32 %v2714_v35, %v6258_v19  ;;  %v6266_v33 = vld [vmem:[#allocation35_spill] sm:$0xff]  ;;  %v6271_v19 = vld [vmem:[#allocation13_spill] sm:$0xff] }
 0x2b2   : > { %v2650_v6 = vadd.f32 %v5371_v42, %v1847_v44  ;;  %v1990_v26 = vsub.f32 0.008333334, %v1958_v9  ;;  %v2736_v1 = vadd.f32 %v2735_v60, %v6259_v13  ;;  %v2021_v46 = vmul.f32 %v1989_v63, %v5493_v15  ;;  %v6269_v63 = vld [vmem:[#allocation18_spill] sm:$0xff] }
 0x2b3   : > { %v2453_v12 = vadd.f32 %v1848_v32, %v1847_v44  ;;  %v2671_v17 = vadd.f32 %v5374_v5, %v1848_v32  ;;  %2475 = vadd.xlane.f32.xlu0 %v2474_v29  ;;  %v1925_v42 = vsub.f32 %v5470_v39, %v1893_v47  ;;  %v1926_v53 = vsub.f32 %v5481_v25, %v1894_v36  ;;  %v5604_v14 = vpop.xlane.xlu0 %2362 }
 0x2b4   : > { %v2651_v16 = vadd.f32 %v2650_v6, %v6260_v57  ;;  %v2022_v5 = vmul.f32 %v1990_v26, %v5504_v50  ;;  %6262 = vst [vmem:[#allocation9_spill] sm:$0xff] %v5604_v14  ;;  %v5606_v28 = vpop.xlane.xlu1 %2365  ;;  %v2053_v21 = vsub.f32 0.083333336, %v2021_v46  ;;  %v2976_v20 = vadd.f32 -1.0, %v6238_v10 }
 0x2b5   : > { %v2672_v49 = vadd.f32 %v2671_v17, %v6261_v27  ;;  %2454 = vadd.xlane.f32.xlu1 %v2453_v12  ;;  %6263 = vst [vmem:[#allocation11_spill] sm:$0xff] %v5606_v28  ;;  %v5610_v0 = vadd.f32 1.0, %v6264_v18  ;;  %v5613_v34 = vadd.f32 1.0, %v6265_v41  ;;  %v2977_v39 = vadd.f32 -1.0, %v6239_v52  ;;  %v6270_v17 = vld [vmem:[#allocation17_spill] sm:$0xff]  ;;  %v6273_v27 = vld [vmem:[#allocation31_spill] sm:$0xff] }
 0x2b6   : > { %v2054_v62 = vsub.f32 0.083333336, %v2022_v5  ;;  %v5617_v25 = vadd.f32 2.0, %v6264_v18  ;;  %v5620_v55 = vadd.f32 2.0, %v6265_v41  ;;  %v2652_v24 = vadd.f32 %v2651_v16, %v6266_v33  ;;  %v6276_v5 = vld [vmem:[#allocation36_spill] sm:$0xff] }
 0x2b7   : > { %v2085_v48 = vmul.f32 %v2053_v21, %v5493_v15  ;;  %v2716_v7 = vadd.f32 %v2715_v2, %v6267_v54  ;;  %v5626_v23 = vadd.f32 3.0, %v6264_v18  ;;  %v2673_v35 = vadd.f32 %v2672_v49, %v6268_v38  ;;  %v5636_v44 = vpop.xlane.xlu0 %2498 }
 0x2b8   : > { %v2086_v30 = vmul.f32 %v2054_v62, %v5504_v50  ;;  %v5631_v58 = vadd.f32 3.0, %v6265_v41  ;;  %v5634_v60 = vadd.f32 4.0, %v6264_v18  ;;  %v5638_v11 = vpop.xlane.xlu1 %2501  ;;  %v5641_v32 = vadd.f32 4.0, %v6265_v41 }
 0x2b9   : > { %v2117_v15 = vsub.f32 %v1925_v42, %v2085_v48  ;;  %v5645_v47 = vmul.f32 %v5610_v0, %v6264_v18  ;;  %v5649_v50 = vmul.f32 %v5613_v34, %v6265_v41  ;;  %v5653_v9 = vmul.f32 %v5626_v23, %v5617_v25  ;;  %v6274_v42 = vld [vmem:[#allocation6_spill] sm:$0xff] }
 0x2ba   : > { %v2118_v36 = vsub.f32 %v1926_v53, %v2086_v30  ;;  %v5657_v29 = vmul.f32 %v5631_v58, %v5620_v55  ;;  %3312 = vrcp.f32 %v5634_v60  ;;  %v2717_v12 = vadd.f32 %v2716_v7, %v6269_v63  ;;  %v6275_v53 = vld [vmem:[#allocation32_spill] sm:$0xff]  ;;  %v6279_v7 = vld [vmem:[#allocation10_spill] sm:$0xff] }
 0x2bb   : > { %v2149_v6 = vsub.f32 %v2117_v15, %v1221_v51  ;;  %v2737_v26 = vadd.f32 %v2736_v1, %v6270_v17  ;;  %3314 = vrcp.f32 %v5641_v32  ;;  %v2653_v2 = vadd.f32 %v2652_v24, %v6271_v19  ;;  %v5669_v16 = vpop.xlane.xlu0 %2522  ;;  %v6272_v1 = vld [vmem:[#allocation5_spill] sm:$0xff]  ;;  %v6277_v24 = vld [vmem:[#allocation20_spill] sm:$0xff]  ;;  %v6281_v17 = vld [vmem:[#allocation14_spill] sm:$0xff] }
 0x2bc   : > { %v2150_v13 = vsub.f32 %v2118_v36, %v1222_v8  ;;  %v5666_v57 = vmul.f32 %v5653_v9, %v5645_v47  ;;  %3316 = vlog2.f32 %v5634_v60  ;;  %v5671_v46 = vpop.xlane.xlu1 %2525  ;;  %v2587_v49 = vadd.f32 %v6273_v27, %v6272_v1  ;;  %v6282_v19 = vld [vmem:[#allocation37_spill] sm:$0xff]  ;;  %v6283_v27 = vld [vmem:[#allocation38_spill] sm:$0xff] }
 0x2bd   : > { %v5673_v51 = vmul.f32 %v2976_v20, %v2149_v6  ;;  %3318 = vlog2.f32 %v5641_v32  ;;  %v2608_v8 = vadd.f32 %v6275_v53, %v6274_v42  ;;  %v2674_v21 = vadd.f32 %v2673_v35, %v6276_v5  ;;  %v6278_v20 = vld [vmem:[#allocation8_spill] sm:$0xff]  ;;  %v6284_v42 = vld [vmem:[#allocation23_spill] sm:$0xff] }
 0x2be   : > { %v5681_v62 = vmul.f32 %v2977_v39, %v2150_v13  ;;  %v5685_v33 = vmul.f32 %v5657_v29, %v5649_v50  ;;  %v2738_v48 = vadd.f32 %v2737_v26, %v6277_v24  ;;  %3320 = vlog2.f32 %v5666_v57  ;;  %v6280_v6 = vld [vmem:[#allocation12_spill] sm:$0xff] }
 0x2bf   : > { %v2588_v54 = vadd.f32 %v2587_v49, %v6278_v20  ;;  %v2609_v38 = vadd.f32 %v2608_v8, %v6279_v7  ;;  %v3337_v35 = vmov 1966171168   ;;  %v5694_v15 = vpop.xlane.xlu0 %2433  ;;  %v2654_v13 = vadd.f32 %v2653_v2, %v6282_v19  ;;  %v6285_v8 = vld [vmem:[#allocation25_spill] sm:$0xff]  ;;  %v6286_v24 = vld [vmem:[#allocation16_spill] sm:$0xff]  ;;  %v6287_v7 = vld [vmem:[#allocation19_spill] sm:$0xff] }
 0x2c0   : > { %v2539_v30 = vadd.f32 %v5681_v62, %v5673_v51  ;;  %3322 = vlog2.f32 %v5685_v33  ;;  %v2625_v39 = vunpack.c.l.s4 %v3337_v35  ;;  %v5696_v36 = vpop.xlane.xlu1 %2436  ;;  %v2675_v49 = vadd.f32 %v2674_v21, %v6283_v27 }
 0x2c1   : > { %3324 = vrcp.f32 %v5666_v57  ;;  %v2589_v63 = vadd.f32 %v2588_v54, %v6280_v6  ;;  %v2610_v26 = vadd.f32 %v2609_v38, %v6281_v17  ;;  %v5705_v53 = vadd.f32 %v2717_v12, %v6284_v42 }
 0x2c2   : > { %2540 = vadd.xlane.f32.xlu0 %v2539_v30  ;;  %3326 = vrcp.f32 %v5685_v33  ;;  %v2626_v1 = vunpack.c.0.s8 %v2625_v39  ;;  %v5708_v5 = vadd.f32 %v2738_v48, %v6285_v8  ;;  %v2946_v38 = vadd.f32 -0.5, %v5634_v60  ;;  %v6288_v30 = vld [vmem:[#allocation39_spill] sm:$0xff] }
 0x2c3   : > { %v2590_v20 = vadd.f32 %v2589_v63, %v6286_v24  ;;  %v2611_v54 = vadd.f32 %v2610_v26, %v6287_v7  ;;  %v2947_v2 = vadd.f32 -0.5, %v5641_v32  ;;  %v2655_v6 = vadd.f32 %v2654_v13, %v6288_v30  ;;  %v5717_v39 = vpop.xlane.xlu0 %2457  ;;  %v6289_v63 = vld [vmem:[#allocation21_spill] sm:$0xff]  ;;  %v6290_v26 = vld [vmem:[#allocation22_spill] sm:$0xff]  ;;  %v6291_v24 = vld [vmem:[#allocation4_spill] sm:$0xff] }
 0x2c4   : > { %v3313_v35 = vpop.eup %3312  ;;  %v871_v21 = vadd.f32 %v5610_v0, %v6264_v18  ;;  %v5719_v12 = vpop.xlane.xlu1 %2460  ;;  %v872_v42 = vadd.f32 %v5613_v34, %v6265_v41  ;;  %v5728_v7 = vsub.s32 %v2626_v1, %v6291_v24  ;;  %v6292_v0 = vld [vmem:[#allocation40_spill] sm:$0xff]  ;;  %v903_v28 = vadd.f32 %v5626_v23, %v5617_v25 }
 0x2c5   : > { %v3315_v48 = vpop.eup %3314  ;;  %v1287_v17 = vmul.f32 %v3313_v35, %v5634_v60  ;;  %v2591_v19 = vadd.f32 %v2590_v20, %v6289_v63  ;;  %v2612_v27 = vadd.f32 %v2611_v54, %v6290_v26  ;;  %v2676_v30 = vadd.f32 %v2675_v49, %v6292_v0  ;;  %v6293_v26 = vld [vmem:[#allocation27_spill] sm:$0xff] }
 0x2c6   : > { %v3317_v8 = vpop.eup %3316  ;;  %v1288_v13 = vmul.f32 %v3315_v48, %v5641_v32  ;;  %v2656_v22 = vadd.f32 %v2655_v6, %v6293_v26  ;;  %v904_v1 = vadd.f32 %v5631_v58, %v5620_v55  ;;  %v6294_v58 = vld [vmem:[#allocation29_spill] sm:$0xff]  ;;  %vm2415_vm2 = vcmask 7168  }
 0x2c7   : > { %v3319_v14 = vpop.eup %3318  ;;  %v1319_v56 = vsub.f32 2.0, %v1287_v17  ;;  %v5733_v4 = vmul.f32 0.6931472, %v3317_v8  ;;  %v2592_v20 = vadd.f32 %v2591_v19, %v6238_v10  ;;  %v2613_v54 = vadd.f32 %v2612_v27, %v6239_v52  ;;  %v5742_v49 = vpop.xlane.xlu0 %2504  ;;  %2422 = vst.msk [vmem:[%s5824_s19 + $0x30] sm:$0xff] %vm2415_vm2, %v5555_v45  ;;  %2430 = vst.msk [vmem:[%s5824_s19 + $0x70] sm:$0xff] %vm2415_vm2, %v5568_v43 }
 0x2c8   : > { %v1320_v34 = vsub.f32 2.0, %v1288_v13  ;;  %v5737_v63 = vmul.f32 0.6931472, %v3319_v14  ;;  %v5744_v24 = vpop.xlane.xlu1 %2507  ;;  %v3321_v25 = vpop.eup %3320  ;;  %v935_v52 = vmul.f32 %v871_v21, %v5653_v9  ;;  %v5756_v27 = vadd.f32 %v2676_v30, %v6294_v58  ;;  %2423 = vst.msk [vmem:[%s5824_s19 + $0x38] sm:$0xff] %vm2415_vm2, %v5557_v40  ;;  %2431 = vst.msk [vmem:[%s5824_s19 + $0x78] sm:$0xff] %vm2415_vm2, %v5570_v61 }
 0x2c9   : > { %v5746_v23 = vmul.f32 %v3313_v35, %v1319_v56  ;;  %v1511_v17 = vmul.f32 %v2946_v38, %v5733_v4  ;;  %v2593_v10 = vadd.f32 %v2592_v20, %v6264_v18  ;;  %v2614_v55 = vadd.f32 %v2613_v54, %v6265_v41 }
 0x2ca   : > { %v3323_v14 = vpop.eup %3322  ;;  %v5751_v19 = vmul.f32 %v3315_v48, %v1320_v34  ;;  %v1512_v6 = vmul.f32 %v2947_v2, %v5737_v63  ;;  %v936_v38 = vmul.f32 %v872_v42, %v5657_v29  ;;  %v967_v9 = vmul.f32 %v903_v28, %v5645_v47 }
 0x2cb   : > { %v3325_v8 = vpop.eup %3324  ;;  %v5760_v56 = vmul.f32 %v5746_v23, %v5746_v23  ;;  %v2594_v35 = vrot.slane %v2593_v10, 4  ;;  %v1543_v48 = vsub.f32 %v1511_v17, %v5634_v60  ;;  %v2615_v13 = vrot.slane %v2614_v55, 4  ;;  %v5772_v30 = vpop.xlane.xlu0 %2528 }
 0x2cc   : > { %v3327_v21 = vpop.eup %3326  ;;  %v5766_v2 = vmul.f32 %v5751_v19, %v5751_v19  ;;  %v5770_v0 = vadd.f32 %v2656_v22, %v5577_v59  ;;  %v5774_v20 = vpop.xlane.xlu1 %2531  ;;  %v5776_v54 = vmul.f32 0.6931472, %v3321_v25  ;;  %v968_v47 = vmul.f32 %v904_v1, %v5649_v50 }
 0x2cd   : > { %v1607_v29 = vmul.f32 0.0005952381, %v5760_v56  ;;  %v2595_v28 = vadd.f32 %v2594_v35, %v2593_v10  ;;  %v1544_v42 = vsub.f32 %v1512_v6, %v5641_v32  ;;  %v2616_v34 = vadd.f32 %v2615_v13, %v2614_v55 }
 0x2ce   : > { %v1608_v60 = vmul.f32 0.0005952381, %v5766_v2  ;;  %v1127_v22 = vmul.f32 %v3325_v8, %v5666_v57  ;;  %v5784_v59 = vmul.f32 0.6931472, %v3323_v14  ;;  %v1128_v17 = vmul.f32 %v3327_v21, %v5685_v33 }
 0x2cf   : > { %v1639_v26 = vsub.f32 0.0007936508, %v1607_v29  ;;  %v2596_v25 = vrot.slane %v2595_v28, 2  ;;  %v5787_v58 = vadd.f32 0.9189385, %v1543_v48  ;;  %v2617_v50 = vrot.slane %v2616_v34, 2  ;;  %v5791_v32 = vpop.xlane.xlu0 %2439 }
 0x2d0   : > { %v1640_v10 = vsub.f32 0.0007936508, %v1608_v60  ;;  %v5789_v1 = vadd.f32 %v967_v9, %v935_v52  ;;  %v5793_v6 = vpop.xlane.xlu1 %2442  ;;  %v5796_v57 = vadd.f32 %v968_v47, %v936_v38  ;;  %v5799_v14 = vmul.f32 0.5, %v5746_v23 }
 0x2d1   : > { %v1671_v55 = vmul.f32 %v1639_v26, %v5760_v56  ;;  %v2597_v35 = vadd.f32 %v2596_v25, %v2595_v28  ;;  %v5806_v33 = vadd.f32 0.9189385, %v1544_v42  ;;  %v2618_v9 = vadd.f32 %v2617_v50, %v2616_v34 }
 0x2d2   : > { %v1672_v52 = vmul.f32 %v1640_v10, %v5766_v2  ;;  %v1159_v48 = vsub.f32 2.0, %v1127_v22  ;;  %v6295_v60 = vlaneseq  ;;  %v1160_v38 = vsub.f32 2.0, %v1128_v17 }
 0x2d3   : > { %v1703_v13 = vadd.f32 -0.0027777778, %v1671_v55  ;;  %v2598_v29 = vrot.slane %v2597_v35, 1  ;;  %v1959_v47 = vmul.f32 0.003968254, %v5760_v56  ;;  %v2619_v25 = vrot.slane %v2618_v9, 1  ;;  %v2464_v34 = vpop.xlane.xlu0 %2463 }
 0x2d4   : > { %vm5810_vm1 = vcmp.lt.s32.totalorder %v6295_v60, 256  ;;  %v1704_v26 = vadd.f32 -0.0027777778, %v1672_v52  ;;  %v5816_v3 = vmul.f32 0.5, %v5751_v19  ;;  %v1960_v42 = vmul.f32 0.003968254, %v5766_v2  ;;  %v2467_v41 = vpop.xlane.xlu1 %2466 }
 0x2d5   : > { %v1735_v22 = vmul.f32 %v1703_v13, %v5760_v56  ;;  %v2599_v17 = vadd.f32 %v2598_v29, %v2597_v35  ;;  %v1927_v10 = vsub.f32 %v5733_v4, %v5799_v14  ;;  %v1991_v50 = vsub.f32 0.008333334, %v1959_v47  ;;  %v6298_v47 = vld [vmem:[#allocation41_spill] sm:$0xff] }
 0x2d6   : > { %v1736_v55 = vmul.f32 %v1704_v26, %v5766_v2  ;;  %v2620_v52 = vadd.f32 %v2619_v25, %v2618_v9  ;;  %v1191_v60 = vmul.f32 %v3325_v8, %v1159_v48  ;;  %v1992_v37 = vsub.f32 0.008333334, %v1960_v42  ;;  %2416 = vst.msk [vmem:[%s5824_s19] sm:$0xff] %vm2415_vm2, %v6298_v47  ;;  %v6301_v26 = vld [vmem:[#allocation44_spill] sm:$0xff]  ;;  %v6302_v25 = vld [vmem:[#allocation49_spill] sm:$0xff]  ;;  %v6303_v42 = vld [vmem:[#allocation26_spill] sm:$0xff] }
 0x2d7   : > { %v1767_v13 = vadd.f32 0.083333336, %v1735_v22  ;;  %v5830_v35 = vmul.f32 %v3327_v21, %v1160_v38  ;;  %v2023_v29 = vmul.f32 %v1991_v50, %v5760_v56  ;;  %v6299_v21 = vld [vmem:[#allocation43_spill] sm:$0xff]  ;;  %v6300_v38 = vld [vmem:[#allocation42_spill] sm:$0xff]  ;;  %2425 = vst.msk [vmem:[%s5824_s19 + $0x48] sm:$0xff] %vm2415_vm2, %v6301_v26  ;;  %2418 = vst.msk [vmem:[%s5824_s19 + $0x10] sm:$0xff] %vm2415_vm2, %v6302_v25  ;;  %v5883_v47 = vpop.xlane.xlu0 %2510  ;;  %v1928_v43 = vsub.f32 %v5737_v63, %v5816_v3 }
 0x2d8   : > { %v1768_v9 = vadd.f32 0.083333336, %v1736_v55  ;;  %v2623_v8 = vcombine.low %v2599_v17, %v2620_v52  ;;  %v2024_v48 = vmul.f32 %v1992_v37, %v5766_v2  ;;  %2424 = vst.msk [vmem:[%s5824_s19 + $0x40] sm:$0xff] %vm2415_vm2, %v6299_v21  ;;  %2417 = vst.msk [vmem:[%s5824_s19 + $0x8] sm:$0xff] %vm2415_vm2, %v6300_v38  ;;  %v6304_v37 = vld [vmem:[#allocation51_spill] sm:$0xff]  ;;  %v6305_v22 = vld [vmem:[#allocation50_spill] sm:$0xff] }
 0x2d9   : > { %2419 = vst.msk [vmem:[%s5824_s19 + $0x18] sm:$0xff] %vm2415_vm2, %v6303_v42  ;;  %2426 = vst.msk [vmem:[%s5824_s19 + $0x50] sm:$0xff] %vm2415_vm2, %v6304_v37  ;;  %v6306_v17 = vld [vmem:[#allocation55_spill] sm:$0xff]  ;;  %v6307_v50 = vld [vmem:[#allocation57_spill] sm:$0xff]  ;;  %vm2480_vm3 = vcmask 15368   ;;  %v1799_v21 = vmul.f32 %v1767_v13, %v5746_v23  ;;  %vm2545_vm4 = vcmask 23568   ;;  %v1224_v23 = vmul.f32 %v5830_v35, %v5796_v57 }
 0x2da   : > { %2427 = vst.msk [vmem:[%s5824_s19 + $0x58] sm:$0xff] %vm2415_vm2, %v6305_v22  ;;  %2420 = vst.msk [vmem:[%s5824_s19 + $0x20] sm:$0xff] %vm2415_vm2, %v6306_v17  ;;  %v6308_v55 = vld [vmem:[#allocation56_spill] sm:$0xff]  ;;  %v6309_v52 = vld [vmem:[#allocation58_spill] sm:$0xff]  ;;  %v2055_v38 = vsub.f32 0.083333336, %v2023_v29  ;;  %v1800_v45 = vmul.f32 %v1768_v9, %v5751_v19  ;;  %v2630_v40 = vrot.slane %v2623_v8, %v5728_v7 }
 0x2db   : > { %2428 = vst.msk [vmem:[%s5824_s19 + $0x60] sm:$0xff] %vm2415_vm2, %v6307_v50  ;;  %2421 = vst.msk [vmem:[%s5824_s19 + $0x28] sm:$0xff] %vm2415_vm2, %v6308_v55  ;;  %vm2562_vm5 = vcmask 31768   ;;  %v2056_v61 = vsub.f32 0.083333336, %v2024_v48  ;;  %v1831_v3 = vadd.f32 %v1799_v21, %v5787_v58  ;;  %v6317_v63 = vld [vmem:[#allocation54_spill] sm:$0xff] }
 0x2dc   : > { %2429 = vst.msk [vmem:[%s5824_s19 + $0x68] sm:$0xff] %vm2415_vm2, %v6309_v52  ;;  %v2978_v4 = vadd.f32 -1.0, %v6264_v18  ;;  %v6319_v18 = vld [vmem:[#allocation59_spill] sm:$0xff]  ;;  %v6320_v55 = vld [vmem:[#allocation61_spill] sm:$0xff] }
 0x2dd   : > { %2481 = vst.msk [vmem:[%s5824_s19] sm:$0xff] %vm2480_vm3, %v5694_v15  ;;  %2489 = vst.msk [vmem:[%s5824_s19 + $0x40] sm:$0xff] %vm2480_vm3, %v5717_v39  ;;  %v6312_v15 = vld [vmem:[#allocation24_spill] sm:$0xff]  ;;  %v2088_v19 = vmul.f32 %v2056_v61, %v5766_v2  ;;  %v2740_v2 = vadd.f32 %v5708_v5, %v5681_v62 }
 0x2de   : > { %2482 = vst.msk [vmem:[%s5824_s19 + $0x8] sm:$0xff] %vm2480_vm3, %v5696_v36  ;;  %2490 = vst.msk [vmem:[%s5824_s19 + $0x48] sm:$0xff] %vm2480_vm3, %v5719_v12  ;;  %v6313_v36 = vld [vmem:[#allocation46_spill] sm:$0xff]  ;;  %v6314_v39 = vld [vmem:[#allocation48_spill] sm:$0xff] }
 0x2df   : > { %2483 = vst.msk [vmem:[%s5824_s19 + $0x10] sm:$0xff] %vm2480_vm3, %v5791_v32  ;;  %2491 = vst.msk [vmem:[%s5824_s19 + $0x50] sm:$0xff] %vm2480_vm3, %v2464_v34  ;;  %v6316_v12 = vld [vmem:[#allocation52_spill] sm:$0xff] }
 0x2e0   : > { %2484 = vst.msk [vmem:[%s5824_s19 + $0x18] sm:$0xff] %vm2480_vm3, %v5793_v6  ;;  %2492 = vst.msk [vmem:[%s5824_s19 + $0x58] sm:$0xff] %vm2480_vm3, %v2467_v41  ;;  %v2678_v41 = vadd.f32 %v5756_v27, %v5582_v31  ;;  %v6315_v31 = vld [vmem:[#allocation53_spill] sm:$0xff]  ;;  %v2535_v27 = vpop.xlane.xlu0 %2534 }
 0x2e1   : > { %2546 = vst.msk [vmem:[%s5824_s19] sm:$0xff] %vm2545_vm4, %v5636_v44  ;;  %2554 = vst.msk [vmem:[%s5824_s19 + $0x40] sm:$0xff] %vm2545_vm4, %v5669_v16  ;;  %v1223_v44 = vmul.f32 %v1191_v60, %v5789_v1  ;;  %v6310_v16 = vld [vmem:[#allocation45_spill] sm:$0xff]  ;;  %v2120_v1 = vsub.f32 %v1928_v43, %v2088_v19 }
 0x2e2   : > { %2547 = vst.msk [vmem:[%s5824_s19 + $0x8] sm:$0xff] %vm2545_vm4, %v5638_v11  ;;  %2555 = vst.msk [vmem:[%s5824_s19 + $0x48] sm:$0xff] %vm2545_vm4, %v5671_v46  ;;  %v2087_v11 = vmul.f32 %v2055_v38, %v5760_v56  ;;  %v6311_v46 = vld [vmem:[#allocation47_spill] sm:$0xff]  ;;  %v1863_v56 = vsub.f32 %v1831_v3, %v5776_v54 }
 0x2e3   : > { %2548 = vst.msk [vmem:[%s5824_s19 + $0x10] sm:$0xff] %vm2545_vm4, %v5742_v49  ;;  %2556 = vst.msk [vmem:[%s5824_s19 + $0x50] sm:$0xff] %vm2545_vm4, %v5772_v30  ;;  %v1832_v49 = vadd.f32 %v1800_v45, %v5806_v33  ;;  %v2152_v14 = vsub.f32 %v2120_v1, %v1224_v23  ;;  %v6323_v23 = vld [vmem:[#allocation63_spill] sm:$0xff] }
 0x2e4   : > { %2549 = vst.msk [vmem:[%s5824_s19 + $0x18] sm:$0xff] %vm2545_vm4, %v5744_v24  ;;  %2557 = vst.msk [vmem:[%s5824_s19 + $0x58] sm:$0xff] %vm2545_vm4, %v5774_v20  ;;  %v2637_v24 = vrot.slane %v2630_v40, %v5728_v7  ;;  %v2119_v30 = vsub.f32 %v1927_v10, %v2087_v11  ;;  %v2719_v20 = vadd.f32 %v5705_v53, %v5673_v51  ;;  %v6318_v51 = vld [vmem:[#allocation30_spill] sm:$0xff] }
 0x2e5   : > { %2563 = vst.msk [vmem:[%s5824_s19] sm:$0xff] %vm2562_vm5, %v6310_v16  ;;  %2571 = vst.msk [vmem:[%s5824_s19 + $0x40] sm:$0xff] %vm2562_vm5, %v6311_v46  ;;  %v1864_v58 = vsub.f32 %v1832_v49, %v5784_v59  ;;  %v2658_v54 = vadd.f32 %v5770_v0, %v1863_v56  ;;  %v2979_v53 = vadd.f32 -1.0, %v6318_v51  ;;  %v2446_v59 = vpop.xlane.xlu0 %2445 }
 0x2e6   : > { %2564 = vst.msk [vmem:[%s5824_s19 + $0x8] sm:$0xff] %vm2562_vm5, %v6312_v15  ;;  %2572 = vst.msk [vmem:[%s5824_s19 + $0x48] sm:$0xff] %vm2562_vm5, %v6313_v36  ;;  %v2151_v32 = vsub.f32 %v2119_v30, %v1223_v44  ;;  %v6324_v30 = vld [vmem:[#allocation64_spill] sm:$0xff] }
 0x2e7   : > { %2565 = vst.msk [vmem:[%s5824_s19 + $0x10] sm:$0xff] %vm2562_vm5, %v6314_v39  ;;  %2573 = vst.msk [vmem:[%s5824_s19 + $0x50] sm:$0xff] %vm2562_vm5, %v6315_v31  ;;  %v2477_v6 = vadd.f32 %v1864_v58, %v1863_v56  ;;  %v2679_v57 = vadd.f32 %v2678_v41, %v1864_v58  ;;  %v2659_v33 = vrot.slane %v2658_v54, 4  ;;  %v2216_v60 = vmul.f32 %v2979_v53, %v2152_v14  ;;  %v2514_v41 = vpop.xlane.xlu1 %2513  ;;  %v6325_v58 = vld [vmem:[#allocation9_spill] sm:$0xff] }
 0x2e8   : > { %2566 = vst.msk [vmem:[%s5824_s19 + $0x18] sm:$0xff] %vm2562_vm5, %v6316_v12  ;;  %2574 = vst.msk [vmem:[%s5824_s19 + $0x58] sm:$0xff] %vm2562_vm5, %v6317_v63  ;;  %v2215_v34 = vmul.f32 %v2978_v4, %v2151_v32  ;;  %v6321_v63 = vld [vmem:[#allocation60_spill] sm:$0xff] }
 0x2e9   : > { %2643 = vst.msk [vmem:[%s5941_s22] ss:$4 sm:$0x3] %vm5810_vm1, %v2637_v24  ;;  %v2680_v10 = vrot.slane %v2679_v57, 4  ;;  %2478 = vadd.xlane.f32.xlu1 %v2477_v6  ;;  %v2660_v62 = vadd.f32 %v2659_v33, %v2658_v54  ;;  %v2741_v35 = vadd.f32 %v2740_v2, %v2216_v60  ;;  %v2470_v26 = vpop.xlane.xlu0 %2469  ;;  %v6326_v54 = vld [vmem:[#allocation11_spill] sm:$0xff] }
 0x2ea   : > { %2485 = vst.msk [vmem:[%s5824_s19 + $0x20] sm:$0xff] %vm2480_vm3, %v2446_v59  ;;  %v2720_v5 = vadd.f32 %v2719_v20, %v2215_v34  ;;  %v2542_v13 = vadd.f32 %v2216_v60, %v2215_v34  ;;  %2493 = vst.msk [vmem:[%s5824_s19 + $0x60] sm:$0xff] %vm2480_vm3, %v2470_v26 }
 0x2eb   : > { %2550 = vst.msk [vmem:[%s5824_s19 + $0x20] sm:$0xff] %vm2545_vm4, %v5883_v47  ;;  %v2681_v0 = vadd.f32 %v2680_v10, %v2679_v57  ;;  %v2661_v29 = vrot.slane %v2660_v62, 2  ;;  %v2742_v48 = vrot.slane %v2741_v35, 4  ;;  %2558 = vst.msk [vmem:[%s5824_s19 + $0x60] sm:$0xff] %vm2545_vm4, %v2535_v27 }
 0x2ec   : > { %2567 = vst.msk [vmem:[%s5824_s19 + $0x20] sm:$0xff] %vm2562_vm5, %v6319_v18  ;;  %v2721_v9 = vrot.slane %v2720_v5, 4  ;;  %2575 = vst.msk [vmem:[%s5824_s19 + $0x60] sm:$0xff] %vm2562_vm5, %v6320_v55 }
 0x2ed   : > { %v2682_v8 = vrot.slane %v2681_v0, 2  ;;  %2543 = vadd.xlane.f32.xlu1 %v2542_v13  ;;  %v2662_v25 = vadd.f32 %v2661_v29, %v2660_v62  ;;  %v2743_v22 = vadd.f32 %v2742_v48, %v2741_v35 }
 0x2ee   : > { %v2722_v42 = vadd.f32 %v2721_v9, %v2720_v5 }
 0x2ef   : > { %v2683_v37 = vadd.f32 %v2682_v8, %v2681_v0  ;;  %v2663_v17 = vrot.slane %v2662_v25, 1  ;;  %v2744_v47 = vrot.slane %v2743_v22, 2 }
 0x2f0   : > { %v2723_v50 = vrot.slane %v2722_v42, 2 }
 0x2f1   : > { %v2684_v52 = vrot.slane %v2683_v37, 1  ;;  %v2664_v21 = vadd.f32 %v2663_v17, %v2662_v25  ;;  %v2745_v40 = vadd.f32 %v2744_v47, %v2743_v22 }
 0x2f2   : > { %v2724_v38 = vadd.f32 %v2723_v50, %v2722_v42 }
 0x2f3   : > { %v2685_v45 = vadd.f32 %v2684_v52, %v2683_v37  ;;  %v2746_v3 = vrot.slane %v2745_v40, 1 }
 0x2f4   : > { %v2725_v43 = vrot.slane %v2724_v38, 1 }
 0x2f5   : > { %v2688_v61 = vcombine.low %v2664_v21, %v2685_v45  ;;  %v2747_v16 = vadd.f32 %v2746_v3, %v2745_v40  ;;  %v2538_v39 = vpop.xlane.xlu1 %2537 }
 0x2f6   : > { %v2726_v44 = vadd.f32 %v2725_v43, %v2724_v38 }
 0x2f7   : > { %v2695_v11 = vrot.slane %v2688_v61, %v5728_v7 }
 0x2f8   : > { %v2750_v15 = vcombine.low %v2726_v44, %v2747_v16 }
 0x2f9   : > { %v2702_v46 = vrot.slane %v2695_v11, %v5728_v7  ;;  %v2449_v12 = vpop.xlane.xlu1 %2448 }
 0x2fa   : > { %v2757_v36 = vrot.slane %v2750_v15, %v5728_v7  ;;  %2486 = vst.msk [vmem:[%s5824_s19 + $0x28] sm:$0xff] %vm2480_vm3, %v2449_v12 }
 0x2fb   : > { %2981 = vst.msk [vmem:[%s5941_s22 + $0x1] ss:$4 sm:$0x3] %vm5810_vm1, %v2702_v46 }
 0x2fc   : > { %v2764_v31 = vrot.slane %v2757_v36, %v5728_v7  ;;  %2551 = vst.msk [vmem:[%s5824_s19 + $0x28] sm:$0xff] %vm2545_vm4, %v2514_v41  ;;  %v6322_v7 = vld [vmem:[#allocation62_spill] sm:$0xff] }
 0x2fd   : > { %2568 = vst.msk [vmem:[%s5824_s19 + $0x28] sm:$0xff] %vm2562_vm5, %v6321_v63 }
 0x2fe   : > { %2982 = vst.msk [vmem:[%s5941_s22 + $0x2] ss:$4 sm:$0x3] %vm5810_vm1, %v2764_v31 }
 0x308   : > { %v2473_v49 = vpop.xlane.xlu1 %2472 }
 0x309   : > { %2494 = vst.msk [vmem:[%s5824_s19 + $0x68] sm:$0xff] %vm2480_vm3, %v2473_v49 }
 0x30a   : > { %2559 = vst.msk [vmem:[%s5824_s19 + $0x68] sm:$0xff] %vm2545_vm4, %v2538_v39 }
 0x30b   : > { %2576 = vst.msk [vmem:[%s5824_s19 + $0x68] sm:$0xff] %vm2562_vm5, %v6322_v7 }
 0x317   : > { %v2517_v28 = vpop.xlane.xlu0 %2516 }
 0x31b   : > { %v2452_v24 = vpop.xlane.xlu0 %2451 }
 0x31c   : > { %2487 = vst.msk [vmem:[%s5824_s19 + $0x30] sm:$0xff] %vm2480_vm3, %v2452_v24 }
 0x31d   : > { %2552 = vst.msk [vmem:[%s5824_s19 + $0x30] sm:$0xff] %vm2545_vm4, %v2517_v28 }
 0x31e   : > { %2569 = vst.msk [vmem:[%s5824_s19 + $0x30] sm:$0xff] %vm2562_vm5, %v6323_v23 }
 0x337   : > { %v2520_v19 = vpop.xlane.xlu1 %2519 }
 0x340   : > { %v2476_v27 = vpop.xlane.xlu0 %2475 }
 0x341   : > { %2495 = vst.msk [vmem:[%s5824_s19 + $0x70] sm:$0xff] %vm2480_vm3, %v2476_v27 }
 0x342   : > { %v2455_v56 = vpop.xlane.xlu1 %2454 }
 0x343   : > { %2488 = vst.msk [vmem:[%s5824_s19 + $0x38] sm:$0xff] %vm2480_vm3, %v2455_v56 }
 0x344   : > { %2553 = vst.msk [vmem:[%s5824_s19 + $0x38] sm:$0xff] %vm2545_vm4, %v2520_v19 }
 0x345   : > { %2570 = vst.msk [vmem:[%s5824_s19 + $0x38] sm:$0xff] %vm2562_vm5, %v6324_v30 }
 0x34f   : > { %v2541_v20 = vpop.xlane.xlu0 %2540 }
 0x350   : > { %2560 = vst.msk [vmem:[%s5824_s19 + $0x70] sm:$0xff] %vm2545_vm4, %v2541_v20 }
 0x351   : > { %2577 = vst.msk [vmem:[%s5824_s19 + $0x70] sm:$0xff] %vm2562_vm5, %v6325_v58 }
 0x376   : > { %v2479_v1 = vpop.xlane.xlu1 %2478 }
 0x377   : > { %2496 = vst.msk [vmem:[%s5824_s19 + $0x78] sm:$0xff] %vm2480_vm3, %v2479_v1 }
 0x37a   : > { %v2544_v2 = vpop.xlane.xlu1 %2543 }
 0x37b   : > { %2561 = vst.msk [vmem:[%s5824_s19 + $0x78] sm:$0xff] %vm2545_vm4, %v2544_v2 }
 0x37c   : > { %2578 = vst.msk [vmem:[%s5824_s19 + $0x78] sm:$0xff] %vm2562_vm5, %v6326_v54 }
 0x37d PF: > { %s16_s17 = sadd.s32 1, %s3334_s17  }
 0x37e   : > { %p13_p5 = scmp.ge.s32.totalorder %s16_s17, 4  }
 0x380   :  { %15 = sbr.rel (!%p13_p5) target bundleno = 2 (0x2), region = 72 }

</bundles_post_ra>
